<compile_context>
chip_gen: v5e
topology: v5e:2x2
jax: 0.10.0
libtpu: 0.0.40
codegen_flags: <defaults>
</compile_context>

<pallas_src>
import jax
import jax.numpy as jnp
from jax.experimental import pallas as pl
from jax.experimental.pallas import tpu as pltpu


# ----------------------------------------------------------------------------
# Pallas kernel: full CNN2LSTM forward for one batch element (grid axis = batch)
# ----------------------------------------------------------------------------
def cnn2lstm_kernel(x_ref,     # (1, 2, S//2, CIN)  even/odd time-split input, one batch row
                    w1_ref,    # (K, CIN, C1)       conv1 weight, tap-major
                    sc1_ref,   # (1, C1)            folded BN1 scale
                    sh1_ref,   # (1, C1)            folded BN1 shift (includes conv1 bias)
                    wih1_ref,  # (C1, 4H1)          LSTM1 input weights (repacked i,f,o,g; transposed)
                    whh1_ref,  # (H1, 4H1)          LSTM1 recurrent weights (repacked; transposed)
                    b1_ref,    # (1, 4H1)           LSTM1 bias (b_ih + b_hh, repacked)
                    w2_ref,    # (K, H1, C2)        conv2 weight, tap-major
                    sc2_ref,   # (1, C2)
                    sh2_ref,   # (1, C2)
                    wih2_ref,  # (C2, 4H2)
                    whh2_ref,  # (H2, 4H2)
                    b2_ref,    # (1, 4H2)
                    fcw_ref,   # (H2, O)
                    fcb_ref,   # (1, O)
                    out_ref,   # (1, 1, O)
                    seq1_ref): # VMEM (2, ceil(T1/2), H1)  LSTM1 output sequence, even/odd layout
    f32 = jnp.float32
    S2 = x_ref.shape[2]
    K1, _, C1 = w1_ref.shape
    K2, _, C2 = w2_ref.shape
    H1 = whh1_ref.shape[0]
    H2 = whh2_ref.shape[0]
    T1 = (2 * S2 - K1) // 2 + 1
    T2 = (T1 - K2) // 2 + 1

    # ---- CNN1: stride-2 Conv1d as K tap-matmuls + folded BatchNorm(eval) + ReLU ----
    a1 = jnp.zeros((T1, C1), f32)
    for j in range(K1):                                   # static unroll over taps
        xj = x_ref[0, j % 2, pl.ds(j // 2, T1), :]        # (T1, CIN), contiguous slice
        a1 = a1 + jnp.dot(xj, w1_ref[j], preferred_element_type=f32)
    a1 = jnp.maximum(a1 * sc1_ref[...] + sh1_ref[...], 0.0)          # (T1, C1)

    # ---- LSTM1: hoisted input projection, unrolled recurrence, h/c in registers ----
    gates1 = jnp.dot(a1, wih1_ref[...], preferred_element_type=f32) + b1_ref[...]   # (T1, 4H1)
    whh1 = whh1_ref[...]
    h = jnp.zeros((1, H1), f32)
    c = jnp.zeros((1, H1), f32)
    for t in range(T1):                                   # static unroll over time
        g = gates1[t:t + 1] + jnp.dot(h, whh1, preferred_element_type=f32)   # (1, 4H1)
        sig = jax.nn.sigmoid(g[:, :3 * H1])               # (i, f, o) in one EUP pass
        gg = jnp.tanh(g[:, 3 * H1:])                      # g-gate
        c = sig[:, H1:2 * H1] * c + sig[:, :H1] * gg
        h = sig[:, 2 * H1:3 * H1] * jnp.tanh(c)
        seq1_ref[t % 2, pl.ds(t // 2, 1), :] = h          # even/odd layout for conv2 taps

    # ---- CNN2 over the LSTM1 output sequence ----
    a2 = jnp.zeros((T2, C2), f32)
    for j in range(K2):
        sj = seq1_ref[j % 2, pl.ds(j // 2, T2), :]        # (T2, H1), contiguous slice
        a2 = a2 + jnp.dot(sj, w2_ref[j], preferred_element_type=f32)
    a2 = jnp.maximum(a2 * sc2_ref[...] + sh2_ref[...], 0.0)          # (T2, C2)

    # ---- LSTM2 (only the final hidden state is needed) ----
    gates2 = jnp.dot(a2, wih2_ref[...], preferred_element_type=f32) + b2_ref[...]   # (T2, 4H2)
    whh2 = whh2_ref[...]
    h2 = jnp.zeros((1, H2), f32)
    c2 = jnp.zeros((1, H2), f32)
    for t in range(T2):
        g = gates2[t:t + 1] + jnp.dot(h2, whh2, preferred_element_type=f32)
        sig = jax.nn.sigmoid(g[:, :3 * H2])
        gg = jnp.tanh(g[:, 3 * H2:])
        c2 = sig[:, H2:2 * H2] * c2 + sig[:, :H2] * gg
        h2 = sig[:, 2 * H2:3 * H2] * jnp.tanh(c2)

    # ---- fc(out[-1, :, :]) ----
    out_ref[0, :, :] = jnp.dot(h2, fcw_ref[...], preferred_element_type=f32) + fcb_ref[...]


# ----------------------------------------------------------------------------
# Wrapper
# ----------------------------------------------------------------------------
@jax.jit
def cnn2lstm_forward(x, w1, sc1, sh1, wih1, whh1, b1,
                     w2, sc2, sh2, wih2, whh2, b2, fcw, fcb):
    """x: (batch, cnn1_input_size, seq) — same layout as the PyTorch module."""
    B, CIN, S = x.shape
    assert S % 2 == 0, "sequence length must be even for the even/odd conv split"
    S2 = S // 2
    K1 = w1.shape[0]
    K2 = w2.shape[0]
    H1 = whh1.shape[0]
    O = fcw.shape[1]
    T1 = (S - K1) // 2 + 1
    T2 = (T1 - K2) // 2 + 1
    assert T2 >= 1, "sequence too short for the two stride-2 convolutions"
    T1h = (T1 + 1) // 2

    # (B, CIN, S) -> (B, 2, S//2, CIN): time-major, split into even/odd time streams so the
    # stride-2 conv taps become contiguous (non-strided) slices inside the kernel.
    x_eo = (jnp.transpose(x, (0, 2, 1)).astype(jnp.float32)
            .reshape(B, S2, 2, CIN).transpose(0, 2, 1, 3))

    weights = (w1, sc1, sh1, wih1, whh1, b1, w2, sc2, sh2, wih2, whh2, b2, fcw, fcb)

    def full_spec(a):
        # whole array resident in VMEM; same block for every grid step (no re-DMA).
        return pl.BlockSpec(a.shape, lambda b: (0,) * a.ndim)

    out = pl.pallas_call(
        cnn2lstm_kernel,
        out_shape=jax.ShapeDtypeStruct((B, 1, O), jnp.float32),
        grid=(B,),
        in_specs=[pl.BlockSpec((1, 2, S2, CIN), lambda b: (b, 0, 0, 0))]
                 + [full_spec(a) for a in weights],
        out_specs=pl.BlockSpec((1, 1, O), lambda b: (b, 0, 0)),
        scratch_shapes=[pltpu.VMEM((2, T1h, H1), jnp.float32)],
        compiler_params=pltpu.CompilerParams(
            dimension_semantics=("parallel",)),
    )(x_eo, *weights)
    return out.reshape(B, O)


# ----------------------------------------------------------------------------
# Pure-JAX reference (mirrors the PyTorch module in eval mode)
# ----------------------------------------------------------------------------
def reference(x, conv1_w, conv1_b, bn1_g, bn1_b, bn1_m, bn1_v,
              w_ih1, w_hh1, b_ih1, b_hh1,
              conv2_w, conv2_b, bn2_g, bn2_b, bn2_m, bn2_v,
              w_ih2, w_hh2, b_ih2, b_hh2, fc_w, fc_b, eps=1e-5):
    def conv_bn_relu(inp, w, b, g, beta, m, v):
        Cout, _, K = w.shape
        L = inp.shape[2]
        T = (L - K) // 2 + 1
        out = jnp.zeros((inp.shape[0], Cout, T), jnp.float32)
        for j in range(K):
            xs = inp[:, :, j:j + 2 * (T - 1) + 1:2]          # (B, Cin, T)
            out = out + jnp.einsum('bct,oc->bot', xs, w[:, :, j])
        out = out + b[None, :, None]
        scale = g / jnp.sqrt(v + eps)
        out = out * scale[None, :, None] + (beta - m * scale)[None, :, None]
        return jnp.maximum(out, 0.0)

    def lstm(seq, w_ih, w_hh, b_ih, b_hh):
        T, Bb, _ = seq.shape
        H = w_hh.shape[1]
        h = jnp.zeros((Bb, H), jnp.float32)
        c = jnp.zeros((Bb, H), jnp.float32)
        outs = []
        for t in range(T):
            gt = seq[t] @ w_ih.T + h @ w_hh.T + b_ih + b_hh
            i = jax.nn.sigmoid(gt[:, :H])
            f = jax.nn.sigmoid(gt[:, H:2 * H])
            gg = jnp.tanh(gt[:, 2 * H:3 * H])
            o = jax.nn.sigmoid(gt[:, 3 * H:])
            c = f * c + i * gg
            h = o * jnp.tanh(c)
            outs.append(h)
        return jnp.stack(outs)

    out = conv_bn_relu(x, conv1_w, conv1_b, bn1_g, bn1_b, bn1_m, bn1_v)
    out = jnp.transpose(out, (2, 0, 1))
    out = lstm(out, w_ih1, w_hh1, b_ih1, b_hh1)
    out = jnp.transpose(out, (1, 2, 0))
    out = conv_bn_relu(out, conv2_w, conv2_b, bn2_g, bn2_b, bn2_m, bn2_v)
    out = jnp.transpose(out, (2, 0, 1))
    out = lstm(out, w_ih2, w_hh2, b_ih2, b_hh2)
    return out[-1] @ fc_w.T + fc_b


# ----------------------------------------------------------------------------
# Main
# ----------------------------------------------------------------------------
if __name__ == "__main__":
    B, CIN, S = 2, 4, 64          # batch, cnn1_input_size, input sequence length
    C1, H1 = 8, 32                # rnn1_input_size, hidden_size1
    C2, H2 = 8, 32                # rnn2_input_size, hidden_size2
    O = 8                         # output_dim
    K = 10                        # Conv1d kernel_size (fixed by the module)
    EPS = 1e-5

    key = jax.random.PRNGKey(0)
    keys = iter(jax.random.split(key, 32))

    def uni(shape, bound):
        return jax.random.uniform(next(keys), shape, jnp.float32, -bound, bound)

    # ---- PyTorch-layout parameters (deterministic) ----
    conv1_w = uni((C1, CIN, K), (CIN * K) ** -0.5)
    conv1_b = uni((C1,), (CIN * K) ** -0.5)
    bn1_g = 1.0 + 0.5 * uni((C1,), 1.0)
    bn1_b = 0.5 * uni((C1,), 1.0)
    bn1_m = 0.5 * uni((C1,), 1.0)
    bn1_v = 1.0 + 0.5 * uni((C1,), 1.0)

    w_ih1 = uni((4 * H1, C1), H1 ** -0.5)
    w_hh1 = uni((4 * H1, H1), H1 ** -0.5)
    b_ih1 = uni((4 * H1,), H1 ** -0.5)
    b_hh1 = uni((4 * H1,), H1 ** -0.5)

    conv2_w = uni((C2, H1, K), (H1 * K) ** -0.5)
    conv2_b = uni((C2,), (H1 * K) ** -0.5)
    bn2_g = 1.0 + 0.5 * uni((C2,), 1.0)
    bn2_b = 0.5 * uni((C2,), 1.0)
    bn2_m = 0.5 * uni((C2,), 1.0)
    bn2_v = 1.0 + 0.5 * uni((C2,), 1.0)

    w_ih2 = uni((4 * H2, C2), H2 ** -0.5)
    w_hh2 = uni((4 * H2, H2), H2 ** -0.5)
    b_ih2 = uni((4 * H2,), H2 ** -0.5)
    b_hh2 = uni((4 * H2,), H2 ** -0.5)

    fc_w = uni((O, H2), H2 ** -0.5)
    fc_b = uni((O,), H2 ** -0.5)

    x = jax.random.normal(next(keys), (B, CIN, S), jnp.float32)

    # ---- wrapper-side packing: BN fold, gate re-pack (i,f,g,o -> i,f,o,g), transposes ----
    def repack(w):
        Hh = w.shape[0] // 4
        return jnp.concatenate([w[:Hh], w[Hh:2 * Hh], w[3 * Hh:], w[2 * Hh:3 * Hh]], axis=0)

    def fold_bn(gamma, beta, mean, var, conv_bias):
        scale = gamma / jnp.sqrt(var + EPS)
        shift = beta - mean * scale + conv_bias * scale
        return scale[None, :], shift[None, :]

    sc1, sh1 = fold_bn(bn1_g, bn1_b, bn1_m, bn1_v, conv1_b)
    sc2, sh2 = fold_bn(bn2_g, bn2_b, bn2_m, bn2_v, conv2_b)

    w1_t = jnp.transpose(conv1_w, (2, 1, 0))            # (K, CIN, C1)
    w2_t = jnp.transpose(conv2_w, (2, 1, 0))            # (K, H1, C2)
    wih1_t = repack(w_ih1).T                            # (C1, 4H1)
    whh1_t = repack(w_hh1).T                            # (H1, 4H1)
    b1_t = (repack(b_ih1) + repack(b_hh1))[None, :]     # (1, 4H1)
    wih2_t = repack(w_ih2).T
    whh2_t = repack(w_hh2).T
    b2_t = (repack(b_ih2) + repack(b_hh2))[None, :]
    fcw_t = fc_w.T                                      # (H2, O)
    fcb_t = fc_b[None, :]                               # (1, O)

    out = cnn2lstm_forward(x, w1_t, sc1, sh1, wih1_t, whh1_t, b1_t,
                           w2_t, sc2, sh2, wih2_t, whh2_t, b2_t, fcw_t, fcb_t)
    out = jax.block_until_ready(out)

    ref = reference(x, conv1_w, conv1_b, bn1_g, bn1_b, bn1_m, bn1_v,
                    w_ih1, w_hh1, b_ih1, b_hh1,
                    conv2_w, conv2_b, bn2_g, bn2_b, bn2_m, bn2_v,
                    w_ih2, w_hh2, b_ih2, b_hh2, fc_w, fc_b)

    assert out.shape == (B, O)
    err = jnp.max(jnp.abs(out - ref))
    assert jnp.allclose(out, ref, atol=1e-4, rtol=1e-4), f"mismatch vs reference: {err}"
    print("KERNEL_OK")
</pallas_src>

<mosaic_0001>
module attributes {stable_mosaic.version = 11 : i64} {
  func.func @cnn2lstm_kernel(%arg0: i32, %arg1: memref<1x2x32x4xf32, #tpu.memory_space<vmem>>, %arg2: memref<10x4x8xf32, #tpu.memory_space<vmem>>, %arg3: memref<1x8xf32, #tpu.memory_space<vmem>>, %arg4: memref<1x8xf32, #tpu.memory_space<vmem>>, %arg5: memref<8x128xf32, #tpu.memory_space<vmem>>, %arg6: memref<32x128xf32, #tpu.memory_space<vmem>>, %arg7: memref<1x128xf32, #tpu.memory_space<vmem>>, %arg8: memref<10x32x8xf32, #tpu.memory_space<vmem>>, %arg9: memref<1x8xf32, #tpu.memory_space<vmem>>, %arg10: memref<1x8xf32, #tpu.memory_space<vmem>>, %arg11: memref<8x128xf32, #tpu.memory_space<vmem>>, %arg12: memref<32x128xf32, #tpu.memory_space<vmem>>, %arg13: memref<1x128xf32, #tpu.memory_space<vmem>>, %arg14: memref<32x8xf32, #tpu.memory_space<vmem>>, %arg15: memref<1x8xf32, #tpu.memory_space<vmem>>, %arg16: memref<1x1x8xf32, #tpu.memory_space<vmem>>, %arg17: memref<2x14x32xf32, #tpu.memory_space<vmem>>) attributes {dimension_semantics = [#tpu.dimension_semantics<parallel>], iteration_bounds = array<i64: 2>, scalar_prefetch = 0 : i64, scratch_operands = 1 : i64, tpu.core_type = #tpu.core_type<tc>, window_params = [{transform_indices = @transform_0, window_bounds = array<i64: 1, 2, 32, 4>}, {pipeline_mode = #tpu.pipeline_mode<synchronous>, transform_indices = @transform_1, window_bounds = array<i64: 10, 4, 8>}, {pipeline_mode = #tpu.pipeline_mode<synchronous>, transform_indices = @transform_2, window_bounds = array<i64: 1, 8>}, {pipeline_mode = #tpu.pipeline_mode<synchronous>, transform_indices = @transform_3, window_bounds = array<i64: 1, 8>}, {pipeline_mode = #tpu.pipeline_mode<synchronous>, transform_indices = @transform_4, window_bounds = array<i64: 8, 128>}, {pipeline_mode = #tpu.pipeline_mode<synchronous>, transform_indices = @transform_5, window_bounds = array<i64: 32, 128>}, {pipeline_mode = #tpu.pipeline_mode<synchronous>, transform_indices = @transform_6, window_bounds = array<i64: 1, 128>}, {pipeline_mode = #tpu.pipeline_mode<synchronous>, transform_indices = @transform_7, window_bounds = array<i64: 10, 32, 8>}, {pipeline_mode = #tpu.pipeline_mode<synchronous>, transform_indices = @transform_8, window_bounds = array<i64: 1, 8>}, {pipeline_mode = #tpu.pipeline_mode<synchronous>, transform_indices = @transform_9, window_bounds = array<i64: 1, 8>}, {pipeline_mode = #tpu.pipeline_mode<synchronous>, transform_indices = @transform_10, window_bounds = array<i64: 8, 128>}, {pipeline_mode = #tpu.pipeline_mode<synchronous>, transform_indices = @transform_11, window_bounds = array<i64: 32, 128>}, {pipeline_mode = #tpu.pipeline_mode<synchronous>, transform_indices = @transform_12, window_bounds = array<i64: 1, 128>}, {pipeline_mode = #tpu.pipeline_mode<synchronous>, transform_indices = @transform_13, window_bounds = array<i64: 32, 8>}, {pipeline_mode = #tpu.pipeline_mode<synchronous>, transform_indices = @transform_14, window_bounds = array<i64: 1, 8>}, {transform_indices = @transform_15, window_bounds = array<i64: 1, 1, 8>}]} {
    %cst = arith.constant 0.000000e+00 : f32
    %0 = vector.broadcast %cst : f32 to vector<28x8xf32>
    %c0 = arith.constant 0 : index
    %c0_0 = arith.constant 0 : index
    %c0_1 = arith.constant 0 : index
    %c0_2 = arith.constant 0 : index
    %1 = vector.load %arg1[%c0, %c0_0, %c0_1, %c0_2] : memref<1x2x32x4xf32, #tpu.memory_space<vmem>>, vector<1x1x28x4xf32>
    %2 = vector.shape_cast %1 : vector<1x1x28x4xf32> to vector<28x4xf32>
    %c0_3 = arith.constant 0 : index
    %c0_4 = arith.constant 0 : index
    %c0_5 = arith.constant 0 : index
    %3 = vector.load %arg2[%c0_3, %c0_4, %c0_5] : memref<10x4x8xf32, #tpu.memory_space<vmem>>, vector<1x4x8xf32>
    %4 = vector.shape_cast %3 : vector<1x4x8xf32> to vector<4x8xf32>
    %cst_6 = arith.constant dense<0.000000e+00> : vector<28x8xf32>
    %5 = tpu.matmul %2, %4, %cst_6 {dimension_numbers = #tpu.dot_dimension_numbers<[1], [0], [0], [1], [0, 0, 1, 1], [], []>} : vector<28x4xf32>, vector<4x8xf32>, vector<28x8xf32> -> vector<28x8xf32>
    %6 = arith.addf %0, %5 : vector<28x8xf32>
    %c0_7 = arith.constant 0 : index
    %c1 = arith.constant 1 : index
    %c0_8 = arith.constant 0 : index
    %c0_9 = arith.constant 0 : index
    %7 = vector.load %arg1[%c0_7, %c1, %c0_8, %c0_9] : memref<1x2x32x4xf32, #tpu.memory_space<vmem>>, vector<1x1x28x4xf32>
    %8 = vector.shape_cast %7 : vector<1x1x28x4xf32> to vector<28x4xf32>
    %c1_10 = arith.constant 1 : index
    %c0_11 = arith.constant 0 : index
    %c0_12 = arith.constant 0 : index
    %9 = vector.load %arg2[%c1_10, %c0_11, %c0_12] : memref<10x4x8xf32, #tpu.memory_space<vmem>>, vector<1x4x8xf32>
    %10 = vector.shape_cast %9 : vector<1x4x8xf32> to vector<4x8xf32>
    %cst_13 = arith.constant dense<0.000000e+00> : vector<28x8xf32>
    %11 = tpu.matmul %8, %10, %cst_13 {dimension_numbers = #tpu.dot_dimension_numbers<[1], [0], [0], [1], [0, 0, 1, 1], [], []>} : vector<28x4xf32>, vector<4x8xf32>, vector<28x8xf32> -> vector<28x8xf32>
    %12 = arith.addf %6, %11 : vector<28x8xf32>
    %c0_14 = arith.constant 0 : index
    %c0_15 = arith.constant 0 : index
    %c1_16 = arith.constant 1 : index
    %c0_17 = arith.constant 0 : index
    %13 = vector.load %arg1[%c0_14, %c0_15, %c1_16, %c0_17] : memref<1x2x32x4xf32, #tpu.memory_space<vmem>>, vector<1x1x28x4xf32>
    %14 = vector.shape_cast %13 : vector<1x1x28x4xf32> to vector<28x4xf32>
    %c2 = arith.constant 2 : index
    %c0_18 = arith.constant 0 : index
    %c0_19 = arith.constant 0 : index
    %15 = vector.load %arg2[%c2, %c0_18, %c0_19] : memref<10x4x8xf32, #tpu.memory_space<vmem>>, vector<1x4x8xf32>
    %16 = vector.shape_cast %15 : vector<1x4x8xf32> to vector<4x8xf32>
    %cst_20 = arith.constant dense<0.000000e+00> : vector<28x8xf32>
    %17 = tpu.matmul %14, %16, %cst_20 {dimension_numbers = #tpu.dot_dimension_numbers<[1], [0], [0], [1], [0, 0, 1, 1], [], []>} : vector<28x4xf32>, vector<4x8xf32>, vector<28x8xf32> -> vector<28x8xf32>
    %18 = arith.addf %12, %17 : vector<28x8xf32>
    %c0_21 = arith.constant 0 : index
    %c1_22 = arith.constant 1 : index
    %c1_23 = arith.constant 1 : index
    %c0_24 = arith.constant 0 : index
    %19 = vector.load %arg1[%c0_21, %c1_22, %c1_23, %c0_24] : memref<1x2x32x4xf32, #tpu.memory_space<vmem>>, vector<1x1x28x4xf32>
    %20 = vector.shape_cast %19 : vector<1x1x28x4xf32> to vector<28x4xf32>
    %c3 = arith.constant 3 : index
    %c0_25 = arith.constant 0 : index
    %c0_26 = arith.constant 0 : index
    %21 = vector.load %arg2[%c3, %c0_25, %c0_26] : memref<10x4x8xf32, #tpu.memory_space<vmem>>, vector<1x4x8xf32>
    %22 = vector.shape_cast %21 : vector<1x4x8xf32> to vector<4x8xf32>
    %cst_27 = arith.constant dense<0.000000e+00> : vector<28x8xf32>
    %23 = tpu.matmul %20, %22, %cst_27 {dimension_numbers = #tpu.dot_dimension_numbers<[1], [0], [0], [1], [0, 0, 1, 1], [], []>} : vector<28x4xf32>, vector<4x8xf32>, vector<28x8xf32> -> vector<28x8xf32>
    %24 = arith.addf %18, %23 : vector<28x8xf32>
    %c0_28 = arith.constant 0 : index
    %c0_29 = arith.constant 0 : index
    %c2_30 = arith.constant 2 : index
    %c0_31 = arith.constant 0 : index
    %25 = vector.load %arg1[%c0_28, %c0_29, %c2_30, %c0_31] : memref<1x2x32x4xf32, #tpu.memory_space<vmem>>, vector<1x1x28x4xf32>
    %26 = vector.shape_cast %25 : vector<1x1x28x4xf32> to vector<28x4xf32>
    %c4 = arith.constant 4 : index
    %c0_32 = arith.constant 0 : index
    %c0_33 = arith.constant 0 : index
    %27 = vector.load %arg2[%c4, %c0_32, %c0_33] : memref<10x4x8xf32, #tpu.memory_space<vmem>>, vector<1x4x8xf32>
    %28 = vector.shape_cast %27 : vector<1x4x8xf32> to vector<4x8xf32>
    %cst_34 = arith.constant dense<0.000000e+00> : vector<28x8xf32>
    %29 = tpu.matmul %26, %28, %cst_34 {dimension_numbers = #tpu.dot_dimension_numbers<[1], [0], [0], [1], [0, 0, 1, 1], [], []>} : vector<28x4xf32>, vector<4x8xf32>, vector<28x8xf32> -> vector<28x8xf32>
    %30 = arith.addf %24, %29 : vector<28x8xf32>
    %c0_35 = arith.constant 0 : index
    %c1_36 = arith.constant 1 : index
    %c2_37 = arith.constant 2 : index
    %c0_38 = arith.constant 0 : index
    %31 = vector.load %arg1[%c0_35, %c1_36, %c2_37, %c0_38] : memref<1x2x32x4xf32, #tpu.memory_space<vmem>>, vector<1x1x28x4xf32>
    %32 = vector.shape_cast %31 : vector<1x1x28x4xf32> to vector<28x4xf32>
    %c5 = arith.constant 5 : index
    %c0_39 = arith.constant 0 : index
    %c0_40 = arith.constant 0 : index
    %33 = vector.load %arg2[%c5, %c0_39, %c0_40] : memref<10x4x8xf32, #tpu.memory_space<vmem>>, vector<1x4x8xf32>
    %34 = vector.shape_cast %33 : vector<1x4x8xf32> to vector<4x8xf32>
    %cst_41 = arith.constant dense<0.000000e+00> : vector<28x8xf32>
    %35 = tpu.matmul %32, %34, %cst_41 {dimension_numbers = #tpu.dot_dimension_numbers<[1], [0], [0], [1], [0, 0, 1, 1], [], []>} : vector<28x4xf32>, vector<4x8xf32>, vector<28x8xf32> -> vector<28x8xf32>
    %36 = arith.addf %30, %35 : vector<28x8xf32>
    %c0_42 = arith.constant 0 : index
    %c0_43 = arith.constant 0 : index
    %c3_44 = arith.constant 3 : index
    %c0_45 = arith.constant 0 : index
    %37 = vector.load %arg1[%c0_42, %c0_43, %c3_44, %c0_45] : memref<1x2x32x4xf32, #tpu.memory_space<vmem>>, vector<1x1x28x4xf32>
    %38 = vector.shape_cast %37 : vector<1x1x28x4xf32> to vector<28x4xf32>
    %c6 = arith.constant 6 : index
    %c0_46 = arith.constant 0 : index
    %c0_47 = arith.constant 0 : index
    %39 = vector.load %arg2[%c6, %c0_46, %c0_47] : memref<10x4x8xf32, #tpu.memory_space<vmem>>, vector<1x4x8xf32>
    %40 = vector.shape_cast %39 : vector<1x4x8xf32> to vector<4x8xf32>
    %cst_48 = arith.constant dense<0.000000e+00> : vector<28x8xf32>
    %41 = tpu.matmul %38, %40, %cst_48 {dimension_numbers = #tpu.dot_dimension_numbers<[1], [0], [0], [1], [0, 0, 1, 1], [], []>} : vector<28x4xf32>, vector<4x8xf32>, vector<28x8xf32> -> vector<28x8xf32>
    %42 = arith.addf %36, %41 : vector<28x8xf32>
    %c0_49 = arith.constant 0 : index
    %c1_50 = arith.constant 1 : index
    %c3_51 = arith.constant 3 : index
    %c0_52 = arith.constant 0 : index
    %43 = vector.load %arg1[%c0_49, %c1_50, %c3_51, %c0_52] : memref<1x2x32x4xf32, #tpu.memory_space<vmem>>, vector<1x1x28x4xf32>
    %44 = vector.shape_cast %43 : vector<1x1x28x4xf32> to vector<28x4xf32>
    %c7 = arith.constant 7 : index
    %c0_53 = arith.constant 0 : index
    %c0_54 = arith.constant 0 : index
    %45 = vector.load %arg2[%c7, %c0_53, %c0_54] : memref<10x4x8xf32, #tpu.memory_space<vmem>>, vector<1x4x8xf32>
    %46 = vector.shape_cast %45 : vector<1x4x8xf32> to vector<4x8xf32>
    %cst_55 = arith.constant dense<0.000000e+00> : vector<28x8xf32>
    %47 = tpu.matmul %44, %46, %cst_55 {dimension_numbers = #tpu.dot_dimension_numbers<[1], [0], [0], [1], [0, 0, 1, 1], [], []>} : vector<28x4xf32>, vector<4x8xf32>, vector<28x8xf32> -> vector<28x8xf32>
    %48 = arith.addf %42, %47 : vector<28x8xf32>
    %c0_56 = arith.constant 0 : index
    %c0_57 = arith.constant 0 : index
    %c4_58 = arith.constant 4 : index
    %c0_59 = arith.constant 0 : index
    %49 = vector.load %arg1[%c0_56, %c0_57, %c4_58, %c0_59] : memref<1x2x32x4xf32, #tpu.memory_space<vmem>>, vector<1x1x28x4xf32>
    %50 = vector.shape_cast %49 : vector<1x1x28x4xf32> to vector<28x4xf32>
    %c8 = arith.constant 8 : index
    %c0_60 = arith.constant 0 : index
    %c0_61 = arith.constant 0 : index
    %51 = vector.load %arg2[%c8, %c0_60, %c0_61] : memref<10x4x8xf32, #tpu.memory_space<vmem>>, vector<1x4x8xf32>
    %52 = vector.shape_cast %51 : vector<1x4x8xf32> to vector<4x8xf32>
    %cst_62 = arith.constant dense<0.000000e+00> : vector<28x8xf32>
    %53 = tpu.matmul %50, %52, %cst_62 {dimension_numbers = #tpu.dot_dimension_numbers<[1], [0], [0], [1], [0, 0, 1, 1], [], []>} : vector<28x4xf32>, vector<4x8xf32>, vector<28x8xf32> -> vector<28x8xf32>
    %54 = arith.addf %48, %53 : vector<28x8xf32>
    %c0_63 = arith.constant 0 : index
    %c1_64 = arith.constant 1 : index
    %c4_65 = arith.constant 4 : index
    %c0_66 = arith.constant 0 : index
    %55 = vector.load %arg1[%c0_63, %c1_64, %c4_65, %c0_66] : memref<1x2x32x4xf32, #tpu.memory_space<vmem>>, vector<1x1x28x4xf32>
    %56 = vector.shape_cast %55 : vector<1x1x28x4xf32> to vector<28x4xf32>
    %c9 = arith.constant 9 : index
    %c0_67 = arith.constant 0 : index
    %c0_68 = arith.constant 0 : index
    %57 = vector.load %arg2[%c9, %c0_67, %c0_68] : memref<10x4x8xf32, #tpu.memory_space<vmem>>, vector<1x4x8xf32>
    %58 = vector.shape_cast %57 : vector<1x4x8xf32> to vector<4x8xf32>
    %cst_69 = arith.constant dense<0.000000e+00> : vector<28x8xf32>
    %59 = tpu.matmul %56, %58, %cst_69 {dimension_numbers = #tpu.dot_dimension_numbers<[1], [0], [0], [1], [0, 0, 1, 1], [], []>} : vector<28x4xf32>, vector<4x8xf32>, vector<28x8xf32> -> vector<28x8xf32>
    %60 = arith.addf %54, %59 : vector<28x8xf32>
    %c0_70 = arith.constant 0 : index
    %c0_71 = arith.constant 0 : index
    %61 = vector.load %arg3[%c0_70, %c0_71] : memref<1x8xf32, #tpu.memory_space<vmem>>, vector<1x8xf32>
    %62 = vector.broadcast %61 : vector<1x8xf32> to vector<28x8xf32>
    %63 = arith.mulf %60, %62 : vector<28x8xf32>
    %c0_72 = arith.constant 0 : index
    %c0_73 = arith.constant 0 : index
    %64 = vector.load %arg4[%c0_72, %c0_73] : memref<1x8xf32, #tpu.memory_space<vmem>>, vector<1x8xf32>
    %65 = vector.broadcast %64 : vector<1x8xf32> to vector<28x8xf32>
    %66 = arith.addf %63, %65 : vector<28x8xf32>
    %cst_74 = arith.constant 0.000000e+00 : f32
    %67 = vector.broadcast %cst_74 : f32 to vector<28x8xf32>
    %68 = arith.maximumf %66, %67 : vector<28x8xf32>
    %c0_75 = arith.constant 0 : index
    %c0_76 = arith.constant 0 : index
    %69 = vector.load %arg5[%c0_75, %c0_76] : memref<8x128xf32, #tpu.memory_space<vmem>>, vector<8x128xf32>
    %cst_77 = arith.constant dense<0.000000e+00> : vector<28x128xf32>
    %70 = tpu.matmul %68, %69, %cst_77 {dimension_numbers = #tpu.dot_dimension_numbers<[1], [0], [0], [1], [0, 0, 1, 1], [], []>} : vector<28x8xf32>, vector<8x128xf32>, vector<28x128xf32> -> vector<28x128xf32>
    %c0_78 = arith.constant 0 : index
    %c0_79 = arith.constant 0 : index
    %71 = vector.load %arg7[%c0_78, %c0_79] : memref<1x128xf32, #tpu.memory_space<vmem>>, vector<1x128xf32>
    %72 = vector.broadcast %71 : vector<1x128xf32> to vector<28x128xf32>
    %73 = arith.addf %70, %72 : vector<28x128xf32>
    %c0_80 = arith.constant 0 : index
    %c0_81 = arith.constant 0 : index
    %74 = vector.load %arg6[%c0_80, %c0_81] : memref<32x128xf32, #tpu.memory_space<vmem>>, vector<32x128xf32>
    %cst_82 = arith.constant 0.000000e+00 : f32
    %75 = vector.broadcast %cst_82 : f32 to vector<1x32xf32>
    %cst_83 = arith.constant 0.000000e+00 : f32
    %76 = vector.broadcast %cst_83 : f32 to vector<1x32xf32>
    %77 = vector.extract_strided_slice %73 {offsets = [0, 0], sizes = [1, 128], strides = [1, 1]} : vector<28x128xf32> to vector<1x128xf32>
    %cst_84 = arith.constant dense<0.000000e+00> : vector<1x128xf32>
    %78 = tpu.matmul %75, %74, %cst_84 {dimension_numbers = #tpu.dot_dimension_numbers<[1], [0], [0], [1], [0, 0, 1, 1], [], []>} : vector<1x32xf32>, vector<32x128xf32>, vector<1x128xf32> -> vector<1x128xf32>
    %79 = arith.addf %77, %78 : vector<1x128xf32>
    %80 = vector.extract_strided_slice %79 {offsets = [0, 0], sizes = [1, 96], strides = [1, 1]} : vector<1x128xf32> to vector<1x96xf32>
    %81 = arith.negf %80 : vector<1x96xf32>
    %82 = math.exp %81 : vector<1x96xf32>
    %cst_85 = arith.constant 1.000000e+00 : f32
    %83 = vector.broadcast %cst_85 : f32 to vector<1x96xf32>
    %84 = arith.addf %83, %82 : vector<1x96xf32>
    %85 = arith.divf %83, %84 : vector<1x96xf32>
    %86 = vector.extract_strided_slice %79 {offsets = [0, 96], sizes = [1, 32], strides = [1, 1]} : vector<1x128xf32> to vector<1x32xf32>
    %87 = math.tanh %86 : vector<1x32xf32>
    %88 = vector.extract_strided_slice %85 {offsets = [0, 32], sizes = [1, 32], strides = [1, 1]} : vector<1x96xf32> to vector<1x32xf32>
    %89 = arith.mulf %88, %76 : vector<1x32xf32>
    %90 = vector.extract_strided_slice %85 {offsets = [0, 0], sizes = [1, 32], strides = [1, 1]} : vector<1x96xf32> to vector<1x32xf32>
    %91 = arith.mulf %90, %87 : vector<1x32xf32>
    %92 = arith.addf %89, %91 : vector<1x32xf32>
    %93 = vector.extract_strided_slice %85 {offsets = [0, 64], sizes = [1, 32], strides = [1, 1]} : vector<1x96xf32> to vector<1x32xf32>
    %94 = math.tanh %92 : vector<1x32xf32>
    %95 = arith.mulf %93, %94 : vector<1x32xf32>
    %c0_86 = arith.constant 0 : index
    %c0_87 = arith.constant 0 : index
    %c0_88 = arith.constant 0 : index
    %96 = vector.load %arg17[%c0_86, %c0_87, %c0_88] : memref<2x14x32xf32, #tpu.memory_space<vmem>>, vector<1x1x32xf32>
    %97 = vector.shape_cast %96 : vector<1x1x32xf32> to vector<1x32xf32>
    %98 = vector.shape_cast %95 : vector<1x32xf32> to vector<1x1x32xf32>
    tpu.vector_store %arg17[%c0_86, %c0_87, %c0_88], %98 {strides = array<i32>} : memref<2x14x32xf32, #tpu.memory_space<vmem>>, vector<1x1x32xf32>,
    %99 = vector.extract_strided_slice %73 {offsets = [1, 0], sizes = [1, 128], strides = [1, 1]} : vector<28x128xf32> to vector<1x128xf32>
    %cst_89 = arith.constant dense<0.000000e+00> : vector<1x128xf32>
    %100 = tpu.matmul %95, %74, %cst_89 {dimension_numbers = #tpu.dot_dimension_numbers<[1], [0], [0], [1], [0, 0, 1, 1], [], []>} : vector<1x32xf32>, vector<32x128xf32>, vector<1x128xf32> -> vector<1x128xf32>
    %101 = arith.addf %99, %100 : vector<1x128xf32>
    %102 = vector.extract_strided_slice %101 {offsets = [0, 0], sizes = [1, 96], strides = [1, 1]} : vector<1x128xf32> to vector<1x96xf32>
    %103 = arith.negf %102 : vector<1x96xf32>
    %104 = math.exp %103 : vector<1x96xf32>
    %cst_90 = arith.constant 1.000000e+00 : f32
    %105 = vector.broadcast %cst_90 : f32 to vector<1x96xf32>
    %106 = arith.addf %105, %104 : vector<1x96xf32>
    %107 = arith.divf %105, %106 : vector<1x96xf32>
    %108 = vector.extract_strided_slice %101 {offsets = [0, 96], sizes = [1, 32], strides = [1, 1]} : vector<1x128xf32> to vector<1x32xf32>
    %109 = math.tanh %108 : vector<1x32xf32>
    %110 = vector.extract_strided_slice %107 {offsets = [0, 32], sizes = [1, 32], strides = [1, 1]} : vector<1x96xf32> to vector<1x32xf32>
    %111 = arith.mulf %110, %92 : vector<1x32xf32>
    %112 = vector.extract_strided_slice %107 {offsets = [0, 0], sizes = [1, 32], strides = [1, 1]} : vector<1x96xf32> to vector<1x32xf32>
    %113 = arith.mulf %112, %109 : vector<1x32xf32>
    %114 = arith.addf %111, %113 : vector<1x32xf32>
    %115 = vector.extract_strided_slice %107 {offsets = [0, 64], sizes = [1, 32], strides = [1, 1]} : vector<1x96xf32> to vector<1x32xf32>
    %116 = math.tanh %114 : vector<1x32xf32>
    %117 = arith.mulf %115, %116 : vector<1x32xf32>
    %c1_91 = arith.constant 1 : index
    %c0_92 = arith.constant 0 : index
    %c0_93 = arith.constant 0 : index
    %118 = vector.load %arg17[%c1_91, %c0_92, %c0_93] : memref<2x14x32xf32, #tpu.memory_space<vmem>>, vector<1x1x32xf32>
    %119 = vector.shape_cast %118 : vector<1x1x32xf32> to vector<1x32xf32>
    %120 = vector.shape_cast %117 : vector<1x32xf32> to vector<1x1x32xf32>
    tpu.vector_store %arg17[%c1_91, %c0_92, %c0_93], %120 {strides = array<i32>} : memref<2x14x32xf32, #tpu.memory_space<vmem>>, vector<1x1x32xf32>,
    %121 = vector.extract_strided_slice %73 {offsets = [2, 0], sizes = [1, 128], strides = [1, 1]} : vector<28x128xf32> to vector<1x128xf32>
    %cst_94 = arith.constant dense<0.000000e+00> : vector<1x128xf32>
    %122 = tpu.matmul %117, %74, %cst_94 {dimension_numbers = #tpu.dot_dimension_numbers<[1], [0], [0], [1], [0, 0, 1, 1], [], []>} : vector<1x32xf32>, vector<32x128xf32>, vector<1x128xf32> -> vector<1x128xf32>
    %123 = arith.addf %121, %122 : vector<1x128xf32>
    %124 = vector.extract_strided_slice %123 {offsets = [0, 0], sizes = [1, 96], strides = [1, 1]} : vector<1x128xf32> to vector<1x96xf32>
    %125 = arith.negf %124 : vector<1x96xf32>
    %126 = math.exp %125 : vector<1x96xf32>
    %cst_95 = arith.constant 1.000000e+00 : f32
    %127 = vector.broadcast %cst_95 : f32 to vector<1x96xf32>
    %128 = arith.addf %127, %126 : vector<1x96xf32>
    %129 = arith.divf %127, %128 : vector<1x96xf32>
    %130 = vector.extract_strided_slice %123 {offsets = [0, 96], sizes = [1, 32], strides = [1, 1]} : vector<1x128xf32> to vector<1x32xf32>
    %131 = math.tanh %130 : vector<1x32xf32>
    %132 = vector.extract_strided_slice %129 {offsets = [0, 32], sizes = [1, 32], strides = [1, 1]} : vector<1x96xf32> to vector<1x32xf32>
    %133 = arith.mulf %132, %114 : vector<1x32xf32>
    %134 = vector.extract_strided_slice %129 {offsets = [0, 0], sizes = [1, 32], strides = [1, 1]} : vector<1x96xf32> to vector<1x32xf32>
    %135 = arith.mulf %134, %131 : vector<1x32xf32>
    %136 = arith.addf %133, %135 : vector<1x32xf32>
    %137 = vector.extract_strided_slice %129 {offsets = [0, 64], sizes = [1, 32], strides = [1, 1]} : vector<1x96xf32> to vector<1x32xf32>
    %138 = math.tanh %136 : vector<1x32xf32>
    %139 = arith.mulf %137, %138 : vector<1x32xf32>
    %c0_96 = arith.constant 0 : index
    %c1_97 = arith.constant 1 : index
    %c0_98 = arith.constant 0 : index
    %140 = vector.load %arg17[%c0_96, %c1_97, %c0_98] : memref<2x14x32xf32, #tpu.memory_space<vmem>>, vector<1x1x32xf32>
    %141 = vector.shape_cast %140 : vector<1x1x32xf32> to vector<1x32xf32>
    %142 = vector.shape_cast %139 : vector<1x32xf32> to vector<1x1x32xf32>
    tpu.vector_store %arg17[%c0_96, %c1_97, %c0_98], %142 {strides = array<i32>} : memref<2x14x32xf32, #tpu.memory_space<vmem>>, vector<1x1x32xf32>,
    %143 = vector.extract_strided_slice %73 {offsets = [3, 0], sizes = [1, 128], strides = [1, 1]} : vector<28x128xf32> to vector<1x128xf32>
    %cst_99 = arith.constant dense<0.000000e+00> : vector<1x128xf32>
    %144 = tpu.matmul %139, %74, %cst_99 {dimension_numbers = #tpu.dot_dimension_numbers<[1], [0], [0], [1], [0, 0, 1, 1], [], []>} : vector<1x32xf32>, vector<32x128xf32>, vector<1x128xf32> -> vector<1x128xf32>
    %145 = arith.addf %143, %144 : vector<1x128xf32>
    %146 = vector.extract_strided_slice %145 {offsets = [0, 0], sizes = [1, 96], strides = [1, 1]} : vector<1x128xf32> to vector<1x96xf32>
    %147 = arith.negf %146 : vector<1x96xf32>
    %148 = math.exp %147 : vector<1x96xf32>
    %cst_100 = arith.constant 1.000000e+00 : f32
    %149 = vector.broadcast %cst_100 : f32 to vector<1x96xf32>
    %150 = arith.addf %149, %148 : vector<1x96xf32>
    %151 = arith.divf %149, %150 : vector<1x96xf32>
    %152 = vector.extract_strided_slice %145 {offsets = [0, 96], sizes = [1, 32], strides = [1, 1]} : vector<1x128xf32> to vector<1x32xf32>
    %153 = math.tanh %152 : vector<1x32xf32>
    %154 = vector.extract_strided_slice %151 {offsets = [0, 32], sizes = [1, 32], strides = [1, 1]} : vector<1x96xf32> to vector<1x32xf32>
    %155 = arith.mulf %154, %136 : vector<1x32xf32>
    %156 = vector.extract_strided_slice %151 {offsets = [0, 0], sizes = [1, 32], strides = [1, 1]} : vector<1x96xf32> to vector<1x32xf32>
    %157 = arith.mulf %156, %153 : vector<1x32xf32>
    %158 = arith.addf %155, %157 : vector<1x32xf32>
    %159 = vector.extract_strided_slice %151 {offsets = [0, 64], sizes = [1, 32], strides = [1, 1]} : vector<1x96xf32> to vector<1x32xf32>
    %160 = math.tanh %158 : vector<1x32xf32>
    %161 = arith.mulf %159, %160 : vector<1x32xf32>
    %c1_101 = arith.constant 1 : index
    %c1_102 = arith.constant 1 : index
    %c0_103 = arith.constant 0 : index
    %162 = vector.load %arg17[%c1_101, %c1_102, %c0_103] : memref<2x14x32xf32, #tpu.memory_space<vmem>>, vector<1x1x32xf32>
    %163 = vector.shape_cast %162 : vector<1x1x32xf32> to vector<1x32xf32>
    %164 = vector.shape_cast %161 : vector<1x32xf32> to vector<1x1x32xf32>
    tpu.vector_store %arg17[%c1_101, %c1_102, %c0_103], %164 {strides = array<i32>} : memref<2x14x32xf32, #tpu.memory_space<vmem>>, vector<1x1x32xf32>,
    %165 = vector.extract_strided_slice %73 {offsets = [4, 0], sizes = [1, 128], strides = [1, 1]} : vector<28x128xf32> to vector<1x128xf32>
    %cst_104 = arith.constant dense<0.000000e+00> : vector<1x128xf32>
    %166 = tpu.matmul %161, %74, %cst_104 {dimension_numbers = #tpu.dot_dimension_numbers<[1], [0], [0], [1], [0, 0, 1, 1], [], []>} : vector<1x32xf32>, vector<32x128xf32>, vector<1x128xf32> -> vector<1x128xf32>
    %167 = arith.addf %165, %166 : vector<1x128xf32>
    %168 = vector.extract_strided_slice %167 {offsets = [0, 0], sizes = [1, 96], strides = [1, 1]} : vector<1x128xf32> to vector<1x96xf32>
    %169 = arith.negf %168 : vector<1x96xf32>
    %170 = math.exp %169 : vector<1x96xf32>
    %cst_105 = arith.constant 1.000000e+00 : f32
    %171 = vector.broadcast %cst_105 : f32 to vector<1x96xf32>
    %172 = arith.addf %171, %170 : vector<1x96xf32>
    %173 = arith.divf %171, %172 : vector<1x96xf32>
    %174 = vector.extract_strided_slice %167 {offsets = [0, 96], sizes = [1, 32], strides = [1, 1]} : vector<1x128xf32> to vector<1x32xf32>
    %175 = math.tanh %174 : vector<1x32xf32>
    %176 = vector.extract_strided_slice %173 {offsets = [0, 32], sizes = [1, 32], strides = [1, 1]} : vector<1x96xf32> to vector<1x32xf32>
    %177 = arith.mulf %176, %158 : vector<1x32xf32>
    %178 = vector.extract_strided_slice %173 {offsets = [0, 0], sizes = [1, 32], strides = [1, 1]} : vector<1x96xf32> to vector<1x32xf32>
    %179 = arith.mulf %178, %175 : vector<1x32xf32>
    %180 = arith.addf %177, %179 : vector<1x32xf32>
    %181 = vector.extract_strided_slice %173 {offsets = [0, 64], sizes = [1, 32], strides = [1, 1]} : vector<1x96xf32> to vector<1x32xf32>
    %182 = math.tanh %180 : vector<1x32xf32>
    %183 = arith.mulf %181, %182 : vector<1x32xf32>
    %c0_106 = arith.constant 0 : index
    %c2_107 = arith.constant 2 : index
    %c0_108 = arith.constant 0 : index
    %184 = vector.load %arg17[%c0_106, %c2_107, %c0_108] : memref<2x14x32xf32, #tpu.memory_space<vmem>>, vector<1x1x32xf32>
    %185 = vector.shape_cast %184 : vector<1x1x32xf32> to vector<1x32xf32>
    %186 = vector.shape_cast %183 : vector<1x32xf32> to vector<1x1x32xf32>
    tpu.vector_store %arg17[%c0_106, %c2_107, %c0_108], %186 {strides = array<i32>} : memref<2x14x32xf32, #tpu.memory_space<vmem>>, vector<1x1x32xf32>,
    %187 = vector.extract_strided_slice %73 {offsets = [5, 0], sizes = [1, 128], strides = [1, 1]} : vector<28x128xf32> to vector<1x128xf32>
    %cst_109 = arith.constant dense<0.000000e+00> : vector<1x128xf32>
    %188 = tpu.matmul %183, %74, %cst_109 {dimension_numbers = #tpu.dot_dimension_numbers<[1], [0], [0], [1], [0, 0, 1, 1], [], []>} : vector<1x32xf32>, vector<32x128xf32>, vector<1x128xf32> -> vector<1x128xf32>
    %189 = arith.addf %187, %188 : vector<1x128xf32>
    %190 = vector.extract_strided_slice %189 {offsets = [0, 0], sizes = [1, 96], strides = [1, 1]} : vector<1x128xf32> to vector<1x96xf32>
    %191 = arith.negf %190 : vector<1x96xf32>
    %192 = math.exp %191 : vector<1x96xf32>
    %cst_110 = arith.constant 1.000000e+00 : f32
    %193 = vector.broadcast %cst_110 : f32 to vector<1x96xf32>
    %194 = arith.addf %193, %192 : vector<1x96xf32>
    %195 = arith.divf %193, %194 : vector<1x96xf32>
    %196 = vector.extract_strided_slice %189 {offsets = [0, 96], sizes = [1, 32], strides = [1, 1]} : vector<1x128xf32> to vector<1x32xf32>
    %197 = math.tanh %196 : vector<1x32xf32>
    %198 = vector.extract_strided_slice %195 {offsets = [0, 32], sizes = [1, 32], strides = [1, 1]} : vector<1x96xf32> to vector<1x32xf32>
    %199 = arith.mulf %198, %180 : vector<1x32xf32>
    %200 = vector.extract_strided_slice %195 {offsets = [0, 0], sizes = [1, 32], strides = [1, 1]} : vector<1x96xf32> to vector<1x32xf32>
    %201 = arith.mulf %200, %197 : vector<1x32xf32>
    %202 = arith.addf %199, %201 : vector<1x32xf32>
    %203 = vector.extract_strided_slice %195 {offsets = [0, 64], sizes = [1, 32], strides = [1, 1]} : vector<1x96xf32> to vector<1x32xf32>
    %204 = math.tanh %202 : vector<1x32xf32>
    %205 = arith.mulf %203, %204 : vector<1x32xf32>
    %c1_111 = arith.constant 1 : index
    %c2_112 = arith.constant 2 : index
    %c0_113 = arith.constant 0 : index
    %206 = vector.load %arg17[%c1_111, %c2_112, %c0_113] : memref<2x14x32xf32, #tpu.memory_space<vmem>>, vector<1x1x32xf32>
    %207 = vector.shape_cast %206 : vector<1x1x32xf32> to vector<1x32xf32>
    %208 = vector.shape_cast %205 : vector<1x32xf32> to vector<1x1x32xf32>
    tpu.vector_store %arg17[%c1_111, %c2_112, %c0_113], %208 {strides = array<i32>} : memref<2x14x32xf32, #tpu.memory_space<vmem>>, vector<1x1x32xf32>,
    %209 = vector.extract_strided_slice %73 {offsets = [6, 0], sizes = [1, 128], strides = [1, 1]} : vector<28x128xf32> to vector<1x128xf32>
    %cst_114 = arith.constant dense<0.000000e+00> : vector<1x128xf32>
    %210 = tpu.matmul %205, %74, %cst_114 {dimension_numbers = #tpu.dot_dimension_numbers<[1], [0], [0], [1], [0, 0, 1, 1], [], []>} : vector<1x32xf32>, vector<32x128xf32>, vector<1x128xf32> -> vector<1x128xf32>
    %211 = arith.addf %209, %210 : vector<1x128xf32>
    %212 = vector.extract_strided_slice %211 {offsets = [0, 0], sizes = [1, 96], strides = [1, 1]} : vector<1x128xf32> to vector<1x96xf32>
    %213 = arith.negf %212 : vector<1x96xf32>
    %214 = math.exp %213 : vector<1x96xf32>
    %cst_115 = arith.constant 1.000000e+00 : f32
    %215 = vector.broadcast %cst_115 : f32 to vector<1x96xf32>
    %216 = arith.addf %215, %214 : vector<1x96xf32>
    %217 = arith.divf %215, %216 : vector<1x96xf32>
    %218 = vector.extract_strided_slice %211 {offsets = [0, 96], sizes = [1, 32], strides = [1, 1]} : vector<1x128xf32> to vector<1x32xf32>
    %219 = math.tanh %218 : vector<1x32xf32>
    %220 = vector.extract_strided_slice %217 {offsets = [0, 32], sizes = [1, 32], strides = [1, 1]} : vector<1x96xf32> to vector<1x32xf32>
    %221 = arith.mulf %220, %202 : vector<1x32xf32>
    %222 = vector.extract_strided_slice %217 {offsets = [0, 0], sizes = [1, 32], strides = [1, 1]} : vector<1x96xf32> to vector<1x32xf32>
    %223 = arith.mulf %222, %219 : vector<1x32xf32>
    %224 = arith.addf %221, %223 : vector<1x32xf32>
    %225 = vector.extract_strided_slice %217 {offsets = [0, 64], sizes = [1, 32], strides = [1, 1]} : vector<1x96xf32> to vector<1x32xf32>
    %226 = math.tanh %224 : vector<1x32xf32>
    %227 = arith.mulf %225, %226 : vector<1x32xf32>
    %c0_116 = arith.constant 0 : index
    %c3_117 = arith.constant 3 : index
    %c0_118 = arith.constant 0 : index
    %228 = vector.load %arg17[%c0_116, %c3_117, %c0_118] : memref<2x14x32xf32, #tpu.memory_space<vmem>>, vector<1x1x32xf32>
    %229 = vector.shape_cast %228 : vector<1x1x32xf32> to vector<1x32xf32>
    %230 = vector.shape_cast %227 : vector<1x32xf32> to vector<1x1x32xf32>
    tpu.vector_store %arg17[%c0_116, %c3_117, %c0_118], %230 {strides = array<i32>} : memref<2x14x32xf32, #tpu.memory_space<vmem>>, vector<1x1x32xf32>,
    %231 = vector.extract_strided_slice %73 {offsets = [7, 0], sizes = [1, 128], strides = [1, 1]} : vector<28x128xf32> to vector<1x128xf32>
    %cst_119 = arith.constant dense<0.000000e+00> : vector<1x128xf32>
    %232 = tpu.matmul %227, %74, %cst_119 {dimension_numbers = #tpu.dot_dimension_numbers<[1], [0], [0], [1], [0, 0, 1, 1], [], []>} : vector<1x32xf32>, vector<32x128xf32>, vector<1x128xf32> -> vector<1x128xf32>
    %233 = arith.addf %231, %232 : vector<1x128xf32>
    %234 = vector.extract_strided_slice %233 {offsets = [0, 0], sizes = [1, 96], strides = [1, 1]} : vector<1x128xf32> to vector<1x96xf32>
    %235 = arith.negf %234 : vector<1x96xf32>
    %236 = math.exp %235 : vector<1x96xf32>
    %cst_120 = arith.constant 1.000000e+00 : f32
    %237 = vector.broadcast %cst_120 : f32 to vector<1x96xf32>
    %238 = arith.addf %237, %236 : vector<1x96xf32>
    %239 = arith.divf %237, %238 : vector<1x96xf32>
    %240 = vector.extract_strided_slice %233 {offsets = [0, 96], sizes = [1, 32], strides = [1, 1]} : vector<1x128xf32> to vector<1x32xf32>
    %241 = math.tanh %240 : vector<1x32xf32>
    %242 = vector.extract_strided_slice %239 {offsets = [0, 32], sizes = [1, 32], strides = [1, 1]} : vector<1x96xf32> to vector<1x32xf32>
    %243 = arith.mulf %242, %224 : vector<1x32xf32>
    %244 = vector.extract_strided_slice %239 {offsets = [0, 0], sizes = [1, 32], strides = [1, 1]} : vector<1x96xf32> to vector<1x32xf32>
    %245 = arith.mulf %244, %241 : vector<1x32xf32>
    %246 = arith.addf %243, %245 : vector<1x32xf32>
    %247 = vector.extract_strided_slice %239 {offsets = [0, 64], sizes = [1, 32], strides = [1, 1]} : vector<1x96xf32> to vector<1x32xf32>
    %248 = math.tanh %246 : vector<1x32xf32>
    %249 = arith.mulf %247, %248 : vector<1x32xf32>
    %c1_121 = arith.constant 1 : index
    %c3_122 = arith.constant 3 : index
    %c0_123 = arith.constant 0 : index
    %250 = vector.load %arg17[%c1_121, %c3_122, %c0_123] : memref<2x14x32xf32, #tpu.memory_space<vmem>>, vector<1x1x32xf32>
    %251 = vector.shape_cast %250 : vector<1x1x32xf32> to vector<1x32xf32>
    %252 = vector.shape_cast %249 : vector<1x32xf32> to vector<1x1x32xf32>
    tpu.vector_store %arg17[%c1_121, %c3_122, %c0_123], %252 {strides = array<i32>} : memref<2x14x32xf32, #tpu.memory_space<vmem>>, vector<1x1x32xf32>,
    %253 = vector.extract_strided_slice %73 {offsets = [8, 0], sizes = [1, 128], strides = [1, 1]} : vector<28x128xf32> to vector<1x128xf32>
    %cst_124 = arith.constant dense<0.000000e+00> : vector<1x128xf32>
    %254 = tpu.matmul %249, %74, %cst_124 {dimension_numbers = #tpu.dot_dimension_numbers<[1], [0], [0], [1], [0, 0, 1, 1], [], []>} : vector<1x32xf32>, vector<32x128xf32>, vector<1x128xf32> -> vector<1x128xf32>
    %255 = arith.addf %253, %254 : vector<1x128xf32>
    %256 = vector.extract_strided_slice %255 {offsets = [0, 0], sizes = [1, 96], strides = [1, 1]} : vector<1x128xf32> to vector<1x96xf32>
    %257 = arith.negf %256 : vector<1x96xf32>
    %258 = math.exp %257 : vector<1x96xf32>
    %cst_125 = arith.constant 1.000000e+00 : f32
    %259 = vector.broadcast %cst_125 : f32 to vector<1x96xf32>
    %260 = arith.addf %259, %258 : vector<1x96xf32>
    %261 = arith.divf %259, %260 : vector<1x96xf32>
    %262 = vector.extract_strided_slice %255 {offsets = [0, 96], sizes = [1, 32], strides = [1, 1]} : vector<1x128xf32> to vector<1x32xf32>
    %263 = math.tanh %262 : vector<1x32xf32>
    %264 = vector.extract_strided_slice %261 {offsets = [0, 32], sizes = [1, 32], strides = [1, 1]} : vector<1x96xf32> to vector<1x32xf32>
    %265 = arith.mulf %264, %246 : vector<1x32xf32>
    %266 = vector.extract_strided_slice %261 {offsets = [0, 0], sizes = [1, 32], strides = [1, 1]} : vector<1x96xf32> to vector<1x32xf32>
    %267 = arith.mulf %266, %263 : vector<1x32xf32>
    %268 = arith.addf %265, %267 : vector<1x32xf32>
    %269 = vector.extract_strided_slice %261 {offsets = [0, 64], sizes = [1, 32], strides = [1, 1]} : vector<1x96xf32> to vector<1x32xf32>
    %270 = math.tanh %268 : vector<1x32xf32>
    %271 = arith.mulf %269, %270 : vector<1x32xf32>
    %c0_126 = arith.constant 0 : index
    %c4_127 = arith.constant 4 : index
    %c0_128 = arith.constant 0 : index
    %272 = vector.load %arg17[%c0_126, %c4_127, %c0_128] : memref<2x14x32xf32, #tpu.memory_space<vmem>>, vector<1x1x32xf32>
    %273 = vector.shape_cast %272 : vector<1x1x32xf32> to vector<1x32xf32>
    %274 = vector.shape_cast %271 : vector<1x32xf32> to vector<1x1x32xf32>
    tpu.vector_store %arg17[%c0_126, %c4_127, %c0_128], %274 {strides = array<i32>} : memref<2x14x32xf32, #tpu.memory_space<vmem>>, vector<1x1x32xf32>,
    %275 = vector.extract_strided_slice %73 {offsets = [9, 0], sizes = [1, 128], strides = [1, 1]} : vector<28x128xf32> to vector<1x128xf32>
    %cst_129 = arith.constant dense<0.000000e+00> : vector<1x128xf32>
    %276 = tpu.matmul %271, %74, %cst_129 {dimension_numbers = #tpu.dot_dimension_numbers<[1], [0], [0], [1], [0, 0, 1, 1], [], []>} : vector<1x32xf32>, vector<32x128xf32>, vector<1x128xf32> -> vector<1x128xf32>
    %277 = arith.addf %275, %276 : vector<1x128xf32>
    %278 = vector.extract_strided_slice %277 {offsets = [0, 0], sizes = [1, 96], strides = [1, 1]} : vector<1x128xf32> to vector<1x96xf32>
    %279 = arith.negf %278 : vector<1x96xf32>
    %280 = math.exp %279 : vector<1x96xf32>
    %cst_130 = arith.constant 1.000000e+00 : f32
    %281 = vector.broadcast %cst_130 : f32 to vector<1x96xf32>
    %282 = arith.addf %281, %280 : vector<1x96xf32>
    %283 = arith.divf %281, %282 : vector<1x96xf32>
    %284 = vector.extract_strided_slice %277 {offsets = [0, 96], sizes = [1, 32], strides = [1, 1]} : vector<1x128xf32> to vector<1x32xf32>
    %285 = math.tanh %284 : vector<1x32xf32>
    %286 = vector.extract_strided_slice %283 {offsets = [0, 32], sizes = [1, 32], strides = [1, 1]} : vector<1x96xf32> to vector<1x32xf32>
    %287 = arith.mulf %286, %268 : vector<1x32xf32>
    %288 = vector.extract_strided_slice %283 {offsets = [0, 0], sizes = [1, 32], strides = [1, 1]} : vector<1x96xf32> to vector<1x32xf32>
    %289 = arith.mulf %288, %285 : vector<1x32xf32>
    %290 = arith.addf %287, %289 : vector<1x32xf32>
    %291 = vector.extract_strided_slice %283 {offsets = [0, 64], sizes = [1, 32], strides = [1, 1]} : vector<1x96xf32> to vector<1x32xf32>
    %292 = math.tanh %290 : vector<1x32xf32>
    %293 = arith.mulf %291, %292 : vector<1x32xf32>
    %c1_131 = arith.constant 1 : index
    %c4_132 = arith.constant 4 : index
    %c0_133 = arith.constant 0 : index
    %294 = vector.load %arg17[%c1_131, %c4_132, %c0_133] : memref<2x14x32xf32, #tpu.memory_space<vmem>>, vector<1x1x32xf32>
    %295 = vector.shape_cast %294 : vector<1x1x32xf32> to vector<1x32xf32>
    %296 = vector.shape_cast %293 : vector<1x32xf32> to vector<1x1x32xf32>
    tpu.vector_store %arg17[%c1_131, %c4_132, %c0_133], %296 {strides = array<i32>} : memref<2x14x32xf32, #tpu.memory_space<vmem>>, vector<1x1x32xf32>,
    %297 = vector.extract_strided_slice %73 {offsets = [10, 0], sizes = [1, 128], strides = [1, 1]} : vector<28x128xf32> to vector<1x128xf32>
    %cst_134 = arith.constant dense<0.000000e+00> : vector<1x128xf32>
    %298 = tpu.matmul %293, %74, %cst_134 {dimension_numbers = #tpu.dot_dimension_numbers<[1], [0], [0], [1], [0, 0, 1, 1], [], []>} : vector<1x32xf32>, vector<32x128xf32>, vector<1x128xf32> -> vector<1x128xf32>
    %299 = arith.addf %297, %298 : vector<1x128xf32>
    %300 = vector.extract_strided_slice %299 {offsets = [0, 0], sizes = [1, 96], strides = [1, 1]} : vector<1x128xf32> to vector<1x96xf32>
    %301 = arith.negf %300 : vector<1x96xf32>
    %302 = math.exp %301 : vector<1x96xf32>
    %cst_135 = arith.constant 1.000000e+00 : f32
    %303 = vector.broadcast %cst_135 : f32 to vector<1x96xf32>
    %304 = arith.addf %303, %302 : vector<1x96xf32>
    %305 = arith.divf %303, %304 : vector<1x96xf32>
    %306 = vector.extract_strided_slice %299 {offsets = [0, 96], sizes = [1, 32], strides = [1, 1]} : vector<1x128xf32> to vector<1x32xf32>
    %307 = math.tanh %306 : vector<1x32xf32>
    %308 = vector.extract_strided_slice %305 {offsets = [0, 32], sizes = [1, 32], strides = [1, 1]} : vector<1x96xf32> to vector<1x32xf32>
    %309 = arith.mulf %308, %290 : vector<1x32xf32>
    %310 = vector.extract_strided_slice %305 {offsets = [0, 0], sizes = [1, 32], strides = [1, 1]} : vector<1x96xf32> to vector<1x32xf32>
    %311 = arith.mulf %310, %307 : vector<1x32xf32>
    %312 = arith.addf %309, %311 : vector<1x32xf32>
    %313 = vector.extract_strided_slice %305 {offsets = [0, 64], sizes = [1, 32], strides = [1, 1]} : vector<1x96xf32> to vector<1x32xf32>
    %314 = math.tanh %312 : vector<1x32xf32>
    %315 = arith.mulf %313, %314 : vector<1x32xf32>
    %c0_136 = arith.constant 0 : index
    %c5_137 = arith.constant 5 : index
    %c0_138 = arith.constant 0 : index
    %316 = vector.load %arg17[%c0_136, %c5_137, %c0_138] : memref<2x14x32xf32, #tpu.memory_space<vmem>>, vector<1x1x32xf32>
    %317 = vector.shape_cast %316 : vector<1x1x32xf32> to vector<1x32xf32>
    %318 = vector.shape_cast %315 : vector<1x32xf32> to vector<1x1x32xf32>
    tpu.vector_store %arg17[%c0_136, %c5_137, %c0_138], %318 {strides = array<i32>} : memref<2x14x32xf32, #tpu.memory_space<vmem>>, vector<1x1x32xf32>,
    %319 = vector.extract_strided_slice %73 {offsets = [11, 0], sizes = [1, 128], strides = [1, 1]} : vector<28x128xf32> to vector<1x128xf32>
    %cst_139 = arith.constant dense<0.000000e+00> : vector<1x128xf32>
    %320 = tpu.matmul %315, %74, %cst_139 {dimension_numbers = #tpu.dot_dimension_numbers<[1], [0], [0], [1], [0, 0, 1, 1], [], []>} : vector<1x32xf32>, vector<32x128xf32>, vector<1x128xf32> -> vector<1x128xf32>
    %321 = arith.addf %319, %320 : vector<1x128xf32>
    %322 = vector.extract_strided_slice %321 {offsets = [0, 0], sizes = [1, 96], strides = [1, 1]} : vector<1x128xf32> to vector<1x96xf32>
    %323 = arith.negf %322 : vector<1x96xf32>
    %324 = math.exp %323 : vector<1x96xf32>
    %cst_140 = arith.constant 1.000000e+00 : f32
    %325 = vector.broadcast %cst_140 : f32 to vector<1x96xf32>
    %326 = arith.addf %325, %324 : vector<1x96xf32>
    %327 = arith.divf %325, %326 : vector<1x96xf32>
    %328 = vector.extract_strided_slice %321 {offsets = [0, 96], sizes = [1, 32], strides = [1, 1]} : vector<1x128xf32> to vector<1x32xf32>
    %329 = math.tanh %328 : vector<1x32xf32>
    %330 = vector.extract_strided_slice %327 {offsets = [0, 32], sizes = [1, 32], strides = [1, 1]} : vector<1x96xf32> to vector<1x32xf32>
    %331 = arith.mulf %330, %312 : vector<1x32xf32>
    %332 = vector.extract_strided_slice %327 {offsets = [0, 0], sizes = [1, 32], strides = [1, 1]} : vector<1x96xf32> to vector<1x32xf32>
    %333 = arith.mulf %332, %329 : vector<1x32xf32>
    %334 = arith.addf %331, %333 : vector<1x32xf32>
    %335 = vector.extract_strided_slice %327 {offsets = [0, 64], sizes = [1, 32], strides = [1, 1]} : vector<1x96xf32> to vector<1x32xf32>
    %336 = math.tanh %334 : vector<1x32xf32>
    %337 = arith.mulf %335, %336 : vector<1x32xf32>
    %c1_141 = arith.constant 1 : index
    %c5_142 = arith.constant 5 : index
    %c0_143 = arith.constant 0 : index
    %338 = vector.load %arg17[%c1_141, %c5_142, %c0_143] : memref<2x14x32xf32, #tpu.memory_space<vmem>>, vector<1x1x32xf32>
    %339 = vector.shape_cast %338 : vector<1x1x32xf32> to vector<1x32xf32>
    %340 = vector.shape_cast %337 : vector<1x32xf32> to vector<1x1x32xf32>
    tpu.vector_store %arg17[%c1_141, %c5_142, %c0_143], %340 {strides = array<i32>} : memref<2x14x32xf32, #tpu.memory_space<vmem>>, vector<1x1x32xf32>,
    %341 = vector.extract_strided_slice %73 {offsets = [12, 0], sizes = [1, 128], strides = [1, 1]} : vector<28x128xf32> to vector<1x128xf32>
    %cst_144 = arith.constant dense<0.000000e+00> : vector<1x128xf32>
    %342 = tpu.matmul %337, %74, %cst_144 {dimension_numbers = #tpu.dot_dimension_numbers<[1], [0], [0], [1], [0, 0, 1, 1], [], []>} : vector<1x32xf32>, vector<32x128xf32>, vector<1x128xf32> -> vector<1x128xf32>
    %343 = arith.addf %341, %342 : vector<1x128xf32>
    %344 = vector.extract_strided_slice %343 {offsets = [0, 0], sizes = [1, 96], strides = [1, 1]} : vector<1x128xf32> to vector<1x96xf32>
    %345 = arith.negf %344 : vector<1x96xf32>
    %346 = math.exp %345 : vector<1x96xf32>
    %cst_145 = arith.constant 1.000000e+00 : f32
    %347 = vector.broadcast %cst_145 : f32 to vector<1x96xf32>
    %348 = arith.addf %347, %346 : vector<1x96xf32>
    %349 = arith.divf %347, %348 : vector<1x96xf32>
    %350 = vector.extract_strided_slice %343 {offsets = [0, 96], sizes = [1, 32], strides = [1, 1]} : vector<1x128xf32> to vector<1x32xf32>
    %351 = math.tanh %350 : vector<1x32xf32>
    %352 = vector.extract_strided_slice %349 {offsets = [0, 32], sizes = [1, 32], strides = [1, 1]} : vector<1x96xf32> to vector<1x32xf32>
    %353 = arith.mulf %352, %334 : vector<1x32xf32>
    %354 = vector.extract_strided_slice %349 {offsets = [0, 0], sizes = [1, 32], strides = [1, 1]} : vector<1x96xf32> to vector<1x32xf32>
    %355 = arith.mulf %354, %351 : vector<1x32xf32>
    %356 = arith.addf %353, %355 : vector<1x32xf32>
    %357 = vector.extract_strided_slice %349 {offsets = [0, 64], sizes = [1, 32], strides = [1, 1]} : vector<1x96xf32> to vector<1x32xf32>
    %358 = math.tanh %356 : vector<1x32xf32>
    %359 = arith.mulf %357, %358 : vector<1x32xf32>
    %c0_146 = arith.constant 0 : index
    %c6_147 = arith.constant 6 : index
    %c0_148 = arith.constant 0 : index
    %360 = vector.load %arg17[%c0_146, %c6_147, %c0_148] : memref<2x14x32xf32, #tpu.memory_space<vmem>>, vector<1x1x32xf32>
    %361 = vector.shape_cast %360 : vector<1x1x32xf32> to vector<1x32xf32>
    %362 = vector.shape_cast %359 : vector<1x32xf32> to vector<1x1x32xf32>
    tpu.vector_store %arg17[%c0_146, %c6_147, %c0_148], %362 {strides = array<i32>} : memref<2x14x32xf32, #tpu.memory_space<vmem>>, vector<1x1x32xf32>,
    %363 = vector.extract_strided_slice %73 {offsets = [13, 0], sizes = [1, 128], strides = [1, 1]} : vector<28x128xf32> to vector<1x128xf32>
    %cst_149 = arith.constant dense<0.000000e+00> : vector<1x128xf32>
    %364 = tpu.matmul %359, %74, %cst_149 {dimension_numbers = #tpu.dot_dimension_numbers<[1], [0], [0], [1], [0, 0, 1, 1], [], []>} : vector<1x32xf32>, vector<32x128xf32>, vector<1x128xf32> -> vector<1x128xf32>
    %365 = arith.addf %363, %364 : vector<1x128xf32>
    %366 = vector.extract_strided_slice %365 {offsets = [0, 0], sizes = [1, 96], strides = [1, 1]} : vector<1x128xf32> to vector<1x96xf32>
    %367 = arith.negf %366 : vector<1x96xf32>
    %368 = math.exp %367 : vector<1x96xf32>
    %cst_150 = arith.constant 1.000000e+00 : f32
    %369 = vector.broadcast %cst_150 : f32 to vector<1x96xf32>
    %370 = arith.addf %369, %368 : vector<1x96xf32>
    %371 = arith.divf %369, %370 : vector<1x96xf32>
    %372 = vector.extract_strided_slice %365 {offsets = [0, 96], sizes = [1, 32], strides = [1, 1]} : vector<1x128xf32> to vector<1x32xf32>
    %373 = math.tanh %372 : vector<1x32xf32>
    %374 = vector.extract_strided_slice %371 {offsets = [0, 32], sizes = [1, 32], strides = [1, 1]} : vector<1x96xf32> to vector<1x32xf32>
    %375 = arith.mulf %374, %356 : vector<1x32xf32>
    %376 = vector.extract_strided_slice %371 {offsets = [0, 0], sizes = [1, 32], strides = [1, 1]} : vector<1x96xf32> to vector<1x32xf32>
    %377 = arith.mulf %376, %373 : vector<1x32xf32>
    %378 = arith.addf %375, %377 : vector<1x32xf32>
    %379 = vector.extract_strided_slice %371 {offsets = [0, 64], sizes = [1, 32], strides = [1, 1]} : vector<1x96xf32> to vector<1x32xf32>
    %380 = math.tanh %378 : vector<1x32xf32>
    %381 = arith.mulf %379, %380 : vector<1x32xf32>
    %c1_151 = arith.constant 1 : index
    %c6_152 = arith.constant 6 : index
    %c0_153 = arith.constant 0 : index
    %382 = vector.load %arg17[%c1_151, %c6_152, %c0_153] : memref<2x14x32xf32, #tpu.memory_space<vmem>>, vector<1x1x32xf32>
    %383 = vector.shape_cast %382 : vector<1x1x32xf32> to vector<1x32xf32>
    %384 = vector.shape_cast %381 : vector<1x32xf32> to vector<1x1x32xf32>
    tpu.vector_store %arg17[%c1_151, %c6_152, %c0_153], %384 {strides = array<i32>} : memref<2x14x32xf32, #tpu.memory_space<vmem>>, vector<1x1x32xf32>,
    %385 = vector.extract_strided_slice %73 {offsets = [14, 0], sizes = [1, 128], strides = [1, 1]} : vector<28x128xf32> to vector<1x128xf32>
    %cst_154 = arith.constant dense<0.000000e+00> : vector<1x128xf32>
    %386 = tpu.matmul %381, %74, %cst_154 {dimension_numbers = #tpu.dot_dimension_numbers<[1], [0], [0], [1], [0, 0, 1, 1], [], []>} : vector<1x32xf32>, vector<32x128xf32>, vector<1x128xf32> -> vector<1x128xf32>
    %387 = arith.addf %385, %386 : vector<1x128xf32>
    %388 = vector.extract_strided_slice %387 {offsets = [0, 0], sizes = [1, 96], strides = [1, 1]} : vector<1x128xf32> to vector<1x96xf32>
    %389 = arith.negf %388 : vector<1x96xf32>
    %390 = math.exp %389 : vector<1x96xf32>
    %cst_155 = arith.constant 1.000000e+00 : f32
    %391 = vector.broadcast %cst_155 : f32 to vector<1x96xf32>
    %392 = arith.addf %391, %390 : vector<1x96xf32>
    %393 = arith.divf %391, %392 : vector<1x96xf32>
    %394 = vector.extract_strided_slice %387 {offsets = [0, 96], sizes = [1, 32], strides = [1, 1]} : vector<1x128xf32> to vector<1x32xf32>
    %395 = math.tanh %394 : vector<1x32xf32>
    %396 = vector.extract_strided_slice %393 {offsets = [0, 32], sizes = [1, 32], strides = [1, 1]} : vector<1x96xf32> to vector<1x32xf32>
    %397 = arith.mulf %396, %378 : vector<1x32xf32>
    %398 = vector.extract_strided_slice %393 {offsets = [0, 0], sizes = [1, 32], strides = [1, 1]} : vector<1x96xf32> to vector<1x32xf32>
    %399 = arith.mulf %398, %395 : vector<1x32xf32>
    %400 = arith.addf %397, %399 : vector<1x32xf32>
    %401 = vector.extract_strided_slice %393 {offsets = [0, 64], sizes = [1, 32], strides = [1, 1]} : vector<1x96xf32> to vector<1x32xf32>
    %402 = math.tanh %400 : vector<1x32xf32>
    %403 = arith.mulf %401, %402 : vector<1x32xf32>
    %c0_156 = arith.constant 0 : index
    %c7_157 = arith.constant 7 : index
    %c0_158 = arith.constant 0 : index
    %404 = vector.load %arg17[%c0_156, %c7_157, %c0_158] : memref<2x14x32xf32, #tpu.memory_space<vmem>>, vector<1x1x32xf32>
    %405 = vector.shape_cast %404 : vector<1x1x32xf32> to vector<1x32xf32>
    %406 = vector.shape_cast %403 : vector<1x32xf32> to vector<1x1x32xf32>
    tpu.vector_store %arg17[%c0_156, %c7_157, %c0_158], %406 {strides = array<i32>} : memref<2x14x32xf32, #tpu.memory_space<vmem>>, vector<1x1x32xf32>,
    %407 = vector.extract_strided_slice %73 {offsets = [15, 0], sizes = [1, 128], strides = [1, 1]} : vector<28x128xf32> to vector<1x128xf32>
    %cst_159 = arith.constant dense<0.000000e+00> : vector<1x128xf32>
    %408 = tpu.matmul %403, %74, %cst_159 {dimension_numbers = #tpu.dot_dimension_numbers<[1], [0], [0], [1], [0, 0, 1, 1], [], []>} : vector<1x32xf32>, vector<32x128xf32>, vector<1x128xf32> -> vector<1x128xf32>
    %409 = arith.addf %407, %408 : vector<1x128xf32>
    %410 = vector.extract_strided_slice %409 {offsets = [0, 0], sizes = [1, 96], strides = [1, 1]} : vector<1x128xf32> to vector<1x96xf32>
    %411 = arith.negf %410 : vector<1x96xf32>
    %412 = math.exp %411 : vector<1x96xf32>
    %cst_160 = arith.constant 1.000000e+00 : f32
    %413 = vector.broadcast %cst_160 : f32 to vector<1x96xf32>
    %414 = arith.addf %413, %412 : vector<1x96xf32>
    %415 = arith.divf %413, %414 : vector<1x96xf32>
    %416 = vector.extract_strided_slice %409 {offsets = [0, 96], sizes = [1, 32], strides = [1, 1]} : vector<1x128xf32> to vector<1x32xf32>
    %417 = math.tanh %416 : vector<1x32xf32>
    %418 = vector.extract_strided_slice %415 {offsets = [0, 32], sizes = [1, 32], strides = [1, 1]} : vector<1x96xf32> to vector<1x32xf32>
    %419 = arith.mulf %418, %400 : vector<1x32xf32>
    %420 = vector.extract_strided_slice %415 {offsets = [0, 0], sizes = [1, 32], strides = [1, 1]} : vector<1x96xf32> to vector<1x32xf32>
    %421 = arith.mulf %420, %417 : vector<1x32xf32>
    %422 = arith.addf %419, %421 : vector<1x32xf32>
    %423 = vector.extract_strided_slice %415 {offsets = [0, 64], sizes = [1, 32], strides = [1, 1]} : vector<1x96xf32> to vector<1x32xf32>
    %424 = math.tanh %422 : vector<1x32xf32>
    %425 = arith.mulf %423, %424 : vector<1x32xf32>
    %c1_161 = arith.constant 1 : index
    %c7_162 = arith.constant 7 : index
    %c0_163 = arith.constant 0 : index
    %426 = vector.load %arg17[%c1_161, %c7_162, %c0_163] : memref<2x14x32xf32, #tpu.memory_space<vmem>>, vector<1x1x32xf32>
    %427 = vector.shape_cast %426 : vector<1x1x32xf32> to vector<1x32xf32>
    %428 = vector.shape_cast %425 : vector<1x32xf32> to vector<1x1x32xf32>
    tpu.vector_store %arg17[%c1_161, %c7_162, %c0_163], %428 {strides = array<i32>} : memref<2x14x32xf32, #tpu.memory_space<vmem>>, vector<1x1x32xf32>,
    %429 = vector.extract_strided_slice %73 {offsets = [16, 0], sizes = [1, 128], strides = [1, 1]} : vector<28x128xf32> to vector<1x128xf32>
    %cst_164 = arith.constant dense<0.000000e+00> : vector<1x128xf32>
    %430 = tpu.matmul %425, %74, %cst_164 {dimension_numbers = #tpu.dot_dimension_numbers<[1], [0], [0], [1], [0, 0, 1, 1], [], []>} : vector<1x32xf32>, vector<32x128xf32>, vector<1x128xf32> -> vector<1x128xf32>
    %431 = arith.addf %429, %430 : vector<1x128xf32>
    %432 = vector.extract_strided_slice %431 {offsets = [0, 0], sizes = [1, 96], strides = [1, 1]} : vector<1x128xf32> to vector<1x96xf32>
    %433 = arith.negf %432 : vector<1x96xf32>
    %434 = math.exp %433 : vector<1x96xf32>
    %cst_165 = arith.constant 1.000000e+00 : f32
    %435 = vector.broadcast %cst_165 : f32 to vector<1x96xf32>
    %436 = arith.addf %435, %434 : vector<1x96xf32>
    %437 = arith.divf %435, %436 : vector<1x96xf32>
    %438 = vector.extract_strided_slice %431 {offsets = [0, 96], sizes = [1, 32], strides = [1, 1]} : vector<1x128xf32> to vector<1x32xf32>
    %439 = math.tanh %438 : vector<1x32xf32>
    %440 = vector.extract_strided_slice %437 {offsets = [0, 32], sizes = [1, 32], strides = [1, 1]} : vector<1x96xf32> to vector<1x32xf32>
    %441 = arith.mulf %440, %422 : vector<1x32xf32>
    %442 = vector.extract_strided_slice %437 {offsets = [0, 0], sizes = [1, 32], strides = [1, 1]} : vector<1x96xf32> to vector<1x32xf32>
    %443 = arith.mulf %442, %439 : vector<1x32xf32>
    %444 = arith.addf %441, %443 : vector<1x32xf32>
    %445 = vector.extract_strided_slice %437 {offsets = [0, 64], sizes = [1, 32], strides = [1, 1]} : vector<1x96xf32> to vector<1x32xf32>
    %446 = math.tanh %444 : vector<1x32xf32>
    %447 = arith.mulf %445, %446 : vector<1x32xf32>
    %c0_166 = arith.constant 0 : index
    %c8_167 = arith.constant 8 : index
    %c0_168 = arith.constant 0 : index
    %448 = vector.load %arg17[%c0_166, %c8_167, %c0_168] : memref<2x14x32xf32, #tpu.memory_space<vmem>>, vector<1x1x32xf32>
    %449 = vector.shape_cast %448 : vector<1x1x32xf32> to vector<1x32xf32>
    %450 = vector.shape_cast %447 : vector<1x32xf32> to vector<1x1x32xf32>
    tpu.vector_store %arg17[%c0_166, %c8_167, %c0_168], %450 {strides = array<i32>} : memref<2x14x32xf32, #tpu.memory_space<vmem>>, vector<1x1x32xf32>,
    %451 = vector.extract_strided_slice %73 {offsets = [17, 0], sizes = [1, 128], strides = [1, 1]} : vector<28x128xf32> to vector<1x128xf32>
    %cst_169 = arith.constant dense<0.000000e+00> : vector<1x128xf32>
    %452 = tpu.matmul %447, %74, %cst_169 {dimension_numbers = #tpu.dot_dimension_numbers<[1], [0], [0], [1], [0, 0, 1, 1], [], []>} : vector<1x32xf32>, vector<32x128xf32>, vector<1x128xf32> -> vector<1x128xf32>
    %453 = arith.addf %451, %452 : vector<1x128xf32>
    %454 = vector.extract_strided_slice %453 {offsets = [0, 0], sizes = [1, 96], strides = [1, 1]} : vector<1x128xf32> to vector<1x96xf32>
    %455 = arith.negf %454 : vector<1x96xf32>
    %456 = math.exp %455 : vector<1x96xf32>
    %cst_170 = arith.constant 1.000000e+00 : f32
    %457 = vector.broadcast %cst_170 : f32 to vector<1x96xf32>
    %458 = arith.addf %457, %456 : vector<1x96xf32>
    %459 = arith.divf %457, %458 : vector<1x96xf32>
    %460 = vector.extract_strided_slice %453 {offsets = [0, 96], sizes = [1, 32], strides = [1, 1]} : vector<1x128xf32> to vector<1x32xf32>
    %461 = math.tanh %460 : vector<1x32xf32>
    %462 = vector.extract_strided_slice %459 {offsets = [0, 32], sizes = [1, 32], strides = [1, 1]} : vector<1x96xf32> to vector<1x32xf32>
    %463 = arith.mulf %462, %444 : vector<1x32xf32>
    %464 = vector.extract_strided_slice %459 {offsets = [0, 0], sizes = [1, 32], strides = [1, 1]} : vector<1x96xf32> to vector<1x32xf32>
    %465 = arith.mulf %464, %461 : vector<1x32xf32>
    %466 = arith.addf %463, %465 : vector<1x32xf32>
    %467 = vector.extract_strided_slice %459 {offsets = [0, 64], sizes = [1, 32], strides = [1, 1]} : vector<1x96xf32> to vector<1x32xf32>
    %468 = math.tanh %466 : vector<1x32xf32>
    %469 = arith.mulf %467, %468 : vector<1x32xf32>
    %c1_171 = arith.constant 1 : index
    %c8_172 = arith.constant 8 : index
    %c0_173 = arith.constant 0 : index
    %470 = vector.load %arg17[%c1_171, %c8_172, %c0_173] : memref<2x14x32xf32, #tpu.memory_space<vmem>>, vector<1x1x32xf32>
    %471 = vector.shape_cast %470 : vector<1x1x32xf32> to vector<1x32xf32>
    %472 = vector.shape_cast %469 : vector<1x32xf32> to vector<1x1x32xf32>
    tpu.vector_store %arg17[%c1_171, %c8_172, %c0_173], %472 {strides = array<i32>} : memref<2x14x32xf32, #tpu.memory_space<vmem>>, vector<1x1x32xf32>,
    %473 = vector.extract_strided_slice %73 {offsets = [18, 0], sizes = [1, 128], strides = [1, 1]} : vector<28x128xf32> to vector<1x128xf32>
    %cst_174 = arith.constant dense<0.000000e+00> : vector<1x128xf32>
    %474 = tpu.matmul %469, %74, %cst_174 {dimension_numbers = #tpu.dot_dimension_numbers<[1], [0], [0], [1], [0, 0, 1, 1], [], []>} : vector<1x32xf32>, vector<32x128xf32>, vector<1x128xf32> -> vector<1x128xf32>
    %475 = arith.addf %473, %474 : vector<1x128xf32>
    %476 = vector.extract_strided_slice %475 {offsets = [0, 0], sizes = [1, 96], strides = [1, 1]} : vector<1x128xf32> to vector<1x96xf32>
    %477 = arith.negf %476 : vector<1x96xf32>
    %478 = math.exp %477 : vector<1x96xf32>
    %cst_175 = arith.constant 1.000000e+00 : f32
    %479 = vector.broadcast %cst_175 : f32 to vector<1x96xf32>
    %480 = arith.addf %479, %478 : vector<1x96xf32>
    %481 = arith.divf %479, %480 : vector<1x96xf32>
    %482 = vector.extract_strided_slice %475 {offsets = [0, 96], sizes = [1, 32], strides = [1, 1]} : vector<1x128xf32> to vector<1x32xf32>
    %483 = math.tanh %482 : vector<1x32xf32>
    %484 = vector.extract_strided_slice %481 {offsets = [0, 32], sizes = [1, 32], strides = [1, 1]} : vector<1x96xf32> to vector<1x32xf32>
    %485 = arith.mulf %484, %466 : vector<1x32xf32>
    %486 = vector.extract_strided_slice %481 {offsets = [0, 0], sizes = [1, 32], strides = [1, 1]} : vector<1x96xf32> to vector<1x32xf32>
    %487 = arith.mulf %486, %483 : vector<1x32xf32>
    %488 = arith.addf %485, %487 : vector<1x32xf32>
    %489 = vector.extract_strided_slice %481 {offsets = [0, 64], sizes = [1, 32], strides = [1, 1]} : vector<1x96xf32> to vector<1x32xf32>
    %490 = math.tanh %488 : vector<1x32xf32>
    %491 = arith.mulf %489, %490 : vector<1x32xf32>
    %c0_176 = arith.constant 0 : index
    %c9_177 = arith.constant 9 : index
    %c0_178 = arith.constant 0 : index
    %492 = vector.load %arg17[%c0_176, %c9_177, %c0_178] : memref<2x14x32xf32, #tpu.memory_space<vmem>>, vector<1x1x32xf32>
    %493 = vector.shape_cast %492 : vector<1x1x32xf32> to vector<1x32xf32>
    %494 = vector.shape_cast %491 : vector<1x32xf32> to vector<1x1x32xf32>
    tpu.vector_store %arg17[%c0_176, %c9_177, %c0_178], %494 {strides = array<i32>} : memref<2x14x32xf32, #tpu.memory_space<vmem>>, vector<1x1x32xf32>,
    %495 = vector.extract_strided_slice %73 {offsets = [19, 0], sizes = [1, 128], strides = [1, 1]} : vector<28x128xf32> to vector<1x128xf32>
    %cst_179 = arith.constant dense<0.000000e+00> : vector<1x128xf32>
    %496 = tpu.matmul %491, %74, %cst_179 {dimension_numbers = #tpu.dot_dimension_numbers<[1], [0], [0], [1], [0, 0, 1, 1], [], []>} : vector<1x32xf32>, vector<32x128xf32>, vector<1x128xf32> -> vector<1x128xf32>
    %497 = arith.addf %495, %496 : vector<1x128xf32>
    %498 = vector.extract_strided_slice %497 {offsets = [0, 0], sizes = [1, 96], strides = [1, 1]} : vector<1x128xf32> to vector<1x96xf32>
    %499 = arith.negf %498 : vector<1x96xf32>
    %500 = math.exp %499 : vector<1x96xf32>
    %cst_180 = arith.constant 1.000000e+00 : f32
    %501 = vector.broadcast %cst_180 : f32 to vector<1x96xf32>
    %502 = arith.addf %501, %500 : vector<1x96xf32>
    %503 = arith.divf %501, %502 : vector<1x96xf32>
    %504 = vector.extract_strided_slice %497 {offsets = [0, 96], sizes = [1, 32], strides = [1, 1]} : vector<1x128xf32> to vector<1x32xf32>
    %505 = math.tanh %504 : vector<1x32xf32>
    %506 = vector.extract_strided_slice %503 {offsets = [0, 32], sizes = [1, 32], strides = [1, 1]} : vector<1x96xf32> to vector<1x32xf32>
    %507 = arith.mulf %506, %488 : vector<1x32xf32>
    %508 = vector.extract_strided_slice %503 {offsets = [0, 0], sizes = [1, 32], strides = [1, 1]} : vector<1x96xf32> to vector<1x32xf32>
    %509 = arith.mulf %508, %505 : vector<1x32xf32>
    %510 = arith.addf %507, %509 : vector<1x32xf32>
    %511 = vector.extract_strided_slice %503 {offsets = [0, 64], sizes = [1, 32], strides = [1, 1]} : vector<1x96xf32> to vector<1x32xf32>
    %512 = math.tanh %510 : vector<1x32xf32>
    %513 = arith.mulf %511, %512 : vector<1x32xf32>
    %c1_181 = arith.constant 1 : index
    %c9_182 = arith.constant 9 : index
    %c0_183 = arith.constant 0 : index
    %514 = vector.load %arg17[%c1_181, %c9_182, %c0_183] : memref<2x14x32xf32, #tpu.memory_space<vmem>>, vector<1x1x32xf32>
    %515 = vector.shape_cast %514 : vector<1x1x32xf32> to vector<1x32xf32>
    %516 = vector.shape_cast %513 : vector<1x32xf32> to vector<1x1x32xf32>
    tpu.vector_store %arg17[%c1_181, %c9_182, %c0_183], %516 {strides = array<i32>} : memref<2x14x32xf32, #tpu.memory_space<vmem>>, vector<1x1x32xf32>,
    %517 = vector.extract_strided_slice %73 {offsets = [20, 0], sizes = [1, 128], strides = [1, 1]} : vector<28x128xf32> to vector<1x128xf32>
    %cst_184 = arith.constant dense<0.000000e+00> : vector<1x128xf32>
    %518 = tpu.matmul %513, %74, %cst_184 {dimension_numbers = #tpu.dot_dimension_numbers<[1], [0], [0], [1], [0, 0, 1, 1], [], []>} : vector<1x32xf32>, vector<32x128xf32>, vector<1x128xf32> -> vector<1x128xf32>
    %519 = arith.addf %517, %518 : vector<1x128xf32>
    %520 = vector.extract_strided_slice %519 {offsets = [0, 0], sizes = [1, 96], strides = [1, 1]} : vector<1x128xf32> to vector<1x96xf32>
    %521 = arith.negf %520 : vector<1x96xf32>
    %522 = math.exp %521 : vector<1x96xf32>
    %cst_185 = arith.constant 1.000000e+00 : f32
    %523 = vector.broadcast %cst_185 : f32 to vector<1x96xf32>
    %524 = arith.addf %523, %522 : vector<1x96xf32>
    %525 = arith.divf %523, %524 : vector<1x96xf32>
    %526 = vector.extract_strided_slice %519 {offsets = [0, 96], sizes = [1, 32], strides = [1, 1]} : vector<1x128xf32> to vector<1x32xf32>
    %527 = math.tanh %526 : vector<1x32xf32>
    %528 = vector.extract_strided_slice %525 {offsets = [0, 32], sizes = [1, 32], strides = [1, 1]} : vector<1x96xf32> to vector<1x32xf32>
    %529 = arith.mulf %528, %510 : vector<1x32xf32>
    %530 = vector.extract_strided_slice %525 {offsets = [0, 0], sizes = [1, 32], strides = [1, 1]} : vector<1x96xf32> to vector<1x32xf32>
    %531 = arith.mulf %530, %527 : vector<1x32xf32>
    %532 = arith.addf %529, %531 : vector<1x32xf32>
    %533 = vector.extract_strided_slice %525 {offsets = [0, 64], sizes = [1, 32], strides = [1, 1]} : vector<1x96xf32> to vector<1x32xf32>
    %534 = math.tanh %532 : vector<1x32xf32>
    %535 = arith.mulf %533, %534 : vector<1x32xf32>
    %c0_186 = arith.constant 0 : index
    %c10 = arith.constant 10 : index
    %c0_187 = arith.constant 0 : index
    %536 = vector.load %arg17[%c0_186, %c10, %c0_187] : memref<2x14x32xf32, #tpu.memory_space<vmem>>, vector<1x1x32xf32>
    %537 = vector.shape_cast %536 : vector<1x1x32xf32> to vector<1x32xf32>
    %538 = vector.shape_cast %535 : vector<1x32xf32> to vector<1x1x32xf32>
    tpu.vector_store %arg17[%c0_186, %c10, %c0_187], %538 {strides = array<i32>} : memref<2x14x32xf32, #tpu.memory_space<vmem>>, vector<1x1x32xf32>,
    %539 = vector.extract_strided_slice %73 {offsets = [21, 0], sizes = [1, 128], strides = [1, 1]} : vector<28x128xf32> to vector<1x128xf32>
    %cst_188 = arith.constant dense<0.000000e+00> : vector<1x128xf32>
    %540 = tpu.matmul %535, %74, %cst_188 {dimension_numbers = #tpu.dot_dimension_numbers<[1], [0], [0], [1], [0, 0, 1, 1], [], []>} : vector<1x32xf32>, vector<32x128xf32>, vector<1x128xf32> -> vector<1x128xf32>
    %541 = arith.addf %539, %540 : vector<1x128xf32>
    %542 = vector.extract_strided_slice %541 {offsets = [0, 0], sizes = [1, 96], strides = [1, 1]} : vector<1x128xf32> to vector<1x96xf32>
    %543 = arith.negf %542 : vector<1x96xf32>
    %544 = math.exp %543 : vector<1x96xf32>
    %cst_189 = arith.constant 1.000000e+00 : f32
    %545 = vector.broadcast %cst_189 : f32 to vector<1x96xf32>
    %546 = arith.addf %545, %544 : vector<1x96xf32>
    %547 = arith.divf %545, %546 : vector<1x96xf32>
    %548 = vector.extract_strided_slice %541 {offsets = [0, 96], sizes = [1, 32], strides = [1, 1]} : vector<1x128xf32> to vector<1x32xf32>
    %549 = math.tanh %548 : vector<1x32xf32>
    %550 = vector.extract_strided_slice %547 {offsets = [0, 32], sizes = [1, 32], strides = [1, 1]} : vector<1x96xf32> to vector<1x32xf32>
    %551 = arith.mulf %550, %532 : vector<1x32xf32>
    %552 = vector.extract_strided_slice %547 {offsets = [0, 0], sizes = [1, 32], strides = [1, 1]} : vector<1x96xf32> to vector<1x32xf32>
    %553 = arith.mulf %552, %549 : vector<1x32xf32>
    %554 = arith.addf %551, %553 : vector<1x32xf32>
    %555 = vector.extract_strided_slice %547 {offsets = [0, 64], sizes = [1, 32], strides = [1, 1]} : vector<1x96xf32> to vector<1x32xf32>
    %556 = math.tanh %554 : vector<1x32xf32>
    %557 = arith.mulf %555, %556 : vector<1x32xf32>
    %c1_190 = arith.constant 1 : index
    %c10_191 = arith.constant 10 : index
    %c0_192 = arith.constant 0 : index
    %558 = vector.load %arg17[%c1_190, %c10_191, %c0_192] : memref<2x14x32xf32, #tpu.memory_space<vmem>>, vector<1x1x32xf32>
    %559 = vector.shape_cast %558 : vector<1x1x32xf32> to vector<1x32xf32>
    %560 = vector.shape_cast %557 : vector<1x32xf32> to vector<1x1x32xf32>
    tpu.vector_store %arg17[%c1_190, %c10_191, %c0_192], %560 {strides = array<i32>} : memref<2x14x32xf32, #tpu.memory_space<vmem>>, vector<1x1x32xf32>,
    %561 = vector.extract_strided_slice %73 {offsets = [22, 0], sizes = [1, 128], strides = [1, 1]} : vector<28x128xf32> to vector<1x128xf32>
    %cst_193 = arith.constant dense<0.000000e+00> : vector<1x128xf32>
    %562 = tpu.matmul %557, %74, %cst_193 {dimension_numbers = #tpu.dot_dimension_numbers<[1], [0], [0], [1], [0, 0, 1, 1], [], []>} : vector<1x32xf32>, vector<32x128xf32>, vector<1x128xf32> -> vector<1x128xf32>
    %563 = arith.addf %561, %562 : vector<1x128xf32>
    %564 = vector.extract_strided_slice %563 {offsets = [0, 0], sizes = [1, 96], strides = [1, 1]} : vector<1x128xf32> to vector<1x96xf32>
    %565 = arith.negf %564 : vector<1x96xf32>
    %566 = math.exp %565 : vector<1x96xf32>
    %cst_194 = arith.constant 1.000000e+00 : f32
    %567 = vector.broadcast %cst_194 : f32 to vector<1x96xf32>
    %568 = arith.addf %567, %566 : vector<1x96xf32>
    %569 = arith.divf %567, %568 : vector<1x96xf32>
    %570 = vector.extract_strided_slice %563 {offsets = [0, 96], sizes = [1, 32], strides = [1, 1]} : vector<1x128xf32> to vector<1x32xf32>
    %571 = math.tanh %570 : vector<1x32xf32>
    %572 = vector.extract_strided_slice %569 {offsets = [0, 32], sizes = [1, 32], strides = [1, 1]} : vector<1x96xf32> to vector<1x32xf32>
    %573 = arith.mulf %572, %554 : vector<1x32xf32>
    %574 = vector.extract_strided_slice %569 {offsets = [0, 0], sizes = [1, 32], strides = [1, 1]} : vector<1x96xf32> to vector<1x32xf32>
    %575 = arith.mulf %574, %571 : vector<1x32xf32>
    %576 = arith.addf %573, %575 : vector<1x32xf32>
    %577 = vector.extract_strided_slice %569 {offsets = [0, 64], sizes = [1, 32], strides = [1, 1]} : vector<1x96xf32> to vector<1x32xf32>
    %578 = math.tanh %576 : vector<1x32xf32>
    %579 = arith.mulf %577, %578 : vector<1x32xf32>
    %c0_195 = arith.constant 0 : index
    %c11 = arith.constant 11 : index
    %c0_196 = arith.constant 0 : index
    %580 = vector.load %arg17[%c0_195, %c11, %c0_196] : memref<2x14x32xf32, #tpu.memory_space<vmem>>, vector<1x1x32xf32>
    %581 = vector.shape_cast %580 : vector<1x1x32xf32> to vector<1x32xf32>
    %582 = vector.shape_cast %579 : vector<1x32xf32> to vector<1x1x32xf32>
    tpu.vector_store %arg17[%c0_195, %c11, %c0_196], %582 {strides = array<i32>} : memref<2x14x32xf32, #tpu.memory_space<vmem>>, vector<1x1x32xf32>,
    %583 = vector.extract_strided_slice %73 {offsets = [23, 0], sizes = [1, 128], strides = [1, 1]} : vector<28x128xf32> to vector<1x128xf32>
    %cst_197 = arith.constant dense<0.000000e+00> : vector<1x128xf32>
    %584 = tpu.matmul %579, %74, %cst_197 {dimension_numbers = #tpu.dot_dimension_numbers<[1], [0], [0], [1], [0, 0, 1, 1], [], []>} : vector<1x32xf32>, vector<32x128xf32>, vector<1x128xf32> -> vector<1x128xf32>
    %585 = arith.addf %583, %584 : vector<1x128xf32>
    %586 = vector.extract_strided_slice %585 {offsets = [0, 0], sizes = [1, 96], strides = [1, 1]} : vector<1x128xf32> to vector<1x96xf32>
    %587 = arith.negf %586 : vector<1x96xf32>
    %588 = math.exp %587 : vector<1x96xf32>
    %cst_198 = arith.constant 1.000000e+00 : f32
    %589 = vector.broadcast %cst_198 : f32 to vector<1x96xf32>
    %590 = arith.addf %589, %588 : vector<1x96xf32>
    %591 = arith.divf %589, %590 : vector<1x96xf32>
    %592 = vector.extract_strided_slice %585 {offsets = [0, 96], sizes = [1, 32], strides = [1, 1]} : vector<1x128xf32> to vector<1x32xf32>
    %593 = math.tanh %592 : vector<1x32xf32>
    %594 = vector.extract_strided_slice %591 {offsets = [0, 32], sizes = [1, 32], strides = [1, 1]} : vector<1x96xf32> to vector<1x32xf32>
    %595 = arith.mulf %594, %576 : vector<1x32xf32>
    %596 = vector.extract_strided_slice %591 {offsets = [0, 0], sizes = [1, 32], strides = [1, 1]} : vector<1x96xf32> to vector<1x32xf32>
    %597 = arith.mulf %596, %593 : vector<1x32xf32>
    %598 = arith.addf %595, %597 : vector<1x32xf32>
    %599 = vector.extract_strided_slice %591 {offsets = [0, 64], sizes = [1, 32], strides = [1, 1]} : vector<1x96xf32> to vector<1x32xf32>
    %600 = math.tanh %598 : vector<1x32xf32>
    %601 = arith.mulf %599, %600 : vector<1x32xf32>
    %c1_199 = arith.constant 1 : index
    %c11_200 = arith.constant 11 : index
    %c0_201 = arith.constant 0 : index
    %602 = vector.load %arg17[%c1_199, %c11_200, %c0_201] : memref<2x14x32xf32, #tpu.memory_space<vmem>>, vector<1x1x32xf32>
    %603 = vector.shape_cast %602 : vector<1x1x32xf32> to vector<1x32xf32>
    %604 = vector.shape_cast %601 : vector<1x32xf32> to vector<1x1x32xf32>
    tpu.vector_store %arg17[%c1_199, %c11_200, %c0_201], %604 {strides = array<i32>} : memref<2x14x32xf32, #tpu.memory_space<vmem>>, vector<1x1x32xf32>,
    %605 = vector.extract_strided_slice %73 {offsets = [24, 0], sizes = [1, 128], strides = [1, 1]} : vector<28x128xf32> to vector<1x128xf32>
    %cst_202 = arith.constant dense<0.000000e+00> : vector<1x128xf32>
    %606 = tpu.matmul %601, %74, %cst_202 {dimension_numbers = #tpu.dot_dimension_numbers<[1], [0], [0], [1], [0, 0, 1, 1], [], []>} : vector<1x32xf32>, vector<32x128xf32>, vector<1x128xf32> -> vector<1x128xf32>
    %607 = arith.addf %605, %606 : vector<1x128xf32>
    %608 = vector.extract_strided_slice %607 {offsets = [0, 0], sizes = [1, 96], strides = [1, 1]} : vector<1x128xf32> to vector<1x96xf32>
    %609 = arith.negf %608 : vector<1x96xf32>
    %610 = math.exp %609 : vector<1x96xf32>
    %cst_203 = arith.constant 1.000000e+00 : f32
    %611 = vector.broadcast %cst_203 : f32 to vector<1x96xf32>
    %612 = arith.addf %611, %610 : vector<1x96xf32>
    %613 = arith.divf %611, %612 : vector<1x96xf32>
    %614 = vector.extract_strided_slice %607 {offsets = [0, 96], sizes = [1, 32], strides = [1, 1]} : vector<1x128xf32> to vector<1x32xf32>
    %615 = math.tanh %614 : vector<1x32xf32>
    %616 = vector.extract_strided_slice %613 {offsets = [0, 32], sizes = [1, 32], strides = [1, 1]} : vector<1x96xf32> to vector<1x32xf32>
    %617 = arith.mulf %616, %598 : vector<1x32xf32>
    %618 = vector.extract_strided_slice %613 {offsets = [0, 0], sizes = [1, 32], strides = [1, 1]} : vector<1x96xf32> to vector<1x32xf32>
    %619 = arith.mulf %618, %615 : vector<1x32xf32>
    %620 = arith.addf %617, %619 : vector<1x32xf32>
    %621 = vector.extract_strided_slice %613 {offsets = [0, 64], sizes = [1, 32], strides = [1, 1]} : vector<1x96xf32> to vector<1x32xf32>
    %622 = math.tanh %620 : vector<1x32xf32>
    %623 = arith.mulf %621, %622 : vector<1x32xf32>
    %c0_204 = arith.constant 0 : index
    %c12 = arith.constant 12 : index
    %c0_205 = arith.constant 0 : index
    %624 = vector.load %arg17[%c0_204, %c12, %c0_205] : memref<2x14x32xf32, #tpu.memory_space<vmem>>, vector<1x1x32xf32>
    %625 = vector.shape_cast %624 : vector<1x1x32xf32> to vector<1x32xf32>
    %626 = vector.shape_cast %623 : vector<1x32xf32> to vector<1x1x32xf32>
    tpu.vector_store %arg17[%c0_204, %c12, %c0_205], %626 {strides = array<i32>} : memref<2x14x32xf32, #tpu.memory_space<vmem>>, vector<1x1x32xf32>,
    %627 = vector.extract_strided_slice %73 {offsets = [25, 0], sizes = [1, 128], strides = [1, 1]} : vector<28x128xf32> to vector<1x128xf32>
    %cst_206 = arith.constant dense<0.000000e+00> : vector<1x128xf32>
    %628 = tpu.matmul %623, %74, %cst_206 {dimension_numbers = #tpu.dot_dimension_numbers<[1], [0], [0], [1], [0, 0, 1, 1], [], []>} : vector<1x32xf32>, vector<32x128xf32>, vector<1x128xf32> -> vector<1x128xf32>
    %629 = arith.addf %627, %628 : vector<1x128xf32>
    %630 = vector.extract_strided_slice %629 {offsets = [0, 0], sizes = [1, 96], strides = [1, 1]} : vector<1x128xf32> to vector<1x96xf32>
    %631 = arith.negf %630 : vector<1x96xf32>
    %632 = math.exp %631 : vector<1x96xf32>
    %cst_207 = arith.constant 1.000000e+00 : f32
    %633 = vector.broadcast %cst_207 : f32 to vector<1x96xf32>
    %634 = arith.addf %633, %632 : vector<1x96xf32>
    %635 = arith.divf %633, %634 : vector<1x96xf32>
    %636 = vector.extract_strided_slice %629 {offsets = [0, 96], sizes = [1, 32], strides = [1, 1]} : vector<1x128xf32> to vector<1x32xf32>
    %637 = math.tanh %636 : vector<1x32xf32>
    %638 = vector.extract_strided_slice %635 {offsets = [0, 32], sizes = [1, 32], strides = [1, 1]} : vector<1x96xf32> to vector<1x32xf32>
    %639 = arith.mulf %638, %620 : vector<1x32xf32>
    %640 = vector.extract_strided_slice %635 {offsets = [0, 0], sizes = [1, 32], strides = [1, 1]} : vector<1x96xf32> to vector<1x32xf32>
    %641 = arith.mulf %640, %637 : vector<1x32xf32>
    %642 = arith.addf %639, %641 : vector<1x32xf32>
    %643 = vector.extract_strided_slice %635 {offsets = [0, 64], sizes = [1, 32], strides = [1, 1]} : vector<1x96xf32> to vector<1x32xf32>
    %644 = math.tanh %642 : vector<1x32xf32>
    %645 = arith.mulf %643, %644 : vector<1x32xf32>
    %c1_208 = arith.constant 1 : index
    %c12_209 = arith.constant 12 : index
    %c0_210 = arith.constant 0 : index
    %646 = vector.load %arg17[%c1_208, %c12_209, %c0_210] : memref<2x14x32xf32, #tpu.memory_space<vmem>>, vector<1x1x32xf32>
    %647 = vector.shape_cast %646 : vector<1x1x32xf32> to vector<1x32xf32>
    %648 = vector.shape_cast %645 : vector<1x32xf32> to vector<1x1x32xf32>
    tpu.vector_store %arg17[%c1_208, %c12_209, %c0_210], %648 {strides = array<i32>} : memref<2x14x32xf32, #tpu.memory_space<vmem>>, vector<1x1x32xf32>,
    %649 = vector.extract_strided_slice %73 {offsets = [26, 0], sizes = [1, 128], strides = [1, 1]} : vector<28x128xf32> to vector<1x128xf32>
    %cst_211 = arith.constant dense<0.000000e+00> : vector<1x128xf32>
    %650 = tpu.matmul %645, %74, %cst_211 {dimension_numbers = #tpu.dot_dimension_numbers<[1], [0], [0], [1], [0, 0, 1, 1], [], []>} : vector<1x32xf32>, vector<32x128xf32>, vector<1x128xf32> -> vector<1x128xf32>
    %651 = arith.addf %649, %650 : vector<1x128xf32>
    %652 = vector.extract_strided_slice %651 {offsets = [0, 0], sizes = [1, 96], strides = [1, 1]} : vector<1x128xf32> to vector<1x96xf32>
    %653 = arith.negf %652 : vector<1x96xf32>
    %654 = math.exp %653 : vector<1x96xf32>
    %cst_212 = arith.constant 1.000000e+00 : f32
    %655 = vector.broadcast %cst_212 : f32 to vector<1x96xf32>
    %656 = arith.addf %655, %654 : vector<1x96xf32>
    %657 = arith.divf %655, %656 : vector<1x96xf32>
    %658 = vector.extract_strided_slice %651 {offsets = [0, 96], sizes = [1, 32], strides = [1, 1]} : vector<1x128xf32> to vector<1x32xf32>
    %659 = math.tanh %658 : vector<1x32xf32>
    %660 = vector.extract_strided_slice %657 {offsets = [0, 32], sizes = [1, 32], strides = [1, 1]} : vector<1x96xf32> to vector<1x32xf32>
    %661 = arith.mulf %660, %642 : vector<1x32xf32>
    %662 = vector.extract_strided_slice %657 {offsets = [0, 0], sizes = [1, 32], strides = [1, 1]} : vector<1x96xf32> to vector<1x32xf32>
    %663 = arith.mulf %662, %659 : vector<1x32xf32>
    %664 = arith.addf %661, %663 : vector<1x32xf32>
    %665 = vector.extract_strided_slice %657 {offsets = [0, 64], sizes = [1, 32], strides = [1, 1]} : vector<1x96xf32> to vector<1x32xf32>
    %666 = math.tanh %664 : vector<1x32xf32>
    %667 = arith.mulf %665, %666 : vector<1x32xf32>
    %c0_213 = arith.constant 0 : index
    %c13 = arith.constant 13 : index
    %c0_214 = arith.constant 0 : index
    %668 = vector.load %arg17[%c0_213, %c13, %c0_214] : memref<2x14x32xf32, #tpu.memory_space<vmem>>, vector<1x1x32xf32>
    %669 = vector.shape_cast %668 : vector<1x1x32xf32> to vector<1x32xf32>
    %670 = vector.shape_cast %667 : vector<1x32xf32> to vector<1x1x32xf32>
    tpu.vector_store %arg17[%c0_213, %c13, %c0_214], %670 {strides = array<i32>} : memref<2x14x32xf32, #tpu.memory_space<vmem>>, vector<1x1x32xf32>,
    %671 = vector.extract_strided_slice %73 {offsets = [27, 0], sizes = [1, 128], strides = [1, 1]} : vector<28x128xf32> to vector<1x128xf32>
    %cst_215 = arith.constant dense<0.000000e+00> : vector<1x128xf32>
    %672 = tpu.matmul %667, %74, %cst_215 {dimension_numbers = #tpu.dot_dimension_numbers<[1], [0], [0], [1], [0, 0, 1, 1], [], []>} : vector<1x32xf32>, vector<32x128xf32>, vector<1x128xf32> -> vector<1x128xf32>
    %673 = arith.addf %671, %672 : vector<1x128xf32>
    %674 = vector.extract_strided_slice %673 {offsets = [0, 0], sizes = [1, 96], strides = [1, 1]} : vector<1x128xf32> to vector<1x96xf32>
    %675 = arith.negf %674 : vector<1x96xf32>
    %676 = math.exp %675 : vector<1x96xf32>
    %cst_216 = arith.constant 1.000000e+00 : f32
    %677 = vector.broadcast %cst_216 : f32 to vector<1x96xf32>
    %678 = arith.addf %677, %676 : vector<1x96xf32>
    %679 = arith.divf %677, %678 : vector<1x96xf32>
    %680 = vector.extract_strided_slice %673 {offsets = [0, 96], sizes = [1, 32], strides = [1, 1]} : vector<1x128xf32> to vector<1x32xf32>
    %681 = math.tanh %680 : vector<1x32xf32>
    %682 = vector.extract_strided_slice %679 {offsets = [0, 32], sizes = [1, 32], strides = [1, 1]} : vector<1x96xf32> to vector<1x32xf32>
    %683 = arith.mulf %682, %664 : vector<1x32xf32>
    %684 = vector.extract_strided_slice %679 {offsets = [0, 0], sizes = [1, 32], strides = [1, 1]} : vector<1x96xf32> to vector<1x32xf32>
    %685 = arith.mulf %684, %681 : vector<1x32xf32>
    %686 = arith.addf %683, %685 : vector<1x32xf32>
    %687 = vector.extract_strided_slice %679 {offsets = [0, 64], sizes = [1, 32], strides = [1, 1]} : vector<1x96xf32> to vector<1x32xf32>
    %688 = math.tanh %686 : vector<1x32xf32>
    %689 = arith.mulf %687, %688 : vector<1x32xf32>
    %c1_217 = arith.constant 1 : index
    %c13_218 = arith.constant 13 : index
    %c0_219 = arith.constant 0 : index
    %690 = vector.load %arg17[%c1_217, %c13_218, %c0_219] : memref<2x14x32xf32, #tpu.memory_space<vmem>>, vector<1x1x32xf32>
    %691 = vector.shape_cast %690 : vector<1x1x32xf32> to vector<1x32xf32>
    %692 = vector.shape_cast %689 : vector<1x32xf32> to vector<1x1x32xf32>
    tpu.vector_store %arg17[%c1_217, %c13_218, %c0_219], %692 {strides = array<i32>} : memref<2x14x32xf32, #tpu.memory_space<vmem>>, vector<1x1x32xf32>,
    %cst_220 = arith.constant 0.000000e+00 : f32
    %693 = vector.broadcast %cst_220 : f32 to vector<10x8xf32>
    %c0_221 = arith.constant 0 : index
    %c0_222 = arith.constant 0 : index
    %c0_223 = arith.constant 0 : index
    %694 = vector.load %arg17[%c0_221, %c0_222, %c0_223] : memref<2x14x32xf32, #tpu.memory_space<vmem>>, vector<1x10x32xf32>
    %695 = vector.shape_cast %694 : vector<1x10x32xf32> to vector<10x32xf32>
    %c0_224 = arith.constant 0 : index
    %c0_225 = arith.constant 0 : index
    %c0_226 = arith.constant 0 : index
    %696 = vector.load %arg8[%c0_224, %c0_225, %c0_226] : memref<10x32x8xf32, #tpu.memory_space<vmem>>, vector<1x32x8xf32>
    %697 = vector.shape_cast %696 : vector<1x32x8xf32> to vector<32x8xf32>
    %cst_227 = arith.constant dense<0.000000e+00> : vector<10x8xf32>
    %698 = tpu.matmul %695, %697, %cst_227 {dimension_numbers = #tpu.dot_dimension_numbers<[1], [0], [0], [1], [0, 0, 1, 1], [], []>} : vector<10x32xf32>, vector<32x8xf32>, vector<10x8xf32> -> vector<10x8xf32>
    %699 = arith.addf %693, %698 : vector<10x8xf32>
    %c1_228 = arith.constant 1 : index
    %c0_229 = arith.constant 0 : index
    %c0_230 = arith.constant 0 : index
    %700 = vector.load %arg17[%c1_228, %c0_229, %c0_230] : memref<2x14x32xf32, #tpu.memory_space<vmem>>, vector<1x10x32xf32>
    %701 = vector.shape_cast %700 : vector<1x10x32xf32> to vector<10x32xf32>
    %c1_231 = arith.constant 1 : index
    %c0_232 = arith.constant 0 : index
    %c0_233 = arith.constant 0 : index
    %702 = vector.load %arg8[%c1_231, %c0_232, %c0_233] : memref<10x32x8xf32, #tpu.memory_space<vmem>>, vector<1x32x8xf32>
    %703 = vector.shape_cast %702 : vector<1x32x8xf32> to vector<32x8xf32>
    %cst_234 = arith.constant dense<0.000000e+00> : vector<10x8xf32>
    %704 = tpu.matmul %701, %703, %cst_234 {dimension_numbers = #tpu.dot_dimension_numbers<[1], [0], [0], [1], [0, 0, 1, 1], [], []>} : vector<10x32xf32>, vector<32x8xf32>, vector<10x8xf32> -> vector<10x8xf32>
    %705 = arith.addf %699, %704 : vector<10x8xf32>
    %c0_235 = arith.constant 0 : index
    %c1_236 = arith.constant 1 : index
    %c0_237 = arith.constant 0 : index
    %706 = vector.load %arg17[%c0_235, %c1_236, %c0_237] : memref<2x14x32xf32, #tpu.memory_space<vmem>>, vector<1x10x32xf32>
    %707 = vector.shape_cast %706 : vector<1x10x32xf32> to vector<10x32xf32>
    %c2_238 = arith.constant 2 : index
    %c0_239 = arith.constant 0 : index
    %c0_240 = arith.constant 0 : index
    %708 = vector.load %arg8[%c2_238, %c0_239, %c0_240] : memref<10x32x8xf32, #tpu.memory_space<vmem>>, vector<1x32x8xf32>
    %709 = vector.shape_cast %708 : vector<1x32x8xf32> to vector<32x8xf32>
    %cst_241 = arith.constant dense<0.000000e+00> : vector<10x8xf32>
    %710 = tpu.matmul %707, %709, %cst_241 {dimension_numbers = #tpu.dot_dimension_numbers<[1], [0], [0], [1], [0, 0, 1, 1], [], []>} : vector<10x32xf32>, vector<32x8xf32>, vector<10x8xf32> -> vector<10x8xf32>
    %711 = arith.addf %705, %710 : vector<10x8xf32>
    %c1_242 = arith.constant 1 : index
    %c1_243 = arith.constant 1 : index
    %c0_244 = arith.constant 0 : index
    %712 = vector.load %arg17[%c1_242, %c1_243, %c0_244] : memref<2x14x32xf32, #tpu.memory_space<vmem>>, vector<1x10x32xf32>
    %713 = vector.shape_cast %712 : vector<1x10x32xf32> to vector<10x32xf32>
    %c3_245 = arith.constant 3 : index
    %c0_246 = arith.constant 0 : index
    %c0_247 = arith.constant 0 : index
    %714 = vector.load %arg8[%c3_245, %c0_246, %c0_247] : memref<10x32x8xf32, #tpu.memory_space<vmem>>, vector<1x32x8xf32>
    %715 = vector.shape_cast %714 : vector<1x32x8xf32> to vector<32x8xf32>
    %cst_248 = arith.constant dense<0.000000e+00> : vector<10x8xf32>
    %716 = tpu.matmul %713, %715, %cst_248 {dimension_numbers = #tpu.dot_dimension_numbers<[1], [0], [0], [1], [0, 0, 1, 1], [], []>} : vector<10x32xf32>, vector<32x8xf32>, vector<10x8xf32> -> vector<10x8xf32>
    %717 = arith.addf %711, %716 : vector<10x8xf32>
    %c0_249 = arith.constant 0 : index
    %c2_250 = arith.constant 2 : index
    %c0_251 = arith.constant 0 : index
    %718 = vector.load %arg17[%c0_249, %c2_250, %c0_251] : memref<2x14x32xf32, #tpu.memory_space<vmem>>, vector<1x10x32xf32>
    %719 = vector.shape_cast %718 : vector<1x10x32xf32> to vector<10x32xf32>
    %c4_252 = arith.constant 4 : index
    %c0_253 = arith.constant 0 : index
    %c0_254 = arith.constant 0 : index
    %720 = vector.load %arg8[%c4_252, %c0_253, %c0_254] : memref<10x32x8xf32, #tpu.memory_space<vmem>>, vector<1x32x8xf32>
    %721 = vector.shape_cast %720 : vector<1x32x8xf32> to vector<32x8xf32>
    %cst_255 = arith.constant dense<0.000000e+00> : vector<10x8xf32>
    %722 = tpu.matmul %719, %721, %cst_255 {dimension_numbers = #tpu.dot_dimension_numbers<[1], [0], [0], [1], [0, 0, 1, 1], [], []>} : vector<10x32xf32>, vector<32x8xf32>, vector<10x8xf32> -> vector<10x8xf32>
    %723 = arith.addf %717, %722 : vector<10x8xf32>
    %c1_256 = arith.constant 1 : index
    %c2_257 = arith.constant 2 : index
    %c0_258 = arith.constant 0 : index
    %724 = vector.load %arg17[%c1_256, %c2_257, %c0_258] : memref<2x14x32xf32, #tpu.memory_space<vmem>>, vector<1x10x32xf32>
    %725 = vector.shape_cast %724 : vector<1x10x32xf32> to vector<10x32xf32>
    %c5_259 = arith.constant 5 : index
    %c0_260 = arith.constant 0 : index
    %c0_261 = arith.constant 0 : index
    %726 = vector.load %arg8[%c5_259, %c0_260, %c0_261] : memref<10x32x8xf32, #tpu.memory_space<vmem>>, vector<1x32x8xf32>
    %727 = vector.shape_cast %726 : vector<1x32x8xf32> to vector<32x8xf32>
    %cst_262 = arith.constant dense<0.000000e+00> : vector<10x8xf32>
    %728 = tpu.matmul %725, %727, %cst_262 {dimension_numbers = #tpu.dot_dimension_numbers<[1], [0], [0], [1], [0, 0, 1, 1], [], []>} : vector<10x32xf32>, vector<32x8xf32>, vector<10x8xf32> -> vector<10x8xf32>
    %729 = arith.addf %723, %728 : vector<10x8xf32>
    %c0_263 = arith.constant 0 : index
    %c3_264 = arith.constant 3 : index
    %c0_265 = arith.constant 0 : index
    %730 = vector.load %arg17[%c0_263, %c3_264, %c0_265] : memref<2x14x32xf32, #tpu.memory_space<vmem>>, vector<1x10x32xf32>
    %731 = vector.shape_cast %730 : vector<1x10x32xf32> to vector<10x32xf32>
    %c6_266 = arith.constant 6 : index
    %c0_267 = arith.constant 0 : index
    %c0_268 = arith.constant 0 : index
    %732 = vector.load %arg8[%c6_266, %c0_267, %c0_268] : memref<10x32x8xf32, #tpu.memory_space<vmem>>, vector<1x32x8xf32>
    %733 = vector.shape_cast %732 : vector<1x32x8xf32> to vector<32x8xf32>
    %cst_269 = arith.constant dense<0.000000e+00> : vector<10x8xf32>
    %734 = tpu.matmul %731, %733, %cst_269 {dimension_numbers = #tpu.dot_dimension_numbers<[1], [0], [0], [1], [0, 0, 1, 1], [], []>} : vector<10x32xf32>, vector<32x8xf32>, vector<10x8xf32> -> vector<10x8xf32>
    %735 = arith.addf %729, %734 : vector<10x8xf32>
    %c1_270 = arith.constant 1 : index
    %c3_271 = arith.constant 3 : index
    %c0_272 = arith.constant 0 : index
    %736 = vector.load %arg17[%c1_270, %c3_271, %c0_272] : memref<2x14x32xf32, #tpu.memory_space<vmem>>, vector<1x10x32xf32>
    %737 = vector.shape_cast %736 : vector<1x10x32xf32> to vector<10x32xf32>
    %c7_273 = arith.constant 7 : index
    %c0_274 = arith.constant 0 : index
    %c0_275 = arith.constant 0 : index
    %738 = vector.load %arg8[%c7_273, %c0_274, %c0_275] : memref<10x32x8xf32, #tpu.memory_space<vmem>>, vector<1x32x8xf32>
    %739 = vector.shape_cast %738 : vector<1x32x8xf32> to vector<32x8xf32>
    %cst_276 = arith.constant dense<0.000000e+00> : vector<10x8xf32>
    %740 = tpu.matmul %737, %739, %cst_276 {dimension_numbers = #tpu.dot_dimension_numbers<[1], [0], [0], [1], [0, 0, 1, 1], [], []>} : vector<10x32xf32>, vector<32x8xf32>, vector<10x8xf32> -> vector<10x8xf32>
    %741 = arith.addf %735, %740 : vector<10x8xf32>
    %c0_277 = arith.constant 0 : index
    %c4_278 = arith.constant 4 : index
    %c0_279 = arith.constant 0 : index
    %742 = vector.load %arg17[%c0_277, %c4_278, %c0_279] : memref<2x14x32xf32, #tpu.memory_space<vmem>>, vector<1x10x32xf32>
    %743 = vector.shape_cast %742 : vector<1x10x32xf32> to vector<10x32xf32>
    %c8_280 = arith.constant 8 : index
    %c0_281 = arith.constant 0 : index
    %c0_282 = arith.constant 0 : index
    %744 = vector.load %arg8[%c8_280, %c0_281, %c0_282] : memref<10x32x8xf32, #tpu.memory_space<vmem>>, vector<1x32x8xf32>
    %745 = vector.shape_cast %744 : vector<1x32x8xf32> to vector<32x8xf32>
    %cst_283 = arith.constant dense<0.000000e+00> : vector<10x8xf32>
    %746 = tpu.matmul %743, %745, %cst_283 {dimension_numbers = #tpu.dot_dimension_numbers<[1], [0], [0], [1], [0, 0, 1, 1], [], []>} : vector<10x32xf32>, vector<32x8xf32>, vector<10x8xf32> -> vector<10x8xf32>
    %747 = arith.addf %741, %746 : vector<10x8xf32>
    %c1_284 = arith.constant 1 : index
    %c4_285 = arith.constant 4 : index
    %c0_286 = arith.constant 0 : index
    %748 = vector.load %arg17[%c1_284, %c4_285, %c0_286] : memref<2x14x32xf32, #tpu.memory_space<vmem>>, vector<1x10x32xf32>
    %749 = vector.shape_cast %748 : vector<1x10x32xf32> to vector<10x32xf32>
    %c9_287 = arith.constant 9 : index
    %c0_288 = arith.constant 0 : index
    %c0_289 = arith.constant 0 : index
    %750 = vector.load %arg8[%c9_287, %c0_288, %c0_289] : memref<10x32x8xf32, #tpu.memory_space<vmem>>, vector<1x32x8xf32>
    %751 = vector.shape_cast %750 : vector<1x32x8xf32> to vector<32x8xf32>
    %cst_290 = arith.constant dense<0.000000e+00> : vector<10x8xf32>
    %752 = tpu.matmul %749, %751, %cst_290 {dimension_numbers = #tpu.dot_dimension_numbers<[1], [0], [0], [1], [0, 0, 1, 1], [], []>} : vector<10x32xf32>, vector<32x8xf32>, vector<10x8xf32> -> vector<10x8xf32>
    %753 = arith.addf %747, %752 : vector<10x8xf32>
    %c0_291 = arith.constant 0 : index
    %c0_292 = arith.constant 0 : index
    %754 = vector.load %arg9[%c0_291, %c0_292] : memref<1x8xf32, #tpu.memory_space<vmem>>, vector<1x8xf32>
    %755 = vector.broadcast %754 : vector<1x8xf32> to vector<10x8xf32>
    %756 = arith.mulf %753, %755 : vector<10x8xf32>
    %c0_293 = arith.constant 0 : index
    %c0_294 = arith.constant 0 : index
    %757 = vector.load %arg10[%c0_293, %c0_294] : memref<1x8xf32, #tpu.memory_space<vmem>>, vector<1x8xf32>
    %758 = vector.broadcast %757 : vector<1x8xf32> to vector<10x8xf32>
    %759 = arith.addf %756, %758 : vector<10x8xf32>
    %cst_295 = arith.constant 0.000000e+00 : f32
    %760 = vector.broadcast %cst_295 : f32 to vector<10x8xf32>
    %761 = arith.maximumf %759, %760 : vector<10x8xf32>
    %c0_296 = arith.constant 0 : index
    %c0_297 = arith.constant 0 : index
    %762 = vector.load %arg11[%c0_296, %c0_297] : memref<8x128xf32, #tpu.memory_space<vmem>>, vector<8x128xf32>
    %cst_298 = arith.constant dense<0.000000e+00> : vector<10x128xf32>
    %763 = tpu.matmul %761, %762, %cst_298 {dimension_numbers = #tpu.dot_dimension_numbers<[1], [0], [0], [1], [0, 0, 1, 1], [], []>} : vector<10x8xf32>, vector<8x128xf32>, vector<10x128xf32> -> vector<10x128xf32>
    %c0_299 = arith.constant 0 : index
    %c0_300 = arith.constant 0 : index
    %764 = vector.load %arg13[%c0_299, %c0_300] : memref<1x128xf32, #tpu.memory_space<vmem>>, vector<1x128xf32>
    %765 = vector.broadcast %764 : vector<1x128xf32> to vector<10x128xf32>
    %766 = arith.addf %763, %765 : vector<10x128xf32>
    %c0_301 = arith.constant 0 : index
    %c0_302 = arith.constant 0 : index
    %767 = vector.load %arg12[%c0_301, %c0_302] : memref<32x128xf32, #tpu.memory_space<vmem>>, vector<32x128xf32>
    %cst_303 = arith.constant 0.000000e+00 : f32
    %768 = vector.broadcast %cst_303 : f32 to vector<1x32xf32>
    %cst_304 = arith.constant 0.000000e+00 : f32
    %769 = vector.broadcast %cst_304 : f32 to vector<1x32xf32>
    %770 = vector.extract_strided_slice %766 {offsets = [0, 0], sizes = [1, 128], strides = [1, 1]} : vector<10x128xf32> to vector<1x128xf32>
    %cst_305 = arith.constant dense<0.000000e+00> : vector<1x128xf32>
    %771 = tpu.matmul %768, %767, %cst_305 {dimension_numbers = #tpu.dot_dimension_numbers<[1], [0], [0], [1], [0, 0, 1, 1], [], []>} : vector<1x32xf32>, vector<32x128xf32>, vector<1x128xf32> -> vector<1x128xf32>
    %772 = arith.addf %770, %771 : vector<1x128xf32>
    %773 = vector.extract_strided_slice %772 {offsets = [0, 0], sizes = [1, 96], strides = [1, 1]} : vector<1x128xf32> to vector<1x96xf32>
    %774 = arith.negf %773 : vector<1x96xf32>
    %775 = math.exp %774 : vector<1x96xf32>
    %cst_306 = arith.constant 1.000000e+00 : f32
    %776 = vector.broadcast %cst_306 : f32 to vector<1x96xf32>
    %777 = arith.addf %776, %775 : vector<1x96xf32>
    %778 = arith.divf %776, %777 : vector<1x96xf32>
    %779 = vector.extract_strided_slice %772 {offsets = [0, 96], sizes = [1, 32], strides = [1, 1]} : vector<1x128xf32> to vector<1x32xf32>
    %780 = math.tanh %779 : vector<1x32xf32>
    %781 = vector.extract_strided_slice %778 {offsets = [0, 32], sizes = [1, 32], strides = [1, 1]} : vector<1x96xf32> to vector<1x32xf32>
    %782 = arith.mulf %781, %769 : vector<1x32xf32>
    %783 = vector.extract_strided_slice %778 {offsets = [0, 0], sizes = [1, 32], strides = [1, 1]} : vector<1x96xf32> to vector<1x32xf32>
    %784 = arith.mulf %783, %780 : vector<1x32xf32>
    %785 = arith.addf %782, %784 : vector<1x32xf32>
    %786 = vector.extract_strided_slice %778 {offsets = [0, 64], sizes = [1, 32], strides = [1, 1]} : vector<1x96xf32> to vector<1x32xf32>
    %787 = math.tanh %785 : vector<1x32xf32>
    %788 = arith.mulf %786, %787 : vector<1x32xf32>
    %789 = vector.extract_strided_slice %766 {offsets = [1, 0], sizes = [1, 128], strides = [1, 1]} : vector<10x128xf32> to vector<1x128xf32>
    %cst_307 = arith.constant dense<0.000000e+00> : vector<1x128xf32>
    %790 = tpu.matmul %788, %767, %cst_307 {dimension_numbers = #tpu.dot_dimension_numbers<[1], [0], [0], [1], [0, 0, 1, 1], [], []>} : vector<1x32xf32>, vector<32x128xf32>, vector<1x128xf32> -> vector<1x128xf32>
    %791 = arith.addf %789, %790 : vector<1x128xf32>
    %792 = vector.extract_strided_slice %791 {offsets = [0, 0], sizes = [1, 96], strides = [1, 1]} : vector<1x128xf32> to vector<1x96xf32>
    %793 = arith.negf %792 : vector<1x96xf32>
    %794 = math.exp %793 : vector<1x96xf32>
    %cst_308 = arith.constant 1.000000e+00 : f32
    %795 = vector.broadcast %cst_308 : f32 to vector<1x96xf32>
    %796 = arith.addf %795, %794 : vector<1x96xf32>
    %797 = arith.divf %795, %796 : vector<1x96xf32>
    %798 = vector.extract_strided_slice %791 {offsets = [0, 96], sizes = [1, 32], strides = [1, 1]} : vector<1x128xf32> to vector<1x32xf32>
    %799 = math.tanh %798 : vector<1x32xf32>
    %800 = vector.extract_strided_slice %797 {offsets = [0, 32], sizes = [1, 32], strides = [1, 1]} : vector<1x96xf32> to vector<1x32xf32>
    %801 = arith.mulf %800, %785 : vector<1x32xf32>
    %802 = vector.extract_strided_slice %797 {offsets = [0, 0], sizes = [1, 32], strides = [1, 1]} : vector<1x96xf32> to vector<1x32xf32>
    %803 = arith.mulf %802, %799 : vector<1x32xf32>
    %804 = arith.addf %801, %803 : vector<1x32xf32>
    %805 = vector.extract_strided_slice %797 {offsets = [0, 64], sizes = [1, 32], strides = [1, 1]} : vector<1x96xf32> to vector<1x32xf32>
    %806 = math.tanh %804 : vector<1x32xf32>
    %807 = arith.mulf %805, %806 : vector<1x32xf32>
    %808 = vector.extract_strided_slice %766 {offsets = [2, 0], sizes = [1, 128], strides = [1, 1]} : vector<10x128xf32> to vector<1x128xf32>
    %cst_309 = arith.constant dense<0.000000e+00> : vector<1x128xf32>
    %809 = tpu.matmul %807, %767, %cst_309 {dimension_numbers = #tpu.dot_dimension_numbers<[1], [0], [0], [1], [0, 0, 1, 1], [], []>} : vector<1x32xf32>, vector<32x128xf32>, vector<1x128xf32> -> vector<1x128xf32>
    %810 = arith.addf %808, %809 : vector<1x128xf32>
    %811 = vector.extract_strided_slice %810 {offsets = [0, 0], sizes = [1, 96], strides = [1, 1]} : vector<1x128xf32> to vector<1x96xf32>
    %812 = arith.negf %811 : vector<1x96xf32>
    %813 = math.exp %812 : vector<1x96xf32>
    %cst_310 = arith.constant 1.000000e+00 : f32
    %814 = vector.broadcast %cst_310 : f32 to vector<1x96xf32>
    %815 = arith.addf %814, %813 : vector<1x96xf32>
    %816 = arith.divf %814, %815 : vector<1x96xf32>
    %817 = vector.extract_strided_slice %810 {offsets = [0, 96], sizes = [1, 32], strides = [1, 1]} : vector<1x128xf32> to vector<1x32xf32>
    %818 = math.tanh %817 : vector<1x32xf32>
    %819 = vector.extract_strided_slice %816 {offsets = [0, 32], sizes = [1, 32], strides = [1, 1]} : vector<1x96xf32> to vector<1x32xf32>
    %820 = arith.mulf %819, %804 : vector<1x32xf32>
    %821 = vector.extract_strided_slice %816 {offsets = [0, 0], sizes = [1, 32], strides = [1, 1]} : vector<1x96xf32> to vector<1x32xf32>
    %822 = arith.mulf %821, %818 : vector<1x32xf32>
    %823 = arith.addf %820, %822 : vector<1x32xf32>
    %824 = vector.extract_strided_slice %816 {offsets = [0, 64], sizes = [1, 32], strides = [1, 1]} : vector<1x96xf32> to vector<1x32xf32>
    %825 = math.tanh %823 : vector<1x32xf32>
    %826 = arith.mulf %824, %825 : vector<1x32xf32>
    %827 = vector.extract_strided_slice %766 {offsets = [3, 0], sizes = [1, 128], strides = [1, 1]} : vector<10x128xf32> to vector<1x128xf32>
    %cst_311 = arith.constant dense<0.000000e+00> : vector<1x128xf32>
    %828 = tpu.matmul %826, %767, %cst_311 {dimension_numbers = #tpu.dot_dimension_numbers<[1], [0], [0], [1], [0, 0, 1, 1], [], []>} : vector<1x32xf32>, vector<32x128xf32>, vector<1x128xf32> -> vector<1x128xf32>
    %829 = arith.addf %827, %828 : vector<1x128xf32>
    %830 = vector.extract_strided_slice %829 {offsets = [0, 0], sizes = [1, 96], strides = [1, 1]} : vector<1x128xf32> to vector<1x96xf32>
    %831 = arith.negf %830 : vector<1x96xf32>
    %832 = math.exp %831 : vector<1x96xf32>
    %cst_312 = arith.constant 1.000000e+00 : f32
    %833 = vector.broadcast %cst_312 : f32 to vector<1x96xf32>
    %834 = arith.addf %833, %832 : vector<1x96xf32>
    %835 = arith.divf %833, %834 : vector<1x96xf32>
    %836 = vector.extract_strided_slice %829 {offsets = [0, 96], sizes = [1, 32], strides = [1, 1]} : vector<1x128xf32> to vector<1x32xf32>
    %837 = math.tanh %836 : vector<1x32xf32>
    %838 = vector.extract_strided_slice %835 {offsets = [0, 32], sizes = [1, 32], strides = [1, 1]} : vector<1x96xf32> to vector<1x32xf32>
    %839 = arith.mulf %838, %823 : vector<1x32xf32>
    %840 = vector.extract_strided_slice %835 {offsets = [0, 0], sizes = [1, 32], strides = [1, 1]} : vector<1x96xf32> to vector<1x32xf32>
    %841 = arith.mulf %840, %837 : vector<1x32xf32>
    %842 = arith.addf %839, %841 : vector<1x32xf32>
    %843 = vector.extract_strided_slice %835 {offsets = [0, 64], sizes = [1, 32], strides = [1, 1]} : vector<1x96xf32> to vector<1x32xf32>
    %844 = math.tanh %842 : vector<1x32xf32>
    %845 = arith.mulf %843, %844 : vector<1x32xf32>
    %846 = vector.extract_strided_slice %766 {offsets = [4, 0], sizes = [1, 128], strides = [1, 1]} : vector<10x128xf32> to vector<1x128xf32>
    %cst_313 = arith.constant dense<0.000000e+00> : vector<1x128xf32>
    %847 = tpu.matmul %845, %767, %cst_313 {dimension_numbers = #tpu.dot_dimension_numbers<[1], [0], [0], [1], [0, 0, 1, 1], [], []>} : vector<1x32xf32>, vector<32x128xf32>, vector<1x128xf32> -> vector<1x128xf32>
    %848 = arith.addf %846, %847 : vector<1x128xf32>
    %849 = vector.extract_strided_slice %848 {offsets = [0, 0], sizes = [1, 96], strides = [1, 1]} : vector<1x128xf32> to vector<1x96xf32>
    %850 = arith.negf %849 : vector<1x96xf32>
    %851 = math.exp %850 : vector<1x96xf32>
    %cst_314 = arith.constant 1.000000e+00 : f32
    %852 = vector.broadcast %cst_314 : f32 to vector<1x96xf32>
    %853 = arith.addf %852, %851 : vector<1x96xf32>
    %854 = arith.divf %852, %853 : vector<1x96xf32>
    %855 = vector.extract_strided_slice %848 {offsets = [0, 96], sizes = [1, 32], strides = [1, 1]} : vector<1x128xf32> to vector<1x32xf32>
    %856 = math.tanh %855 : vector<1x32xf32>
    %857 = vector.extract_strided_slice %854 {offsets = [0, 32], sizes = [1, 32], strides = [1, 1]} : vector<1x96xf32> to vector<1x32xf32>
    %858 = arith.mulf %857, %842 : vector<1x32xf32>
    %859 = vector.extract_strided_slice %854 {offsets = [0, 0], sizes = [1, 32], strides = [1, 1]} : vector<1x96xf32> to vector<1x32xf32>
    %860 = arith.mulf %859, %856 : vector<1x32xf32>
    %861 = arith.addf %858, %860 : vector<1x32xf32>
    %862 = vector.extract_strided_slice %854 {offsets = [0, 64], sizes = [1, 32], strides = [1, 1]} : vector<1x96xf32> to vector<1x32xf32>
    %863 = math.tanh %861 : vector<1x32xf32>
    %864 = arith.mulf %862, %863 : vector<1x32xf32>
    %865 = vector.extract_strided_slice %766 {offsets = [5, 0], sizes = [1, 128], strides = [1, 1]} : vector<10x128xf32> to vector<1x128xf32>
    %cst_315 = arith.constant dense<0.000000e+00> : vector<1x128xf32>
    %866 = tpu.matmul %864, %767, %cst_315 {dimension_numbers = #tpu.dot_dimension_numbers<[1], [0], [0], [1], [0, 0, 1, 1], [], []>} : vector<1x32xf32>, vector<32x128xf32>, vector<1x128xf32> -> vector<1x128xf32>
    %867 = arith.addf %865, %866 : vector<1x128xf32>
    %868 = vector.extract_strided_slice %867 {offsets = [0, 0], sizes = [1, 96], strides = [1, 1]} : vector<1x128xf32> to vector<1x96xf32>
    %869 = arith.negf %868 : vector<1x96xf32>
    %870 = math.exp %869 : vector<1x96xf32>
    %cst_316 = arith.constant 1.000000e+00 : f32
    %871 = vector.broadcast %cst_316 : f32 to vector<1x96xf32>
    %872 = arith.addf %871, %870 : vector<1x96xf32>
    %873 = arith.divf %871, %872 : vector<1x96xf32>
    %874 = vector.extract_strided_slice %867 {offsets = [0, 96], sizes = [1, 32], strides = [1, 1]} : vector<1x128xf32> to vector<1x32xf32>
    %875 = math.tanh %874 : vector<1x32xf32>
    %876 = vector.extract_strided_slice %873 {offsets = [0, 32], sizes = [1, 32], strides = [1, 1]} : vector<1x96xf32> to vector<1x32xf32>
    %877 = arith.mulf %876, %861 : vector<1x32xf32>
    %878 = vector.extract_strided_slice %873 {offsets = [0, 0], sizes = [1, 32], strides = [1, 1]} : vector<1x96xf32> to vector<1x32xf32>
    %879 = arith.mulf %878, %875 : vector<1x32xf32>
    %880 = arith.addf %877, %879 : vector<1x32xf32>
    %881 = vector.extract_strided_slice %873 {offsets = [0, 64], sizes = [1, 32], strides = [1, 1]} : vector<1x96xf32> to vector<1x32xf32>
    %882 = math.tanh %880 : vector<1x32xf32>
    %883 = arith.mulf %881, %882 : vector<1x32xf32>
    %884 = vector.extract_strided_slice %766 {offsets = [6, 0], sizes = [1, 128], strides = [1, 1]} : vector<10x128xf32> to vector<1x128xf32>
    %cst_317 = arith.constant dense<0.000000e+00> : vector<1x128xf32>
    %885 = tpu.matmul %883, %767, %cst_317 {dimension_numbers = #tpu.dot_dimension_numbers<[1], [0], [0], [1], [0, 0, 1, 1], [], []>} : vector<1x32xf32>, vector<32x128xf32>, vector<1x128xf32> -> vector<1x128xf32>
    %886 = arith.addf %884, %885 : vector<1x128xf32>
    %887 = vector.extract_strided_slice %886 {offsets = [0, 0], sizes = [1, 96], strides = [1, 1]} : vector<1x128xf32> to vector<1x96xf32>
    %888 = arith.negf %887 : vector<1x96xf32>
    %889 = math.exp %888 : vector<1x96xf32>
    %cst_318 = arith.constant 1.000000e+00 : f32
    %890 = vector.broadcast %cst_318 : f32 to vector<1x96xf32>
    %891 = arith.addf %890, %889 : vector<1x96xf32>
    %892 = arith.divf %890, %891 : vector<1x96xf32>
    %893 = vector.extract_strided_slice %886 {offsets = [0, 96], sizes = [1, 32], strides = [1, 1]} : vector<1x128xf32> to vector<1x32xf32>
    %894 = math.tanh %893 : vector<1x32xf32>
    %895 = vector.extract_strided_slice %892 {offsets = [0, 32], sizes = [1, 32], strides = [1, 1]} : vector<1x96xf32> to vector<1x32xf32>
    %896 = arith.mulf %895, %880 : vector<1x32xf32>
    %897 = vector.extract_strided_slice %892 {offsets = [0, 0], sizes = [1, 32], strides = [1, 1]} : vector<1x96xf32> to vector<1x32xf32>
    %898 = arith.mulf %897, %894 : vector<1x32xf32>
    %899 = arith.addf %896, %898 : vector<1x32xf32>
    %900 = vector.extract_strided_slice %892 {offsets = [0, 64], sizes = [1, 32], strides = [1, 1]} : vector<1x96xf32> to vector<1x32xf32>
    %901 = math.tanh %899 : vector<1x32xf32>
    %902 = arith.mulf %900, %901 : vector<1x32xf32>
    %903 = vector.extract_strided_slice %766 {offsets = [7, 0], sizes = [1, 128], strides = [1, 1]} : vector<10x128xf32> to vector<1x128xf32>
    %cst_319 = arith.constant dense<0.000000e+00> : vector<1x128xf32>
    %904 = tpu.matmul %902, %767, %cst_319 {dimension_numbers = #tpu.dot_dimension_numbers<[1], [0], [0], [1], [0, 0, 1, 1], [], []>} : vector<1x32xf32>, vector<32x128xf32>, vector<1x128xf32> -> vector<1x128xf32>
    %905 = arith.addf %903, %904 : vector<1x128xf32>
    %906 = vector.extract_strided_slice %905 {offsets = [0, 0], sizes = [1, 96], strides = [1, 1]} : vector<1x128xf32> to vector<1x96xf32>
    %907 = arith.negf %906 : vector<1x96xf32>
    %908 = math.exp %907 : vector<1x96xf32>
    %cst_320 = arith.constant 1.000000e+00 : f32
    %909 = vector.broadcast %cst_320 : f32 to vector<1x96xf32>
    %910 = arith.addf %909, %908 : vector<1x96xf32>
    %911 = arith.divf %909, %910 : vector<1x96xf32>
    %912 = vector.extract_strided_slice %905 {offsets = [0, 96], sizes = [1, 32], strides = [1, 1]} : vector<1x128xf32> to vector<1x32xf32>
    %913 = math.tanh %912 : vector<1x32xf32>
    %914 = vector.extract_strided_slice %911 {offsets = [0, 32], sizes = [1, 32], strides = [1, 1]} : vector<1x96xf32> to vector<1x32xf32>
    %915 = arith.mulf %914, %899 : vector<1x32xf32>
    %916 = vector.extract_strided_slice %911 {offsets = [0, 0], sizes = [1, 32], strides = [1, 1]} : vector<1x96xf32> to vector<1x32xf32>
    %917 = arith.mulf %916, %913 : vector<1x32xf32>
    %918 = arith.addf %915, %917 : vector<1x32xf32>
    %919 = vector.extract_strided_slice %911 {offsets = [0, 64], sizes = [1, 32], strides = [1, 1]} : vector<1x96xf32> to vector<1x32xf32>
    %920 = math.tanh %918 : vector<1x32xf32>
    %921 = arith.mulf %919, %920 : vector<1x32xf32>
    %922 = vector.extract_strided_slice %766 {offsets = [8, 0], sizes = [1, 128], strides = [1, 1]} : vector<10x128xf32> to vector<1x128xf32>
    %cst_321 = arith.constant dense<0.000000e+00> : vector<1x128xf32>
    %923 = tpu.matmul %921, %767, %cst_321 {dimension_numbers = #tpu.dot_dimension_numbers<[1], [0], [0], [1], [0, 0, 1, 1], [], []>} : vector<1x32xf32>, vector<32x128xf32>, vector<1x128xf32> -> vector<1x128xf32>
    %924 = arith.addf %922, %923 : vector<1x128xf32>
    %925 = vector.extract_strided_slice %924 {offsets = [0, 0], sizes = [1, 96], strides = [1, 1]} : vector<1x128xf32> to vector<1x96xf32>
    %926 = arith.negf %925 : vector<1x96xf32>
    %927 = math.exp %926 : vector<1x96xf32>
    %cst_322 = arith.constant 1.000000e+00 : f32
    %928 = vector.broadcast %cst_322 : f32 to vector<1x96xf32>
    %929 = arith.addf %928, %927 : vector<1x96xf32>
    %930 = arith.divf %928, %929 : vector<1x96xf32>
    %931 = vector.extract_strided_slice %924 {offsets = [0, 96], sizes = [1, 32], strides = [1, 1]} : vector<1x128xf32> to vector<1x32xf32>
    %932 = math.tanh %931 : vector<1x32xf32>
    %933 = vector.extract_strided_slice %930 {offsets = [0, 32], sizes = [1, 32], strides = [1, 1]} : vector<1x96xf32> to vector<1x32xf32>
    %934 = arith.mulf %933, %918 : vector<1x32xf32>
    %935 = vector.extract_strided_slice %930 {offsets = [0, 0], sizes = [1, 32], strides = [1, 1]} : vector<1x96xf32> to vector<1x32xf32>
    %936 = arith.mulf %935, %932 : vector<1x32xf32>
    %937 = arith.addf %934, %936 : vector<1x32xf32>
    %938 = vector.extract_strided_slice %930 {offsets = [0, 64], sizes = [1, 32], strides = [1, 1]} : vector<1x96xf32> to vector<1x32xf32>
    %939 = math.tanh %937 : vector<1x32xf32>
    %940 = arith.mulf %938, %939 : vector<1x32xf32>
    %941 = vector.extract_strided_slice %766 {offsets = [9, 0], sizes = [1, 128], strides = [1, 1]} : vector<10x128xf32> to vector<1x128xf32>
    %cst_323 = arith.constant dense<0.000000e+00> : vector<1x128xf32>
    %942 = tpu.matmul %940, %767, %cst_323 {dimension_numbers = #tpu.dot_dimension_numbers<[1], [0], [0], [1], [0, 0, 1, 1], [], []>} : vector<1x32xf32>, vector<32x128xf32>, vector<1x128xf32> -> vector<1x128xf32>
    %943 = arith.addf %941, %942 : vector<1x128xf32>
    %944 = vector.extract_strided_slice %943 {offsets = [0, 0], sizes = [1, 96], strides = [1, 1]} : vector<1x128xf32> to vector<1x96xf32>
    %945 = arith.negf %944 : vector<1x96xf32>
    %946 = math.exp %945 : vector<1x96xf32>
    %cst_324 = arith.constant 1.000000e+00 : f32
    %947 = vector.broadcast %cst_324 : f32 to vector<1x96xf32>
    %948 = arith.addf %947, %946 : vector<1x96xf32>
    %949 = arith.divf %947, %948 : vector<1x96xf32>
    %950 = vector.extract_strided_slice %943 {offsets = [0, 96], sizes = [1, 32], strides = [1, 1]} : vector<1x128xf32> to vector<1x32xf32>
    %951 = math.tanh %950 : vector<1x32xf32>
    %952 = vector.extract_strided_slice %949 {offsets = [0, 32], sizes = [1, 32], strides = [1, 1]} : vector<1x96xf32> to vector<1x32xf32>
    %953 = arith.mulf %952, %937 : vector<1x32xf32>
    %954 = vector.extract_strided_slice %949 {offsets = [0, 0], sizes = [1, 32], strides = [1, 1]} : vector<1x96xf32> to vector<1x32xf32>
    %955 = arith.mulf %954, %951 : vector<1x32xf32>
    %956 = arith.addf %953, %955 : vector<1x32xf32>
    %957 = vector.extract_strided_slice %949 {offsets = [0, 64], sizes = [1, 32], strides = [1, 1]} : vector<1x96xf32> to vector<1x32xf32>
    %958 = math.tanh %956 : vector<1x32xf32>
    %959 = arith.mulf %957, %958 : vector<1x32xf32>
    %c0_325 = arith.constant 0 : index
    %c0_326 = arith.constant 0 : index
    %960 = vector.load %arg14[%c0_325, %c0_326] : memref<32x8xf32, #tpu.memory_space<vmem>>, vector<32x8xf32>
    %cst_327 = arith.constant dense<0.000000e+00> : vector<1x8xf32>
    %961 = tpu.matmul %959, %960, %cst_327 {dimension_numbers = #tpu.dot_dimension_numbers<[1], [0], [0], [1], [0, 0, 1, 1], [], []>} : vector<1x32xf32>, vector<32x8xf32>, vector<1x8xf32> -> vector<1x8xf32>
    %c0_328 = arith.constant 0 : index
    %c0_329 = arith.constant 0 : index
    %962 = vector.load %arg15[%c0_328, %c0_329] : memref<1x8xf32, #tpu.memory_space<vmem>>, vector<1x8xf32>
    %963 = arith.addf %961, %962 : vector<1x8xf32>
    %c0_330 = arith.constant 0 : index
    %c0_331 = arith.constant 0 : index
    %c0_332 = arith.constant 0 : index
    %964 = vector.load %arg16[%c0_330, %c0_331, %c0_332] : memref<1x1x8xf32, #tpu.memory_space<vmem>>, vector<1x1x8xf32>
    %965 = vector.shape_cast %964 : vector<1x1x8xf32> to vector<1x8xf32>
    %966 = vector.shape_cast %963 : vector<1x8xf32> to vector<1x1x8xf32>
    tpu.vector_store %arg16[%c0_330, %c0_331, %c0_332], %966 {strides = array<i32>} : memref<1x1x8xf32, #tpu.memory_space<vmem>>, vector<1x1x8xf32>,
    return
  }
  func.func @transform_0(%arg0: i32) -> (i32, i32, i32, i32) {
    %c0_i32 = arith.constant 0 : i32
    %c0_i32_0 = arith.constant 0 : i32
    %c0_i32_1 = arith.constant 0 : i32
    %c0_i32_2 = arith.constant 0 : i32
    return %arg0, %c0_i32, %c0_i32_0, %c0_i32_1 : i32, i32, i32, i32
  }
  func.func @transform_1(%arg0: i32) -> (i32, i32, i32) {
    %c0_i32 = arith.constant 0 : i32
    %c0_i32_0 = arith.constant 0 : i32
    %c0_i32_1 = arith.constant 0 : i32
    %c0_i32_2 = arith.constant 0 : i32
    return %c0_i32, %c0_i32_0, %c0_i32_1 : i32, i32, i32
  }
  func.func @transform_2(%arg0: i32) -> (i32, i32) {
    %c0_i32 = arith.constant 0 : i32
    %c0_i32_0 = arith.constant 0 : i32
    %c0_i32_1 = arith.constant 0 : i32
    return %c0_i32, %c0_i32_0 : i32, i32
  }
  func.func @transform_3(%arg0: i32) -> (i32, i32) {
    %c0_i32 = arith.constant 0 : i32
    %c0_i32_0 = arith.constant 0 : i32
    %c0_i32_1 = arith.constant 0 : i32
    return %c0_i32, %c0_i32_0 : i32, i32
  }
  func.func @transform_4(%arg0: i32) -> (i32, i32) {
    %c0_i32 = arith.constant 0 : i32
    %c0_i32_0 = arith.constant 0 : i32
    %c0_i32_1 = arith.constant 0 : i32
    return %c0_i32, %c0_i32_0 : i32, i32
  }
  func.func @transform_5(%arg0: i32) -> (i32, i32) {
    %c0_i32 = arith.constant 0 : i32
    %c0_i32_0 = arith.constant 0 : i32
    %c0_i32_1 = arith.constant 0 : i32
    return %c0_i32, %c0_i32_0 : i32, i32
  }
  func.func @transform_6(%arg0: i32) -> (i32, i32) {
    %c0_i32 = arith.constant 0 : i32
    %c0_i32_0 = arith.constant 0 : i32
    %c0_i32_1 = arith.constant 0 : i32
    return %c0_i32, %c0_i32_0 : i32, i32
  }
  func.func @transform_7(%arg0: i32) -> (i32, i32, i32) {
    %c0_i32 = arith.constant 0 : i32
    %c0_i32_0 = arith.constant 0 : i32
    %c0_i32_1 = arith.constant 0 : i32
    %c0_i32_2 = arith.constant 0 : i32
    return %c0_i32, %c0_i32_0, %c0_i32_1 : i32, i32, i32
  }
  func.func @transform_8(%arg0: i32) -> (i32, i32) {
    %c0_i32 = arith.constant 0 : i32
    %c0_i32_0 = arith.constant 0 : i32
    %c0_i32_1 = arith.constant 0 : i32
    return %c0_i32, %c0_i32_0 : i32, i32
  }
  func.func @transform_9(%arg0: i32) -> (i32, i32) {
    %c0_i32 = arith.constant 0 : i32
    %c0_i32_0 = arith.constant 0 : i32
    %c0_i32_1 = arith.constant 0 : i32
    return %c0_i32, %c0_i32_0 : i32, i32
  }
  func.func @transform_10(%arg0: i32) -> (i32, i32) {
    %c0_i32 = arith.constant 0 : i32
    %c0_i32_0 = arith.constant 0 : i32
    %c0_i32_1 = arith.constant 0 : i32
    return %c0_i32, %c0_i32_0 : i32, i32
  }
  func.func @transform_11(%arg0: i32) -> (i32, i32) {
    %c0_i32 = arith.constant 0 : i32
    %c0_i32_0 = arith.constant 0 : i32
    %c0_i32_1 = arith.constant 0 : i32
    return %c0_i32, %c0_i32_0 : i32, i32
  }
  func.func @transform_12(%arg0: i32) -> (i32, i32) {
    %c0_i32 = arith.constant 0 : i32
    %c0_i32_0 = arith.constant 0 : i32
    %c0_i32_1 = arith.constant 0 : i32
    return %c0_i32, %c0_i32_0 : i32, i32
  }
  func.func @transform_13(%arg0: i32) -> (i32, i32) {
    %c0_i32 = arith.constant 0 : i32
    %c0_i32_0 = arith.constant 0 : i32
    %c0_i32_1 = arith.constant 0 : i32
    return %c0_i32, %c0_i32_0 : i32, i32
  }
  func.func @transform_14(%arg0: i32) -> (i32, i32) {
    %c0_i32 = arith.constant 0 : i32
    %c0_i32_0 = arith.constant 0 : i32
    %c0_i32_1 = arith.constant 0 : i32
    return %c0_i32, %c0_i32_0 : i32, i32
  }
  func.func @transform_15(%arg0: i32) -> (i32, i32, i32) {
    %c0_i32 = arith.constant 0 : i32
    %c0_i32_0 = arith.constant 0 : i32
    %c0_i32_1 = arith.constant 0 : i32
    return %arg0, %c0_i32, %c0_i32_0 : i32, i32, i32
  }
}

</mosaic_0001>

<bundles_post_ra>
// kernel: cnn2lstm_forward.1
= control target key start
LH: loop header
LB: loop body
LE: loop exit
PB: predicated region body
PF: predicated region fallthrough
CT: control target
= control target key end

     0   :  { %s6133_s0 = inlined_call_operand.vmem [shape: f32[2,2,32,4], index: 0, kind: input, shape index: {}]   ;;  %s6134_s1 = inlined_call_operand.vmem [shape: f32[10,4,8], index: 1, kind: input, shape index: {}]   ;;  %s6135_s2 = inlined_call_operand.vmem [shape: f32[1,8], index: 2, kind: input, shape index: {}]   ;;  %s6136_s3 = inlined_call_operand.vmem [shape: f32[1,8], index: 3, kind: input, shape index: {}]   ;;  %s6137_s4 = inlined_call_operand.vmem [shape: f32[8,128], index: 4, kind: input, shape index: {}]   ;;  %s6138_s5 = inlined_call_operand.vmem [shape: f32[32,128], index: 5, kind: input, shape index: {}]   ;;  %s6139_s6 = inlined_call_operand.vmem [shape: f32[1,128], index: 6, kind: input, shape index: {}]   ;;  %s6140_s7 = inlined_call_operand.vmem [shape: f32[10,32,8], index: 7, kind: input, shape index: {}]   ;;  %s6141_s8 = inlined_call_operand.vmem [shape: f32[1,8], index: 8, kind: input, shape index: {}]   ;;  %s6142_s9 = inlined_call_operand.vmem [shape: f32[1,8], index: 9, kind: input, shape index: {}]   ;;  %s6143_s10 = inlined_call_operand.vmem [shape: f32[8,128], index: 10, kind: input, shape index: {}]   ;;  %s6144_s11 = inlined_call_operand.vmem [shape: f32[32,128], index: 11, kind: input, shape index: {}]   ;;  %s6145_s12 = inlined_call_operand.vmem [shape: f32[1,128], index: 12, kind: input, shape index: {}]   ;;  %s6146_s13 = inlined_call_operand.vmem [shape: f32[32,8], index: 13, kind: input, shape index: {}]   ;;  %s6147_s14 = inlined_call_operand.vmem [shape: f32[1,8], index: 14, kind: input, shape index: {}]   ;;  %s6148_s15 = inlined_call_operand.hbm [shape: f32[2,1,8], index: 15, kind: output, shape index: {}]  }
   0x1   :  { %6157 = sst [smem:[#allocation10_spill]] %s6133_s0 }
   0x2   :  { %6158 = sst [smem:[#allocation11_spill]] %s6134_s1 }
   0x3   :  { %20 = vsyncpa [#allocation4], 0 }
   0x4   :  { %22 = vsyncpa [#allocation4 + $0x1], 0  ;;  %s5090_s18 = smov 0   ;;  %s5092_s19 = smov 0  }
   0x5   :  { %s5094_s20 = smov 0   ;;  %s5096_s21 = smov 0  }
   0x6 LB: > { %6159 = sst [smem:[#allocation6_spill]] %s5001_s20  ;;  %s5111_s22 = sadd.s32 4294967295, %s5005_s21   ;;  %s5005_s21 = sphi %s5096_s21, %s6170_s21   ;;  %s5001_s20 = sphi %s5094_s20, %s6172_s20   ;;  %s4997_s19 = sphi %s5092_s19, %s6174_s19   ;;  %s4993_s18 = sphi %s5090_s18, %s6173_s18  }
   0x7   : > { %s4361_s23 = sadd.s32 4294967294, %s5005_s21   ;;  %s5115_s24 = sadd.s32 1, %s5005_s21  }
   0x8   : > { %6160 = sst [smem:[#allocation7_spill]] %s5115_s24  ;;  %s355_s25 = sadd.s32 1, %s5001_s20 }
   0x9   : > { %s352_s26 = ssub.s32 %s5005_s21, %s5115_s24  ;;  %p365_p0 = scmp.ne.s32.totalorder %s5001_s20, %s4997_s19 }
   0xa   : > { %p353_p1 = scmp.eq.s32.totalorder %s352_s26, 0  ;;  %p366_p2 = scmp.eq.s32.totalorder %s5111_s22, 1 }
   0xb   : > { %p371_p3 = scmp.ne.s32.totalorder %s4997_s19, %s4993_s18  ;;  %p372_p4 = scmp.eq.s32.totalorder %s4361_s23, 1 }
   0xc   : > { %s5126_s27 = scalar_select %p353_p1, %s5001_s20, %s355_s25  }
   0xd   : > { %p5128_p5 = por %p366_p2, %p365_p0  ;;  %p5132_p6 = por %p372_p4, %p371_p3 }
   0xe   : > { %6161 = sst [smem:[#allocation8_spill]] %s5126_s27  ;;  %p4364_p7 = scmp.ge.s32.totalorder %s5005_s21, 1 }
   0xf   : > { %s6163_s29 = scalar_select %p5132_p6, 1, 0 }
  0x10   : > { %p440_p8 = scmp.lt.s32.totalorder %s5005_s21, 3 }
  0x11   : > { %6164 = sst [smem:[#allocation9_spill]] %s6163_s29 }
  0x12   : > { %p441_p9 = pnand %p4364_p7, %p440_p8 }
  0x13   : > { %s6165_s1 = sld [smem:[#allocation11_spill]] (!%p441_p9)  ;;  %p487_p10 = scmp.lt.s32.totalorder (!%p441_p9), %s5111_s22, 1 }
  0x14   : > { %444 = sbr.rel (%p441_p9) target bundleno = 22128 (0x5670), region = 80  ;;  %s6166_s0 = sld [smem:[#allocation10_spill]] (!%p441_p9) }
  0x15   : > { %s6167_s26 = smov (!%p441_p9), 64   ;;  %s6168_s20 = smov (!%p441_p9), 32  }
  0x16   : > { %s485_s25 = sand.u32 (!%p441_p9), 1, %s4997_s19   ;;  %s4963_s27 = scalar_lea.hbm (!%p441_p9), %s6148_s15, 2 }
  0x19   : > { %v4371_v0 = vld [vmem:[%s6165_s1 + $0x4] sm:$0xf]  ;;  %vm517_vm0 = vcmask 1043456   ;;  %v496_v1 = vld [vmem:[%s6165_s1] sm:$0xf]  ;;  %s488_s30 = scalar_select %p487_p10, %s5111_s22, 1 }
  0x1a   : > { %4372 = vmatpush.msk.msra.mxu0 %vm517_vm0, %v4371_v0  ;;  %4377 = vmatpush.msk.msra.mxu1 %vm517_vm0, %v496_v1  ;;  %v4382_v2 = vld [vmem:[%s6165_s1 + $0x8] sm:$0xf]  ;;  %v4398_v3 = vld [vmem:[%s6165_s1 + $0x10] sm:$0xf]  ;;  %v4392_v4 = vld [vmem:[%s6165_s1 + $0xc] sm:$0xf] }
  0x1b   : > { %4383 = vmatpush.msk.msra.mxu2 %vm517_vm0, %v4382_v2  ;;  %v4408_v5 = vld [vmem:[%s6165_s1 + $0x14] sm:$0xf]  ;;  %4393 = vmatpush.msk.msra.mxu3 %vm517_vm0, %v4392_v4  ;;  %v4414_v6 = vld [vmem:[%s6165_s1 + $0x18] sm:$0xf]  ;;  %v4424_v7 = vld [vmem:[%s6165_s1 + $0x1c] sm:$0xf] }
  0x1c   : > { %4399 = vmatpush.msk.msrb.mxu0 %vm517_vm0, %v4398_v3  ;;  %4409 = vmatpush.msk.msrb.mxu1 %vm517_vm0, %v4408_v5  ;;  %s4585_s29 = sshll.u32 %s488_s30, 6  ;;  %vm504_vm1 = vcmask 31744   ;;  %v4430_v14 = vld [vmem:[%s6165_s1 + $0x20] sm:$0xf]  ;;  %v4440_v17 = vld [vmem:[%s6165_s1 + $0x24] sm:$0xf] }
  0x1d   : > { %4415 = vmatpush.msk.msrb.mxu2 %vm517_vm0, %v4414_v6  ;;  %4425 = vmatpush.msk.msrb.mxu3 %vm517_vm0, %v4424_v7  ;;  %s5175_s17 = scalar_lea.vmem %s6166_s0, %s4585_s29  ;;  %v1046_v55 = vld [vmem:[%s6137_s4] sm:$0xff]  ;;  %v5271_v56 = vld [vmem:[%s6138_s5 + $0x18] sm:$0xff]  ;;  %v5282_v61 = vld [vmem:[%s6138_s5 + $0x10] sm:$0xff]  ;;  %vm1051_vm2 = vcmask 64512   ;;  %s6153_s29 = smov 32   ;;  %vm1163_vm7 = vcmask 253952  }
  0x1e   : > { %v4367_v8 = vld [vmem:[%s5175_s17 + $0x20] sm:$0xff]  ;;  %v4368_v12 = vld [vmem:[%s5175_s17 + $0x28] sm:$0xff]  ;;  %v4369_v18 = vld [vmem:[%s5175_s17 + $0x30] sm:$0xff]  ;;  %s6155_s30 = smov 64   ;;  %vm1097_vm8 = vcmask 261120   ;;  %s4302_s0 = scalar_lea.hbm %s6148_s15, %s5111_s22 }
  0x1f   : > { %v492_v9 = vld [vmem:[%s5175_s17] sm:$0xff]  ;;  %4373 = vmatmul.msk.f32.vlgmr.msra.gmra.mxu0 %vm504_vm1, %v4367_v8  ;;  %v493_v13 = vld [vmem:[%s5175_s17 + $0x8] sm:$0xff]  ;;  %v494_v19 = vld [vmem:[%s5175_s17 + $0x10] sm:$0xff] }
  0x20   : > { %v594_v10 = vld [vmem:[%s5175_s17 + $0x1] sm:$0xff]  ;;  %4378 = vmatmul.msk.f32.vlgmr.msra.gmra.mxu1 %vm504_vm1, %v492_v9  ;;  %v595_v15 = vld [vmem:[%s5175_s17 + $0x9] sm:$0xff]  ;;  %4431 = vmatpush.msk.msra.mxu0 %vm517_vm0, %v4430_v14  ;;  %v596_v20 = vld [vmem:[%s5175_s17 + $0x11] sm:$0xff] }
  0x21   : > { %v4388_v11 = vld [vmem:[%s5175_s17 + $0x21] sm:$0xff]  ;;  %4384 = vmatmul.msk.f32.vlgmr.msra.gmra.mxu2 %vm504_vm1, %v594_v10  ;;  %v4389_v16 = vld [vmem:[%s5175_s17 + $0x29] sm:$0xff]  ;;  %4441 = vmatpush.msk.msra.mxu1 %vm517_vm0, %v4440_v17  ;;  %v4390_v21 = vld [vmem:[%s5175_s17 + $0x31] sm:$0xff] }
  0x22   : > { %4394 = vmatmul.msk.f32.vlgmr.msra.gmra.mxu3 %vm504_vm1, %v4388_v11  ;;  %v4370_v22 = vld [vmem:[%s5175_s17 + $0x38] sm:$0xf]  ;;  %v702_v26 = vld [vmem:[%s5175_s17 + $0x2] sm:$0xff]  ;;  %v703_v30 = vld [vmem:[%s5175_s17 + $0xa] sm:$0xff]  ;;  %1079 = vmatpush.msra.mxu2 %v1046_v55 }
  0x23   : > { %v495_v23 = vld [vmem:[%s5175_s17 + $0x18] sm:$0xf]  ;;  %v4404_v27 = vld [vmem:[%s5175_s17 + $0x22] sm:$0xff]  ;;  %v4405_v31 = vld [vmem:[%s5175_s17 + $0x2a] sm:$0xff]  ;;  %1113 = vmatpush.msra.mxu3 %v5271_v56 }
  0x24   : > { %v597_v24 = vld [vmem:[%s5175_s17 + $0x19] sm:$0xf]  ;;  %v810_v28 = vld [vmem:[%s5175_s17 + $0x3] sm:$0xff]  ;;  %v811_v32 = vld [vmem:[%s5175_s17 + $0xb] sm:$0xff] }
  0x25   : > { %v4391_v25 = vld [vmem:[%s5175_s17 + $0x39] sm:$0xf]  ;;  %v4420_v29 = vld [vmem:[%s5175_s17 + $0x23] sm:$0xff]  ;;  %v4421_v33 = vld [vmem:[%s5175_s17 + $0x2b] sm:$0xff]  ;;  %1114 = vmatpush.msra.mxu3 %v5282_v61 }
  0x26   : > { %v704_v34 = vld [vmem:[%s5175_s17 + $0x12] sm:$0xff]  ;;  %v705_v38 = vld [vmem:[%s5175_s17 + $0x1a] sm:$0xf]  ;;  %v918_v42 = vld [vmem:[%s5175_s17 + $0x4] sm:$0xff] }
  0x27   : > { %4374 = vmatmul.msk.f32.gmra.mxu0 %vm504_vm1, %v4368_v12  ;;  %v4406_v35 = vld [vmem:[%s5175_s17 + $0x32] sm:$0xff]  ;;  %v4407_v39 = vld [vmem:[%s5175_s17 + $0x3a] sm:$0xf]  ;;  %v4436_v43 = vld [vmem:[%s5175_s17 + $0x24] sm:$0xff]  ;;  %v5007_v12 = vmov 0.0  }
  0x28   : > { %4379 = vmatmul.msk.f32.gmra.mxu1 %vm504_vm1, %v493_v13  ;;  %v812_v36 = vld [vmem:[%s5175_s17 + $0x13] sm:$0xff]  ;;  %v813_v40 = vld [vmem:[%s5175_s17 + $0x1b] sm:$0xf]  ;;  %v5295_v1 = vld [vmem:[%s6138_s5 + $0x8] sm:$0xff] }
  0x29   : > { %4385 = vmatmul.msk.f32.gmra.mxu2 %vm504_vm1, %v595_v15  ;;  %v4422_v37 = vld [vmem:[%s5175_s17 + $0x33] sm:$0xff]  ;;  %v4423_v41 = vld [vmem:[%s5175_s17 + $0x3b] sm:$0xf]  ;;  %1115 = vmatpush.msra.mxu3 %v5295_v1  ;;  %v5304_v9 = vld [vmem:[%s6138_s5] sm:$0xff] }
  0x2a   : > { %4395 = vmatmul.msk.f32.gmra.mxu3 %vm504_vm1, %v4389_v16  ;;  %v919_v44 = vld [vmem:[%s5175_s17 + $0xc] sm:$0xff]  ;;  %v920_v46 = vld [vmem:[%s5175_s17 + $0x14] sm:$0xff]  ;;  %v921_v48 = vld [vmem:[%s5175_s17 + $0x1c] sm:$0xf] }
  0x2b   : > { %v4437_v45 = vld [vmem:[%s5175_s17 + $0x2c] sm:$0xff]  ;;  %v4438_v47 = vld [vmem:[%s5175_s17 + $0x34] sm:$0xff]  ;;  %v4439_v49 = vld [vmem:[%s5175_s17 + $0x3c] sm:$0xf]  ;;  %1116 = vmatpush.msra.mxu3 %v5304_v9  ;;  %s486_s17 = scalar_lea.vmem [#allocation3], %s485_s25 }
  0x2c   : > { %s4304_s23 = sshll.u32 %s486_s17, 4  ;;  %s4305_s23 = int_to_ptr.vmem [resolvable:$true] %s4304_s23 }
  0x2f   : > { %4375 = vmatmul.msk.f32.gmra.mxu0 %vm504_vm1, %v4369_v18 }
  0x30   : > { %4380 = vmatmul.msk.f32.gmra.mxu1 %vm504_vm1, %v494_v19 }
  0x31   : > { %4386 = vmatmul.msk.f32.gmra.mxu2 %vm504_vm1, %v596_v20 }
  0x32   : > { %4396 = vmatmul.msk.f32.gmra.mxu3 %vm504_vm1, %v4390_v21 }
  0x37   : > { %4376 = vmatmul.msk.f32.gmra.mxu0 %vm504_vm1, %v4370_v22 }
  0x38   : > { %4381 = vmatmul.msk.f32.gmra.mxu1 %vm504_vm1, %v495_v23 }
  0x39   : > { %4387 = vmatmul.msk.f32.gmra.mxu2 %vm504_vm1, %v597_v24 }
  0x3a   : > { %4397 = vmatmul.msk.f32.gmra.mxu3 %vm504_vm1, %v4391_v25 }
  0x3f   : > { %4400 = vmatmul.msk.f32.vlgmr.msrb.gmra.mxu0 %vm504_vm1, %v702_v26 }
  0x40   : > { %4410 = vmatmul.msk.f32.vlgmr.msrb.gmra.mxu1 %vm504_vm1, %v4404_v27  ;;  %1405 = vmatpush.msrb.mxu0 %v5271_v56 }
  0x41   : > { %4416 = vmatmul.msk.f32.vlgmr.msrb.gmra.mxu2 %vm504_vm1, %v810_v28  ;;  %1480 = vmatpush.msrb.mxu1 %v5271_v56 }
  0x42   : > { %4426 = vmatmul.msk.f32.vlgmr.msrb.gmra.mxu3 %vm504_vm1, %v4420_v29  ;;  %1555 = vmatpush.msrb.mxu2 %v5271_v56 }
  0x43   : > { %1406 = vmatpush.msrb.mxu0 %v5282_v61  ;;  %1481 = vmatpush.msrb.mxu1 %v5282_v61 }
  0x44   : > { %1556 = vmatpush.msrb.mxu2 %v5282_v61  ;;  %1179 = vmatpush.msrb.mxu3 %v5271_v56 }
  0x45   : > { %1407 = vmatpush.msrb.mxu0 %v5295_v1  ;;  %1482 = vmatpush.msrb.mxu1 %v5295_v1 }
  0x46   : > { %1557 = vmatpush.msrb.mxu2 %v5295_v1  ;;  %1180 = vmatpush.msrb.mxu3 %v5282_v61 }
  0x47   : > { %4401 = vmatmul.msk.f32.gmra.mxu0 %vm504_vm1, %v703_v30  ;;  %1483 = vmatpush.msrb.mxu1 %v5304_v9 }
  0x48   : > { %4411 = vmatmul.msk.f32.gmra.mxu1 %vm504_vm1, %v4405_v31  ;;  %1408 = vmatpush.msrb.mxu0 %v5304_v9 }
  0x49   : > { %4417 = vmatmul.msk.f32.gmra.mxu2 %vm504_vm1, %v811_v32  ;;  %1181 = vmatpush.msrb.mxu3 %v5295_v1 }
  0x4a   : > { %4427 = vmatmul.msk.f32.gmra.mxu3 %vm504_vm1, %v4421_v33  ;;  %1558 = vmatpush.msrb.mxu2 %v5304_v9 }
  0x4b   : > { %1182 = vmatpush.msrb.mxu3 %v5304_v9 }
  0x4f   : > { %4402 = vmatmul.msk.f32.gmra.mxu0 %vm504_vm1, %v704_v34 }
  0x50   : > { %4412 = vmatmul.msk.f32.gmra.mxu1 %vm504_vm1, %v4406_v35 }
  0x51   : > { %4418 = vmatmul.msk.f32.gmra.mxu2 %vm504_vm1, %v812_v36 }
  0x52   : > { %4428 = vmatmul.msk.f32.gmra.mxu3 %vm504_vm1, %v4422_v37  ;;  %v4628_v37 = vld [vmem:[%s6135_s2] ss:$0 sm:$0xff] }
  0x57   : > { %4403 = vmatmul.msk.f32.gmra.mxu0 %vm504_vm1, %v705_v38 }
  0x58   : > { %4413 = vmatmul.msk.f32.gmra.mxu1 %vm504_vm1, %v4407_v39 }
  0x59   : > { %4419 = vmatmul.msk.f32.gmra.mxu2 %vm504_vm1, %v813_v40 }
  0x5a   : > { %4429 = vmatmul.msk.f32.gmra.mxu3 %vm504_vm1, %v4423_v41  ;;  %v4629_v41 = vld [vmem:[%s6136_s3] ss:$0 sm:$0xff] }
  0x5f   : > { %4432 = vmatmul.msk.f32.vlgmr.msra.gmra.mxu0 %vm504_vm1, %v918_v42 }
  0x60   : > { %4442 = vmatmul.msk.f32.vlgmr.msra.gmra.mxu1 %vm504_vm1, %v4436_v43  ;;  %1705 = vmatpush.msra.mxu0 %v5271_v56 }
  0x61   : > { %1773 = vmatpush.msra.mxu1 %v5271_v56 }
  0x62   : > { %1117 = vmatmul.f32.vlgmr.msra.gmra.mxu3 %v5007_v12  ;;  %1706 = vmatpush.msra.mxu0 %v5282_v61 }
  0x63   : > { %1774 = vmatpush.msra.mxu1 %v5282_v61  ;;  %1255 = vmatpush.msra.mxu3 %v5271_v56 }
  0x64   : > { %1707 = vmatpush.msra.mxu0 %v5295_v1 }
  0x65   : > { %1775 = vmatpush.msra.mxu1 %v5295_v1  ;;  %1256 = vmatpush.msra.mxu3 %v5282_v61 }
  0x66   : > { %1708 = vmatpush.msra.mxu0 %v5304_v9 }
  0x67   : > { %4433 = vmatmul.msk.f32.gmra.mxu0 %vm504_vm1, %v919_v44  ;;  %1776 = vmatpush.msra.mxu1 %v5304_v9 }
  0x68   : > { %4443 = vmatmul.msk.f32.gmra.mxu1 %vm504_vm1, %v4437_v45  ;;  %1257 = vmatpush.msra.mxu3 %v5295_v1 }
  0x6a   : > { %1258 = vmatpush.msra.mxu3 %v5304_v9 }
  0x6f   : > { %4434 = vmatmul.msk.f32.gmra.mxu0 %vm504_vm1, %v920_v46 }
  0x70   : > { %4444 = vmatmul.msk.f32.gmra.mxu1 %vm504_vm1, %v4438_v47 }
  0x77   : > { %4435 = vmatmul.msk.f32.gmra.mxu0 %vm504_vm1, %v921_v48 }
  0x78   : > { %4445 = vmatmul.msk.f32.gmra.mxu1 %vm504_vm1, %v4439_v49 }
  0x9c   : > { %v538_v50 = vpop.f32.mrf.mxu0 }
  0x9d   : > { %v582_v51 = vpop.f32.mrf.mxu1 }
  0x9e   : > { %v583_v11 = vadd.f32 %v582_v51, %v538_v50 }
  0xa4   : > { %v541_v52 = vpop.f32.mrf.mxu0  ;;  %v632_v54 = vpop.f32.mrf.mxu2 }
  0xa5   : > { %v585_v53 = vpop.f32.mrf.mxu1  ;;  %v686_v57 = vpop.f32.mrf.mxu3  ;;  %v644_v13 = vadd.f32 %v632_v54, %v583_v11 }
  0xa6   : > { %v586_v18 = vadd.f32 %v585_v53, %v541_v52 }
  0xa7   : > { %v698_v17 = vadd.f32 %v686_v57, %v644_v13 }
  0xac   : > { %v5277_v58 = vpop.f32.mrf.mxu0  ;;  %v635_v60 = vpop.f32.mrf.mxu2 }
  0xad   : > { %v588_v59 = vpop.f32.mrf.mxu1  ;;  %v689_v62 = vpop.f32.mrf.mxu3  ;;  %v645_v21 = vadd.f32 %v635_v60, %v586_v18 }
  0xae   : > { %v589_v28 = vadd.f32 %v588_v59, %v5277_v58 }
  0xaf   : > { %v699_v25 = vadd.f32 %v689_v62, %v645_v21 }
  0xb4   : > { %v5288_v63 = vpop.f32.mrf.mxu0  ;;  %v638_v2 = vpop.f32.mrf.mxu2 }
  0xb5   : > { %v5290_v0 = vpop.f32.mrf.mxu1  ;;  %v692_v5 = vpop.f32.mrf.mxu3  ;;  %v646_v30 = vadd.f32 %v638_v2, %v589_v28 }
  0xb6   : > { %v592_v42 = vadd.f32 %v5290_v0, %v5288_v63 }
  0xb7   : > { %v700_v38 = vadd.f32 %v692_v5, %v646_v30 }
  0xbc   : > { %v740_v3 = vpop.f32.mrf.mxu0  ;;  %v641_v6 = vpop.f32.mrf.mxu2 }
  0xbd   : > { %v794_v4 = vpop.f32.mrf.mxu1  ;;  %v5308_v10 = vpop.f32.mrf.mxu3  ;;  %v752_v19 = vadd.f32 %v740_v3, %v698_v17  ;;  %v647_v46 = vadd.f32 %v641_v6, %v592_v42 }
  0xbf   : > { %v806_v24 = vadd.f32 %v794_v4, %v752_v19  ;;  %v701_v55 = vadd.f32 %v5308_v10, %v647_v46 }
  0xc4   : > { %v743_v7 = vpop.f32.mrf.mxu0  ;;  %v848_v16 = vpop.f32.mrf.mxu2 }
  0xc5   : > { %v797_v8 = vpop.f32.mrf.mxu1  ;;  %v902_v20 = vpop.f32.mrf.mxu3  ;;  %v860_v26 = vadd.f32 %v848_v16, %v806_v24  ;;  %v753_v29 = vadd.f32 %v743_v7, %v699_v25 }
  0xc7   : > { %v914_v31 = vadd.f32 %v902_v20, %v860_v26  ;;  %v807_v35 = vadd.f32 %v797_v8, %v753_v29 }
  0xcc   : > { %v746_v14 = vpop.f32.mrf.mxu0  ;;  %v851_v27 = vpop.f32.mrf.mxu2 }
  0xcd   : > { %v800_v15 = vpop.f32.mrf.mxu1  ;;  %v905_v32 = vpop.f32.mrf.mxu3  ;;  %v861_v39 = vadd.f32 %v851_v27, %v807_v35  ;;  %v754_v43 = vadd.f32 %v746_v14, %v700_v38 }
  0xcf   : > { %v915_v47 = vadd.f32 %v905_v32, %v861_v39  ;;  %v808_v51 = vadd.f32 %v800_v15, %v754_v43 }
  0xd4   : > { %v749_v22 = vpop.f32.mrf.mxu0  ;;  %v854_v44 = vpop.f32.mrf.mxu2 }
  0xd5   : > { %v803_v23 = vpop.f32.mrf.mxu1  ;;  %v908_v54 = vpop.f32.mrf.mxu3  ;;  %v862_v57 = vadd.f32 %v854_v44, %v808_v51  ;;  %v755_v59 = vadd.f32 %v749_v22, %v701_v55 }
  0xd7   : > { %v916_v62 = vadd.f32 %v908_v54, %v862_v57  ;;  %v809_v4 = vadd.f32 %v803_v23, %v755_v59  ;;  %v4630_v23 = vld [vmem:[%s6139_s6] ss:$0 sm:$0xff] }
  0xdc   : > { %v956_v33 = vpop.f32.mrf.mxu0  ;;  %v857_v63 = vpop.f32.mrf.mxu2 }
  0xdd   : > { %v1010_v34 = vpop.f32.mrf.mxu1  ;;  %v968_v36 = vadd.f32 %v956_v33, %v914_v31  ;;  %v863_v7 = vadd.f32 %v857_v63, %v809_v4  ;;  %v911_v10 = vpop.f32.mrf.mxu3 }
  0xdf   : > { %v1022_v40 = vadd.f32 %v1010_v34, %v968_v36  ;;  %v917_v13 = vadd.f32 %v911_v10, %v863_v7 }
  0xe1   : > { %v1030_v45 = vmul.f32 %v4628_v37, %v1022_v40 }
  0xe3   : > { %v1038_v48 = vadd.f32 %v4629_v41, %v1030_v45 }
  0xe4   : > { %v959_v49 = vpop.f32.mrf.mxu0 }
  0xe5   : > { %v1013_v50 = vpop.f32.mrf.mxu1  ;;  %v1042_v52 = vmax.f32 %v1038_v48, 0.0  ;;  %v969_v53 = vadd.f32 %v959_v49, %v915_v47  ;;  %v1118_v25 = vpop.f32.mrf.mxu3 }
  0xe7   : > { %v1023_v58 = vadd.f32 %v1013_v50, %v969_v53  ;;  %4446 = vmatmul.msk.f32.vlgmr.msra.gmra.mxu2 %vm1051_vm2, %v1042_v52 }
  0xe8   : > { %1847 = vmatpush.msra.mxu2 %v5271_v56 }
  0xe9   : > { %v1031_v60 = vmul.f32 %v4628_v37, %v1023_v58 }
  0xea   : > { %1848 = vmatpush.msra.mxu2 %v5282_v61 }
  0xeb   : > { %v1039_v0 = vadd.f32 %v4629_v41, %v1031_v60 }
  0xec   : > { %v962_v2 = vpop.f32.mrf.mxu0  ;;  %1849 = vmatpush.msra.mxu2 %v5295_v1 }
  0xed   : > { %v1016_v3 = vpop.f32.mrf.mxu1  ;;  %v970_v5 = vadd.f32 %v962_v2, %v916_v62  ;;  %v1043_v6 = vmax.f32 %v1039_v0, 0.0 }
  0xee   : > { %1850 = vmatpush.msra.mxu2 %v5304_v9 }
  0xef   : > { %v1024_v8 = vadd.f32 %v1016_v3, %v970_v5  ;;  %4447 = vmatmul.msk.f32.gmra.mxu2 %vm1051_vm2, %v1043_v6 }
  0xf1   : > { %v1032_v11 = vmul.f32 %v4628_v37, %v1024_v8 }
  0xf3   : > { %v1040_v14 = vadd.f32 %v4629_v41, %v1032_v11 }
  0xf4   : > { %v965_v15 = vpop.f32.mrf.mxu0 }
  0xf5   : > { %v1019_v16 = vpop.f32.mrf.mxu1  ;;  %v971_v17 = vadd.f32 %v965_v15, %v917_v13  ;;  %v1044_v18 = vmax.f32 %v1040_v14, 0.0 }
  0xf7   : > { %v1025_v19 = vadd.f32 %v1019_v16, %v971_v17  ;;  %4448 = vmatmul.msk.f32.gmra.mxu2 %vm1051_vm2, %v1044_v18 }
  0xf9   : > { %v1033_v20 = vmul.f32 %v4628_v37, %v1025_v19 }
  0xfb   : > { %v1041_v21 = vadd.f32 %v4629_v41, %v1033_v20 }
  0xfd   : > { %v1045_v22 = vmax.f32 %v1041_v21, 0.0 }
  0xff   : > { %4449 = vmatmul.msk.f32.gmra.mxu2 %vm1051_vm2, %v1045_v22 }
 0x16a   : > { %v1081_v24 = vpop.f32.mrf.mxu2 }
 0x16b   : > { %v5350_v26 = vadd.f32 %v4630_v23, %v1081_v24 }
 0x16d   : > { %v1121_v27 = vadd.f32 %v1118_v25, %v5350_v26 }
 0x16f   : > { %4634 = vtanh.f32 %v1121_v27  ;;  %v4450_v33 = vmul.f32 -1.442695, %v1121_v27 }
 0x171   : > { %4636 = vpow2.f32 %v4450_v33 }
 0x172   : > { %v1084_v28 = vpop.f32.mrf.mxu2 }
 0x173   : > { %v5353_v29 = vadd.f32 %v4630_v23, %v1084_v28 }
 0x175   : > { %v4635_v30 = vpop.eup %4634 }
 0x176   : > { %1144 = vrot.lane.b32.xlu0 %v4635_v30, %s6153_s29 }
 0x177   : > { %v4637_v34 = vpop.eup %4636 }
 0x178   : > { %v1125_v35 = vadd.f32 1.0, %v4637_v34 }
 0x17a   : > { %v1087_v31 = vpop.f32.mrf.mxu2  ;;  %4638 = vrcp.f32 %v1125_v35  ;;  %v1137_v41 = vand.u32 2147483648, %v1125_v35  ;;  %vm1131_vm4 = vweird.f32 %v1125_v35  ;;  %v1135_v42 = vand.u32 2147483647, %v1125_v35 }
 0x17b   : > { %v5356_v32 = vadd.f32 %v4630_v23, %v1087_v31 }
 0x17c   : > { %v1138_v44 = vor.u32 1.1754944e-38, %v1137_v41  ;;  %vm1136_vm6 = vcmp.eq.f32.partialorder %v1135_v42, 8.507059e+37 }
 0x180   : > { %v4639_v36 = vpop.eup %4638 }
 0x181   : > { %v1127_v37 = vmul.f32 %v4639_v36, %v1125_v35  ;;  %vm1132_vm3 = vweird.f32 %v4639_v36 }
 0x182   : > { %vm1133_vm5 = vmor %vm1131_vm4, %vm1132_vm3 }
 0x183   : > { %v1128_v38 = vsub.f32 1.0, %v1127_v37 }
 0x185   : > { %v1129_v39 = vmul.f32 %v4639_v36, %v1128_v38 }
 0x187   : > { %v1130_v40 = vadd.f32 %v4639_v36, %v1129_v39 }
 0x189   : > { %v1134_v43 = vsel %vm1133_vm5, %v4639_v36, %v1130_v40 }
 0x18a   : > { %v1139_v46 = vsel %vm1136_vm6, %v1138_v44, %v1134_v43 }
 0x18b   : > { %v1142_v48 = vmul.f32 0.0, %v1139_v46 }
 0x1e8   : > { %v1145_v45 = vpop.permute.xlu0 %1144 }
 0x1e9   : > { %v1147_v47 = vmul.f32 %v1145_v45, %v1139_v46 }
 0x1eb   : > { %1149 = vrot.lane.b32.xlu0 %v1147_v47, %s6153_s29 }
 0x25d   : > { %v1150_v49 = vpop.permute.xlu0 %1149 }
 0x25e   : > { %v1152_v50 = vadd.f32 %v1150_v49, %v1142_v48 }
 0x260   : > { %4640 = vtanh.f32 %v1152_v50  ;;  %v1212_v15 = vrot.slane %v1152_v50, 7 }
 0x266   : > { %v4641_v51 = vpop.eup %4640 }
 0x267   : > { %1155 = vrot.lane.b32.xlu1 %v4641_v51, %s6153_s29 }
 0x2d9   : > { %v1156_v52 = vpop.permute.xlu1 %1155 }
 0x2da   : > { %v1158_v53 = vmul.f32 %v1156_v52, %v1139_v46 }
 0x2dc   : > { %1160 = vrot.lane.b32.xlu1 %v1158_v53, %s6155_s30 }
 0x34e   : > { %v1161_v54 = vpop.permute.xlu1 %1160 }
 0x34f   : > { %1164 = vst.msk [vmem:[#allocation2] sm:$0x1] %vm1163_vm7, %v1161_v54  ;;  %4451 = vmatmul.msk.f32.vlgmr.msrb.gmra.mxu3 %vm1097_vm8, %v1161_v54 }
 0x350   : > { %1330 = vmatpush.msrb.mxu3 %v5271_v56 }
 0x352   : > { %1331 = vmatpush.msrb.mxu3 %v5282_v61 }
 0x354   : > { %1332 = vmatpush.msrb.mxu3 %v5295_v1 }
 0x356   : > { %1333 = vmatpush.msrb.mxu3 %v5304_v9 }
 0x3d2   : > { %v1184_v55 = vpop.f32.mrf.mxu3 }
 0x3d3   : > { %v1188_v57 = vrot.slane %v1184_v55, 7 }
 0x3d5   : > { %v1190_v58 = vadd.f32 %v1188_v57, %v5350_v26 }
 0x3d7   : > { %4642 = vtanh.f32 %v1190_v58  ;;  %v4452_v60 = vmul.f32 -1.442695, %v1190_v58 }
 0x3d9   : > { %4644 = vpow2.f32 %v4452_v60 }
 0x3dd   : > { %v4643_v59 = vpop.eup %4642 }
 0x3de   : > { %1216 = vrot.lane.b32.xlu2 %v4643_v59, %s6153_s29 }
 0x3df   : > { %v4645_v62 = vpop.eup %4644 }
 0x3e0   : > { %v1194_v63 = vadd.f32 1.0, %v4645_v62 }
 0x3e2   : > { %4646 = vrcp.f32 %v1194_v63  ;;  %v1206_v6 = vand.u32 2147483648, %v1194_v63  ;;  %vm1200_vm10 = vweird.f32 %v1194_v63  ;;  %v1204_v7 = vand.u32 2147483647, %v1194_v63 }
 0x3e4   : > { %v1207_v10 = vor.u32 1.1754944e-38, %v1206_v6  ;;  %vm1205_vm12 = vcmp.eq.f32.partialorder %v1204_v7, 8.507059e+37 }
 0x3e8   : > { %v4647_v0 = vpop.eup %4646 }
 0x3e9   : > { %v1196_v2 = vmul.f32 %v4647_v0, %v1194_v63  ;;  %vm1201_vm9 = vweird.f32 %v4647_v0 }
 0x3ea   : > { %vm1202_vm11 = vmor %vm1200_vm10, %vm1201_vm9 }
 0x3eb   : > { %v1197_v3 = vsub.f32 1.0, %v1196_v2 }
 0x3ed   : > { %v1198_v4 = vmul.f32 %v4647_v0, %v1197_v3 }
 0x3ef   : > { %v1199_v5 = vadd.f32 %v4647_v0, %v1198_v4 }
 0x3f1   : > { %v1203_v8 = vsel %vm1202_vm11, %v4647_v0, %v1199_v5 }
 0x3f2   : > { %v1208_v13 = vsel %vm1205_vm12, %v1207_v10, %v1203_v8 }
 0x3f3   : > { %v1214_v16 = vmul.f32 %v1212_v15, %v1208_v13 }
 0x438   : > { %v1217_v11 = vpop.permute.xlu2 %1216 }
 0x439   : > { %v1219_v14 = vmul.f32 %v1217_v11, %v1208_v13 }
 0x43b   : > { %1221 = vrot.lane.b32.xlu2 %v1219_v14, %s6153_s29 }
 0x495   : > { %v1222_v17 = vpop.permute.xlu2 %1221 }
 0x496   : > { %v1224_v18 = vadd.f32 %v1222_v17, %v1214_v16 }
 0x498   : > { %4648 = vtanh.f32 %v1224_v18  ;;  %v1288_v46 = vrot.slane %v1224_v18, 7 }
 0x49e   : > { %v4649_v19 = vpop.eup %4648 }
 0x49f   : > { %1227 = vrot.lane.b32.xlu0 %v4649_v19, %s6153_s29 }
 0x511   : > { %v1228_v20 = vpop.permute.xlu0 %1227 }
 0x512   : > { %v5371_v21 = vmul.f32 %v1228_v20, %v1208_v13 }
 0x514   : > { %v1238_v22 = vrot.slane %v5371_v21, 1 }
 0x516   : > { %1239 = vrot.lane.b32.xlu1 %v1238_v22, %s6155_s30 }
 0x588   : > { %v1240_v23 = vpop.permute.xlu1 %1239 }
 0x589   : > { %4453 = vmatmul.msk.f32.vlgmr.msra.gmra.mxu3 %vm1097_vm8, %v1240_v23 }
 0x58a   : > { %1630 = vmatpush.msra.mxu3 %v5271_v56 }
 0x58c   : > { %1631 = vmatpush.msra.mxu3 %v5282_v61 }
 0x58e   : > { %1632 = vmatpush.msra.mxu3 %v5295_v1 }
 0x590   : > { %1633 = vmatpush.msra.mxu3 %v5304_v9 }
 0x60c   : > { %v1260_v24 = vpop.f32.mrf.mxu3 }
 0x60d   : > { %v1264_v25 = vrot.slane %v1260_v24, 6 }
 0x60f   : > { %v1266_v27 = vadd.f32 %v1264_v25, %v5350_v26 }
 0x611   : > { %4650 = vtanh.f32 %v1266_v27  ;;  %v4454_v30 = vmul.f32 -1.442695, %v1266_v27 }
 0x613   : > { %4652 = vpow2.f32 %v4454_v30 }
 0x617   : > { %v4651_v28 = vpop.eup %4650 }
 0x618   : > { %1292 = vrot.lane.b32.xlu2 %v4651_v28, %s6153_s29 }
 0x619   : > { %v4653_v31 = vpop.eup %4652 }
 0x61a   : > { %v1270_v33 = vadd.f32 1.0, %v4653_v31 }
 0x61c   : > { %4654 = vrcp.f32 %v1270_v33  ;;  %v1282_v39 = vand.u32 2147483648, %v1270_v33  ;;  %vm1276_vm14 = vweird.f32 %v1270_v33  ;;  %v1280_v40 = vand.u32 2147483647, %v1270_v33 }
 0x61e   : > { %v1283_v42 = vor.u32 1.1754944e-38, %v1282_v39  ;;  %vm1281_vm0 = vcmp.eq.f32.partialorder %v1280_v40, 8.507059e+37 }
 0x622   : > { %v4655_v34 = vpop.eup %4654 }
 0x623   : > { %v1272_v35 = vmul.f32 %v4655_v34, %v1270_v33  ;;  %vm1277_vm13 = vweird.f32 %v4655_v34 }
 0x624   : > { %vm1278_vm15 = vmor %vm1276_vm14, %vm1277_vm13 }
 0x625   : > { %v1273_v36 = vsub.f32 1.0, %v1272_v35 }
 0x627   : > { %v1274_v37 = vmul.f32 %v4655_v34, %v1273_v36 }
 0x629   : > { %v1275_v38 = vadd.f32 %v4655_v34, %v1274_v37 }
 0x62b   : > { %v1279_v41 = vsel %vm1278_vm15, %v4655_v34, %v1275_v38 }
 0x62c   : > { %v1284_v44 = vsel %vm1281_vm0, %v1283_v42, %v1279_v41 }
 0x62d   : > { %v1290_v47 = vmul.f32 %v1288_v46, %v1284_v44 }
 0x672   : > { %v1293_v43 = vpop.permute.xlu2 %1292 }
 0x673   : > { %v1295_v45 = vmul.f32 %v1293_v43, %v1284_v44 }
 0x675   : > { %1297 = vrot.lane.b32.xlu0 %v1295_v45, %s6153_s29 }
 0x6e7   : > { %v1298_v48 = vpop.permute.xlu0 %1297 }
 0x6e8   : > { %v1300_v49 = vadd.f32 %v1298_v48, %v1290_v47 }
 0x6ea   : > { %4656 = vtanh.f32 %v1300_v49  ;;  %v1363_v15 = vrot.slane %v1300_v49, 7 }
 0x6f0   : > { %v4657_v50 = vpop.eup %4656 }
 0x6f1   : > { %1303 = vrot.lane.b32.xlu1 %v4657_v50, %s6153_s29 }
 0x763   : > { %v1304_v51 = vpop.permute.xlu1 %1303 }
 0x764   : > { %v5384_v52 = vmul.f32 %v1304_v51, %v1284_v44 }
 0x766   : > { %v1313_v53 = vrot.slane %v5384_v52, 2 }
 0x768   : > { %1314 = vrot.lane.b32.xlu2 %v1313_v53, %s6155_s30 }
 0x7c2   : > { %v1315_v54 = vpop.permute.xlu2 %1314 }
 0x7c3   : > { %4455 = vmatmul.msk.f32.vlgmr.msrb.gmra.mxu3 %vm1097_vm8, %v1315_v54 }
 0x7c4   : > { %1921 = vmatpush.msrb.mxu3 %v5271_v56 }
 0x7c6   : > { %1922 = vmatpush.msrb.mxu3 %v5282_v61 }
 0x7c8   : > { %1923 = vmatpush.msrb.mxu3 %v5295_v1 }
 0x7ca   : > { %1924 = vmatpush.msrb.mxu3 %v5304_v9 }
 0x846   : > { %v1335_v55 = vpop.f32.mrf.mxu3 }
 0x847   : > { %v1339_v57 = vrot.slane %v1335_v55, 5 }
 0x849   : > { %v1341_v58 = vadd.f32 %v1339_v57, %v5350_v26 }
 0x84b   : > { %4658 = vtanh.f32 %v1341_v58  ;;  %v4456_v60 = vmul.f32 -1.442695, %v1341_v58 }
 0x84d   : > { %4660 = vpow2.f32 %v4456_v60 }
 0x851   : > { %v4659_v59 = vpop.eup %4658 }
 0x852   : > { %1367 = vrot.lane.b32.xlu0 %v4659_v59, %s6153_s29 }
 0x853   : > { %v4661_v62 = vpop.eup %4660 }
 0x854   : > { %v1345_v63 = vadd.f32 1.0, %v4661_v62 }
 0x856   : > { %4662 = vrcp.f32 %v1345_v63  ;;  %v1357_v6 = vand.u32 2147483648, %v1345_v63  ;;  %vm1351_vm3 = vweird.f32 %v1345_v63  ;;  %v1355_v7 = vand.u32 2147483647, %v1345_v63 }
 0x858   : > { %v1358_v10 = vor.u32 1.1754944e-38, %v1357_v6  ;;  %vm1356_vm5 = vcmp.eq.f32.partialorder %v1355_v7, 8.507059e+37 }
 0x85c   : > { %v4663_v0 = vpop.eup %4662 }
 0x85d   : > { %v1347_v2 = vmul.f32 %v4663_v0, %v1345_v63  ;;  %vm1352_vm1 = vweird.f32 %v4663_v0 }
 0x85e   : > { %vm1353_vm4 = vmor %vm1351_vm3, %vm1352_vm1 }
 0x85f   : > { %v1348_v3 = vsub.f32 1.0, %v1347_v2 }
 0x861   : > { %v1349_v4 = vmul.f32 %v4663_v0, %v1348_v3 }
 0x863   : > { %v1350_v5 = vadd.f32 %v4663_v0, %v1349_v4 }
 0x865   : > { %v1354_v8 = vsel %vm1353_vm4, %v4663_v0, %v1350_v5 }
 0x866   : > { %v1359_v13 = vsel %vm1356_vm5, %v1358_v10, %v1354_v8 }
 0x867   : > { %v1365_v16 = vmul.f32 %v1363_v15, %v1359_v13 }
 0x8c4   : > { %v1368_v11 = vpop.permute.xlu0 %1367 }
 0x8c5   : > { %v1370_v14 = vmul.f32 %v1368_v11, %v1359_v13 }
 0x8c7   : > { %1372 = vrot.lane.b32.xlu1 %v1370_v14, %s6153_s29 }
 0x939   : > { %v1373_v17 = vpop.permute.xlu1 %1372 }
 0x93a   : > { %v1375_v18 = vadd.f32 %v1373_v17, %v1365_v16 }
 0x93c   : > { %4664 = vtanh.f32 %v1375_v18  ;;  %v1438_v47 = vrot.slane %v1375_v18, 7 }
 0x942   : > { %v4665_v19 = vpop.eup %4664 }
 0x943   : > { %1378 = vrot.lane.b32.xlu2 %v4665_v19, %s6153_s29 }
 0x99d   : > { %v1379_v20 = vpop.permute.xlu2 %1378 }
 0x99e   : > { %v5397_v22 = vmul.f32 %v1379_v20, %v1359_v13 }
 0x9a0   : > { %v1388_v23 = vrot.slane %v5397_v22, 3 }
 0x9a2   : > { %1389 = vrot.lane.b32.xlu0 %v1388_v23, %s6155_s30 }
 0xa14   : > { %v1390_v24 = vpop.permute.xlu0 %1389 }
 0xa15   : > { %4457 = vmatmul.msk.f32.vlgmr.msrb.gmra.mxu0 %vm1097_vm8, %v1390_v24 }
 0xa16   : > { %1995 = vmatpush.msrb.mxu0 %v5271_v56 }
 0xa18   : > { %1996 = vmatpush.msrb.mxu0 %v5282_v61 }
 0xa1a   : > { %1997 = vmatpush.msrb.mxu0 %v5295_v1 }
 0xa1c   : > { %1998 = vmatpush.msrb.mxu0 %v5304_v9 }
 0xa92   : > { %v1410_v25 = vpop.f32.mrf.mxu0 }
 0xa93   : > { %v1414_v27 = vrot.slane %v1410_v25, 4 }
 0xa95   : > { %v1416_v28 = vadd.f32 %v1414_v27, %v5350_v26 }
 0xa97   : > { %4666 = vtanh.f32 %v1416_v28  ;;  %v4458_v31 = vmul.f32 -1.442695, %v1416_v28 }
 0xa99   : > { %4668 = vpow2.f32 %v4458_v31 }
 0xa9d   : > { %v4667_v30 = vpop.eup %4666 }
 0xa9e   : > { %1442 = vrot.lane.b32.xlu1 %v4667_v30, %s6153_s29  ;;  %v5432_v30 = vpop.f32.mrf.mxu2 }
 0xa9f   : > { %v4669_v33 = vpop.eup %4668 }
 0xaa0   : > { %v1420_v34 = vadd.f32 1.0, %v4669_v33 }
 0xaa2   : > { %4670 = vrcp.f32 %v1420_v34  ;;  %v1432_v40 = vand.u32 2147483648, %v1420_v34  ;;  %vm1426_vm9 = vweird.f32 %v1420_v34  ;;  %v1430_v41 = vand.u32 2147483647, %v1420_v34 }
 0xaa4   : > { %v1433_v43 = vor.u32 1.1754944e-38, %v1432_v40  ;;  %vm1431_vm11 = vcmp.eq.f32.partialorder %v1430_v41, 8.507059e+37 }
 0xaa8   : > { %v4671_v35 = vpop.eup %4670 }
 0xaa9   : > { %v1422_v36 = vmul.f32 %v4671_v35, %v1420_v34  ;;  %vm1427_vm6 = vweird.f32 %v4671_v35 }
 0xaaa   : > { %vm1428_vm10 = vmor %vm1426_vm9, %vm1427_vm6 }
 0xaab   : > { %v1423_v37 = vsub.f32 1.0, %v1422_v36 }
 0xaad   : > { %v1424_v38 = vmul.f32 %v4671_v35, %v1423_v37 }
 0xaaf   : > { %v1425_v39 = vadd.f32 %v4671_v35, %v1424_v38 }
 0xab1   : > { %v1429_v42 = vsel %vm1428_vm10, %v4671_v35, %v1425_v39 }
 0xab2   : > { %v1434_v45 = vsel %vm1431_vm11, %v1433_v43, %v1429_v42 }
 0xab3   : > { %v1440_v48 = vmul.f32 %v1438_v47, %v1434_v45 }
 0xb10   : > { %v1443_v44 = vpop.permute.xlu1 %1442 }
 0xb11   : > { %v1445_v46 = vmul.f32 %v1443_v44, %v1434_v45 }
 0xb13   : > { %1447 = vrot.lane.b32.xlu2 %v1445_v46, %s6153_s29 }
 0xb6d   : > { %v1448_v49 = vpop.permute.xlu2 %1447 }
 0xb6e   : > { %v1450_v50 = vadd.f32 %v1448_v49, %v1440_v48 }
 0xb70   : > { %4672 = vtanh.f32 %v1450_v50  ;;  %v1513_v17 = vrot.slane %v1450_v50, 7 }
 0xb76   : > { %v4673_v51 = vpop.eup %4672 }
 0xb77   : > { %1453 = vrot.lane.b32.xlu0 %v4673_v51, %s6153_s29 }
 0xbe9   : > { %v1454_v53 = vpop.permute.xlu0 %1453 }
 0xbea   : > { %v5410_v54 = vmul.f32 %v1454_v53, %v1434_v45 }
 0xbec   : > { %v1463_v55 = vrot.slane %v5410_v54, 4 }
 0xbee   : > { %1464 = vrot.lane.b32.xlu1 %v1463_v55, %s6155_s30 }
 0xc60   : > { %v1465_v57 = vpop.permute.xlu1 %1464 }
 0xc61   : > { %4459 = vmatmul.msk.f32.vlgmr.msrb.gmra.mxu1 %vm1097_vm8, %v1465_v57 }
 0xc62   : > { %2069 = vmatpush.msrb.mxu1 %v5271_v56 }
 0xc64   : > { %2070 = vmatpush.msrb.mxu1 %v5282_v61 }
 0xc66   : > { %2071 = vmatpush.msrb.mxu1 %v5295_v1 }
 0xc68   : > { %2072 = vmatpush.msrb.mxu1 %v5304_v9 }
 0xcde   : > { %v1485_v58 = vpop.f32.mrf.mxu1 }
 0xcdf   : > { %v1489_v59 = vrot.slane %v1485_v58, 3 }
 0xce1   : > { %v1491_v60 = vadd.f32 %v1489_v59, %v5350_v26 }
 0xce3   : > { %4674 = vtanh.f32 %v1491_v60  ;;  %v4460_v63 = vmul.f32 -1.442695, %v1491_v60 }
 0xce5   : > { %4676 = vpow2.f32 %v4460_v63 }
 0xce9   : > { %v4675_v62 = vpop.eup %4674 }
 0xcea   : > { %1517 = vrot.lane.b32.xlu2 %v4675_v62, %s6153_s29 }
 0xceb   : > { %v4677_v0 = vpop.eup %4676 }
 0xcec   : > { %v1495_v2 = vadd.f32 1.0, %v4677_v0 }
 0xcee   : > { %4678 = vrcp.f32 %v1495_v2  ;;  %v1507_v8 = vand.u32 2147483648, %v1495_v2  ;;  %vm1501_vm13 = vweird.f32 %v1495_v2  ;;  %v1505_v10 = vand.u32 2147483647, %v1495_v2 }
 0xcf0   : > { %v1508_v13 = vor.u32 1.1754944e-38, %v1507_v8  ;;  %vm1506_vm15 = vcmp.eq.f32.partialorder %v1505_v10, 8.507059e+37 }
 0xcf4   : > { %v4679_v3 = vpop.eup %4678 }
 0xcf5   : > { %v1497_v4 = vmul.f32 %v4679_v3, %v1495_v2  ;;  %vm1502_vm12 = vweird.f32 %v4679_v3 }
 0xcf6   : > { %vm1503_vm14 = vmor %vm1501_vm13, %vm1502_vm12 }
 0xcf7   : > { %v1498_v5 = vsub.f32 1.0, %v1497_v4 }
 0xcf9   : > { %v1499_v6 = vmul.f32 %v4679_v3, %v1498_v5 }
 0xcfb   : > { %v1500_v7 = vadd.f32 %v4679_v3, %v1499_v6 }
 0xcfd   : > { %v1504_v11 = vsel %vm1503_vm14, %v4679_v3, %v1500_v7 }
 0xcfe   : > { %v1509_v15 = vsel %vm1506_vm15, %v1508_v13, %v1504_v11 }
 0xcff   : > { %v1515_v18 = vmul.f32 %v1513_v17, %v1509_v15 }
 0xd44   : > { %v1518_v14 = vpop.permute.xlu2 %1517 }
 0xd45   : > { %v1520_v16 = vmul.f32 %v1518_v14, %v1509_v15 }
 0xd47   : > { %1522 = vrot.lane.b32.xlu0 %v1520_v16, %s6153_s29 }
 0xdb9   : > { %v1523_v19 = vpop.permute.xlu0 %1522 }
 0xdba   : > { %v1525_v20 = vadd.f32 %v1523_v19, %v1515_v18 }
 0xdbc   : > { %4680 = vtanh.f32 %v1525_v20  ;;  %v1588_v51 = vrot.slane %v1525_v20, 7 }
 0xdc2   : > { %v4681_v23 = vpop.eup %4680 }
 0xdc3   : > { %1528 = vrot.lane.b32.xlu1 %v4681_v23, %s6153_s29 }
 0xe35   : > { %v1529_v24 = vpop.permute.xlu1 %1528 }
 0xe36   : > { %v5423_v25 = vmul.f32 %v1529_v24, %v1509_v15 }
 0xe38   : > { %v1538_v27 = vrot.slane %v5423_v25, 5 }
 0xe3a   : > { %1539 = vrot.lane.b32.xlu2 %v1538_v27, %s6155_s30 }
 0xe94   : > { %v1540_v28 = vpop.permute.xlu2 %1539 }
 0xe95   : > { %4461 = vmatmul.msk.f32.vlgmr.msrb.gmra.mxu2 %vm1097_vm8, %v1540_v28 }
 0xe96   : > { %2143 = vmatpush.msrb.mxu2 %v5271_v56 }
 0xe98   : > { %2144 = vmatpush.msrb.mxu2 %v5282_v61 }
 0xe9a   : > { %2145 = vmatpush.msrb.mxu2 %v5295_v1 }
 0xe9c   : > { %2146 = vmatpush.msrb.mxu2 %v5304_v9 }
 0xf18   : > { %v1560_v31 = vpop.f32.mrf.mxu2 }
 0xf19   : > { %v1564_v33 = vrot.slane %v1560_v31, 2 }
 0xf1b   : > { %v1566_v34 = vadd.f32 %v1564_v33, %v5350_v26 }
 0xf1d   : > { %4682 = vtanh.f32 %v1566_v34  ;;  %v4462_v36 = vmul.f32 -1.442695, %v1566_v34 }
 0xf1f   : > { %4684 = vpow2.f32 %v4462_v36 }
 0xf23   : > { %v4683_v35 = vpop.eup %4682 }
 0xf24   : > { %1592 = vrot.lane.b32.xlu0 %v4683_v35, %s6153_s29 }
 0xf25   : > { %v4685_v37 = vpop.eup %4684 }
 0xf26   : > { %v1570_v38 = vadd.f32 1.0, %v4685_v37 }
 0xf28   : > { %4686 = vrcp.f32 %v1570_v38  ;;  %v1582_v44 = vand.u32 2147483648, %v1570_v38  ;;  %vm1576_vm1 = vweird.f32 %v1570_v38  ;;  %v1580_v45 = vand.u32 2147483647, %v1570_v38 }
 0xf2a   : > { %v1583_v47 = vor.u32 1.1754944e-38, %v1582_v44  ;;  %vm1581_vm4 = vcmp.eq.f32.partialorder %v1580_v45, 8.507059e+37 }
 0xf2e   : > { %v4687_v39 = vpop.eup %4686 }
 0xf2f   : > { %v1572_v40 = vmul.f32 %v4687_v39, %v1570_v38  ;;  %vm1577_vm0 = vweird.f32 %v4687_v39 }
 0xf30   : > { %vm1578_vm3 = vmor %vm1576_vm1, %vm1577_vm0 }
 0xf31   : > { %v1573_v41 = vsub.f32 1.0, %v1572_v40 }
 0xf33   : > { %v1574_v42 = vmul.f32 %v4687_v39, %v1573_v41 }
 0xf35   : > { %v1575_v43 = vadd.f32 %v4687_v39, %v1574_v42 }
 0xf37   : > { %v1579_v46 = vsel %vm1578_vm3, %v4687_v39, %v1575_v43 }
 0xf38   : > { %v1584_v49 = vsel %vm1581_vm4, %v1583_v47, %v1579_v46 }
 0xf39   : > { %v1590_v53 = vmul.f32 %v1588_v51, %v1584_v49 }
 0xf96   : > { %v1593_v48 = vpop.permute.xlu0 %1592 }
 0xf97   : > { %v1595_v50 = vmul.f32 %v1593_v48, %v1584_v49 }
 0xf99   : > { %1597 = vrot.lane.b32.xlu1 %v1595_v50, %s6153_s29 }
0x100b   : > { %v1598_v55 = vpop.permute.xlu1 %1597 }
0x100c   : > { %v1600_v57 = vadd.f32 %v1598_v55, %v1590_v53 }
0x100e   : > { %4688 = vtanh.f32 %v1600_v57  ;;  %v1663_v23 = vrot.slane %v1600_v57, 7 }
0x1014   : > { %v4689_v58 = vpop.eup %4688 }
0x1015   : > { %1603 = vrot.lane.b32.xlu2 %v4689_v58, %s6153_s29 }
0x106f   : > { %v1604_v59 = vpop.permute.xlu2 %1603 }
0x1070   : > { %v5438_v60 = vmul.f32 %v1604_v59, %v1584_v49 }
0x1072   : > { %v1613_v62 = vrot.slane %v5438_v60, 6 }
0x1074   : > { %1614 = vrot.lane.b32.xlu0 %v1613_v62, %s6155_s30 }
0x10e6   : > { %v1615_v63 = vpop.permute.xlu0 %1614 }
0x10e7   : > { %4463 = vmatmul.msk.f32.vlgmr.msra.gmra.mxu3 %vm1097_vm8, %v1615_v63 }
0x10e8   : > { %2217 = vmatpush.msra.mxu3 %v5271_v56 }
0x10ea   : > { %2218 = vmatpush.msra.mxu3 %v5282_v61 }
0x10ec   : > { %2219 = vmatpush.msra.mxu3 %v5295_v1 }
0x10ee   : > { %2220 = vmatpush.msra.mxu3 %v5304_v9 }
0x116a   : > { %v1635_v0 = vpop.f32.mrf.mxu3 }
0x116b   : > { %v1639_v2 = vrot.slane %v1635_v0, 1  ;;  %v5470_v0 = vld [vmem:[%s6138_s5 + $0x18] sm:$0xff] }
0x116d   : > { %v1641_v3 = vadd.f32 %v1639_v2, %v5350_v26  ;;  %v5476_v2 = vld [vmem:[%s6138_s5 + $0x10] sm:$0xff] }
0x116f   : > { %4690 = vtanh.f32 %v1641_v3  ;;  %v4464_v5 = vmul.f32 -1.442695, %v1641_v3  ;;  %v5482_v3 = vld [vmem:[%s6138_s5 + $0x8] sm:$0xff] }
0x1171   : > { %4692 = vpow2.f32 %v4464_v5 }
0x1175   : > { %v4691_v4 = vpop.eup %4690 }
0x1176   : > { %1667 = vrot.lane.b32.xlu1 %v4691_v4, %s6153_s29  ;;  %v5488_v4 = vld [vmem:[%s6138_s5] sm:$0xff] }
0x1177   : > { %v4693_v6 = vpop.eup %4692 }
0x1178   : > { %v1645_v7 = vadd.f32 1.0, %v4693_v6 }
0x117a   : > { %4694 = vrcp.f32 %v1645_v7  ;;  %v1657_v15 = vand.u32 2147483648, %v1645_v7  ;;  %vm1651_vm6 = vweird.f32 %v1645_v7  ;;  %v1655_v16 = vand.u32 2147483647, %v1645_v7 }
0x117c   : > { %v1658_v17 = vor.u32 1.1754944e-38, %v1657_v15  ;;  %vm1656_vm10 = vcmp.eq.f32.partialorder %v1655_v16, 8.507059e+37 }
0x1180   : > { %v4695_v8 = vpop.eup %4694 }
0x1181   : > { %v1647_v10 = vmul.f32 %v4695_v8, %v1645_v7  ;;  %vm1652_vm5 = vweird.f32 %v4695_v8 }
0x1182   : > { %vm1653_vm9 = vmor %vm1651_vm6, %vm1652_vm5 }
0x1183   : > { %v1648_v11 = vsub.f32 1.0, %v1647_v10 }
0x1185   : > { %v1649_v13 = vmul.f32 %v4695_v8, %v1648_v11 }
0x1187   : > { %v1650_v14 = vadd.f32 %v4695_v8, %v1649_v13 }
0x1189   : > { %v1654_v26 = vsel %vm1653_vm9, %v4695_v8, %v1650_v14 }
0x118a   : > { %v1659_v19 = vsel %vm1656_vm10, %v1658_v17, %v1654_v26 }
0x118b   : > { %v1665_v24 = vmul.f32 %v1663_v23, %v1659_v19 }
0x11e8   : > { %v1668_v18 = vpop.permute.xlu1 %1667 }
0x11e9   : > { %v1670_v20 = vmul.f32 %v1668_v18, %v1659_v19 }
0x11eb   : > { %1672 = vrot.lane.b32.xlu2 %v1670_v20, %s6153_s29 }
0x1245   : > { %v1673_v27 = vpop.permute.xlu2 %1672 }
0x1246   : > { %v1675_v28 = vadd.f32 %v1673_v27, %v1665_v24 }
0x1248   : > { %4696 = vtanh.f32 %v1675_v28  ;;  %v1735_v51 = vrot.slane %v1675_v28, 7 }
0x124e   : > { %v4697_v31 = vpop.eup %4696 }
0x124f   : > { %1678 = vrot.lane.b32.xlu0 %v4697_v31, %s6153_s29 }
0x12c1   : > { %v1679_v33 = vpop.permute.xlu0 %1678 }
0x12c2   : > { %v5451_v34 = vmul.f32 %v1679_v33, %v1659_v19 }
0x12c4   : > { %v1688_v35 = vrot.slane %v5451_v34, 7 }
0x12c6   : > { %1689 = vrot.lane.b32.xlu1 %v1688_v35, %s6155_s30 }
0x1338   : > { %v1690_v36 = vpop.permute.xlu1 %1689 }
0x1339   : > { %4465 = vmatmul.msk.f32.vlgmr.msra.gmra.mxu0 %vm1097_vm8, %v1690_v36 }
0x133a   : > { %2291 = vmatpush.msra.mxu0 %v5271_v56 }
0x133c   : > { %2292 = vmatpush.msra.mxu0 %v5282_v61 }
0x133e   : > { %2293 = vmatpush.msra.mxu0 %v5295_v1 }
0x1340   : > { %2294 = vmatpush.msra.mxu0 %v5304_v9 }
0x13b6   : > { %v1710_v37 = vpop.f32.mrf.mxu0 }
0x13b7   : > { %v1713_v38 = vadd.f32 %v1710_v37, %v5353_v29 }
0x13b9   : > { %4698 = vtanh.f32 %v1713_v38  ;;  %v4466_v40 = vmul.f32 -1.442695, %v1713_v38 }
0x13bb   : > { %4700 = vpow2.f32 %v4466_v40 }
0x13bf   : > { %v4699_v39 = vpop.eup %4698 }
0x13c0   : > { %1739 = vrot.lane.b32.xlu2 %v4699_v39, %s6153_s29 }
0x13c1   : > { %v4701_v41 = vpop.eup %4700 }
0x13c2   : > { %v1717_v42 = vadd.f32 1.0, %v4701_v41 }
0x13c4   : > { %4702 = vrcp.f32 %v1717_v42  ;;  %v1729_v1 = vand.u32 2147483648, %v1717_v42  ;;  %vm1723_vm12 = vweird.f32 %v1717_v42  ;;  %v1727_v9 = vand.u32 2147483647, %v1717_v42 }
0x13c6   : > { %v1730_v47 = vor.u32 1.1754944e-38, %v1729_v1  ;;  %vm1728_vm14 = vcmp.eq.f32.partialorder %v1727_v9, 8.507059e+37 }
0x13ca   : > { %v4703_v43 = vpop.eup %4702 }
0x13cb   : > { %v1719_v56 = vmul.f32 %v4703_v43, %v1717_v42  ;;  %vm1724_vm11 = vweird.f32 %v4703_v43 }
0x13cc   : > { %vm1725_vm13 = vmor %vm1723_vm12, %vm1724_vm11 }
0x13cd   : > { %v1720_v44 = vsub.f32 1.0, %v1719_v56 }
0x13cf   : > { %v1721_v61 = vmul.f32 %v4703_v43, %v1720_v44 }
0x13d1   : > { %v1722_v45 = vadd.f32 %v4703_v43, %v1721_v61 }
0x13d3   : > { %v1726_v46 = vsel %vm1725_vm13, %v4703_v43, %v1722_v45 }
0x13d4   : > { %v1731_v49 = vsel %vm1728_vm14, %v1730_v47, %v1726_v46 }
0x13d5   : > { %v1737_v53 = vmul.f32 %v1735_v51, %v1731_v49 }
0x141a   : > { %v1740_v48 = vpop.permute.xlu2 %1739 }
0x141b   : > { %v1742_v50 = vmul.f32 %v1740_v48, %v1731_v49 }
0x141d   : > { %1744 = vrot.lane.b32.xlu0 %v1742_v50, %s6153_s29 }
0x148f   : > { %v1745_v55 = vpop.permute.xlu0 %1744 }
0x1490   : > { %v1747_v57 = vadd.f32 %v1745_v55, %v1737_v53 }
0x1492   : > { %4704 = vtanh.f32 %v1747_v57  ;;  %v1806_v31 = vrot.slane %v1747_v57, 7 }
0x1498   : > { %v4705_v58 = vpop.eup %4704 }
0x1499   : > { %1750 = vrot.lane.b32.xlu1 %v4705_v58, %s6153_s29 }
0x150b   : > { %v1751_v59 = vpop.permute.xlu1 %1750 }
0x150c   : > { %v1753_v62 = vmul.f32 %v1751_v59, %v1731_v49 }
0x150e   : > { %1755 = vrot.lane.b32.xlu2 %v1753_v62, %s6155_s30 }
0x1568   : > { %v1756_v63 = vpop.permute.xlu2 %1755 }
0x1569   : > { %1758 = vst.msk [vmem:[#allocation2 + $0x4] sm:$0x1] %vm1163_vm7, %v1756_v63  ;;  %4467 = vmatmul.msk.f32.vlgmr.msra.gmra.mxu1 %vm1097_vm8, %v1756_v63 }
0x156a   : > { %2359 = vmatpush.msra.mxu1 %v5470_v0 }
0x156c   : > { %2360 = vmatpush.msra.mxu1 %v5476_v2 }
0x156e   : > { %2361 = vmatpush.msra.mxu1 %v5482_v3 }
0x1570   : > { %2362 = vmatpush.msra.mxu1 %v5488_v4 }
0x15e6   : > { %v1778_v5 = vpop.f32.mrf.mxu1 }
0x15e7   : > { %v1782_v6 = vrot.slane %v1778_v5, 7 }
0x15e9   : > { %v1784_v7 = vadd.f32 %v1782_v6, %v5353_v29 }
0x15eb   : > { %4706 = vtanh.f32 %v1784_v7  ;;  %v4468_v10 = vmul.f32 -1.442695, %v1784_v7 }
0x15ed   : > { %4708 = vpow2.f32 %v4468_v10 }
0x15f1   : > { %v4707_v8 = vpop.eup %4706 }
0x15f2   : > { %1810 = vrot.lane.b32.xlu0 %v4707_v8, %s6153_s29 }
0x15f3   : > { %v4709_v11 = vpop.eup %4708 }
0x15f4   : > { %v1788_v13 = vadd.f32 1.0, %v4709_v11 }
0x15f6   : > { %4710 = vrcp.f32 %v1788_v13  ;;  %v1800_v18 = vand.u32 2147483648, %v1788_v13  ;;  %vm1794_vm0 = vweird.f32 %v1788_v13  ;;  %v1798_v19 = vand.u32 2147483647, %v1788_v13 }
0x15f8   : > { %v1801_v23 = vor.u32 1.1754944e-38, %v1800_v18  ;;  %vm1799_vm3 = vcmp.eq.f32.partialorder %v1798_v19, 8.507059e+37 }
0x15fc   : > { %v4711_v14 = vpop.eup %4710 }
0x15fd   : > { %v1790_v15 = vmul.f32 %v4711_v14, %v1788_v13  ;;  %vm1795_vm15 = vweird.f32 %v4711_v14 }
0x15fe   : > { %vm1796_vm1 = vmor %vm1794_vm0, %vm1795_vm15 }
0x15ff   : > { %v1791_v16 = vsub.f32 1.0, %v1790_v15 }
0x1601   : > { %v1792_v26 = vmul.f32 %v4711_v14, %v1791_v16 }
0x1603   : > { %v1793_v17 = vadd.f32 %v4711_v14, %v1792_v26 }
0x1605   : > { %v1797_v20 = vsel %vm1796_vm1, %v4711_v14, %v1793_v17 }
0x1606   : > { %v1802_v27 = vsel %vm1799_vm3, %v1801_v23, %v1797_v20 }
0x1607   : > { %v1808_v33 = vmul.f32 %v1806_v31, %v1802_v27 }
0x1664   : > { %v1811_v24 = vpop.permute.xlu0 %1810 }
0x1665   : > { %v1813_v28 = vmul.f32 %v1811_v24, %v1802_v27 }
0x1667   : > { %1815 = vrot.lane.b32.xlu1 %v1813_v28, %s6153_s29 }
0x16d9   : > { %v1816_v35 = vpop.permute.xlu1 %1815 }
0x16da   : > { %v1818_v36 = vadd.f32 %v1816_v35, %v1808_v33 }
0x16dc   : > { %4712 = vtanh.f32 %v1818_v36  ;;  %v1880_v62 = vrot.slane %v1818_v36, 7 }
0x16e2   : > { %v4713_v37 = vpop.eup %4712 }
0x16e3   : > { %1821 = vrot.lane.b32.xlu2 %v4713_v37, %s6153_s29 }
0x173d   : > { %v1822_v38 = vpop.permute.xlu2 %1821 }
0x173e   : > { %v5495_v39 = vmul.f32 %v1822_v38, %v1802_v27 }
0x1740   : > { %v1830_v40 = vrot.slane %v5495_v39, 1 }
0x1742   : > { %1831 = vrot.lane.b32.xlu0 %v1830_v40, %s6155_s30 }
0x17b4   : > { %v1832_v41 = vpop.permute.xlu0 %1831 }
0x17b5   : > { %4469 = vmatmul.msk.f32.vlgmr.msra.gmra.mxu2 %vm1097_vm8, %v1832_v41 }
0x17b6   : > { %2433 = vmatpush.msra.mxu2 %v5470_v0 }
0x17b8   : > { %2434 = vmatpush.msra.mxu2 %v5476_v2 }
0x17ba   : > { %2435 = vmatpush.msra.mxu2 %v5482_v3 }
0x17bc   : > { %2436 = vmatpush.msra.mxu2 %v5488_v4 }
0x1838   : > { %v1852_v42 = vpop.f32.mrf.mxu2 }
0x1839   : > { %v1856_v43 = vrot.slane %v1852_v42, 6 }
0x183b   : > { %v1858_v56 = vadd.f32 %v1856_v43, %v5353_v29 }
0x183d   : > { %4714 = vtanh.f32 %v1858_v56  ;;  %v4470_v61 = vmul.f32 -1.442695, %v1858_v56 }
0x183f   : > { %4716 = vpow2.f32 %v4470_v61 }
0x1843   : > { %v4715_v44 = vpop.eup %4714 }
0x1844   : > { %1884 = vrot.lane.b32.xlu1 %v4715_v44, %s6153_s29 }
0x1845   : > { %v4717_v45 = vpop.eup %4716 }
0x1846   : > { %v1862_v1 = vadd.f32 1.0, %v4717_v45 }
0x1848   : > { %4718 = vrcp.f32 %v1862_v1  ;;  %v1874_v50 = vand.u32 2147483648, %v1862_v1  ;;  %vm1868_vm5 = vweird.f32 %v1862_v1  ;;  %v1872_v51 = vand.u32 2147483647, %v1862_v1 }
0x184a   : > { %v1875_v55 = vor.u32 1.1754944e-38, %v1874_v50  ;;  %vm1873_vm9 = vcmp.eq.f32.partialorder %v1872_v51, 8.507059e+37 }
0x184e   : > { %v4719_v9 = vpop.eup %4718 }
0x184f   : > { %v1864_v46 = vmul.f32 %v4719_v9, %v1862_v1  ;;  %vm1869_vm4 = vweird.f32 %v4719_v9 }
0x1850   : > { %vm1870_vm6 = vmor %vm1868_vm5, %vm1869_vm4 }
0x1851   : > { %v1865_v47 = vsub.f32 1.0, %v1864_v46 }
0x1853   : > { %v1866_v48 = vmul.f32 %v4719_v9, %v1865_v47 }
0x1855   : > { %v1867_v49 = vadd.f32 %v4719_v9, %v1866_v48 }
0x1857   : > { %v1871_v53 = vsel %vm1870_vm6, %v4719_v9, %v1867_v49 }
0x1858   : > { %v1876_v58 = vsel %vm1873_vm9, %v1875_v55, %v1871_v53 }
0x1859   : > { %v1882_v63 = vmul.f32 %v1880_v62, %v1876_v58 }
0x18b6   : > { %v1885_v57 = vpop.permute.xlu1 %1884 }
0x18b7   : > { %v1887_v59 = vmul.f32 %v1885_v57, %v1876_v58 }
0x18b9   : > { %1889 = vrot.lane.b32.xlu2 %v1887_v59, %s6153_s29 }
0x1913   : > { %v1890_v5 = vpop.permute.xlu2 %1889 }
0x1914   : > { %v1892_v6 = vadd.f32 %v1890_v5, %v1882_v63 }
0x1916   : > { %4720 = vtanh.f32 %v1892_v6  ;;  %v1954_v41 = vrot.slane %v1892_v6, 7 }
0x191c   : > { %v4721_v7 = vpop.eup %4720 }
0x191d   : > { %1895 = vrot.lane.b32.xlu0 %v4721_v7, %s6153_s29 }
0x198f   : > { %v1896_v8 = vpop.permute.xlu0 %1895 }
0x1990   : > { %v5508_v10 = vmul.f32 %v1896_v8, %v1876_v58 }
0x1992   : > { %v1904_v11 = vrot.slane %v5508_v10, 2 }
0x1994   : > { %1905 = vrot.lane.b32.xlu1 %v1904_v11, %s6155_s30 }
0x1a06   : > { %v1906_v13 = vpop.permute.xlu1 %1905 }
0x1a07   : > { %4471 = vmatmul.msk.f32.vlgmr.msrb.gmra.mxu3 %vm1097_vm8, %v1906_v13 }
0x1a08   : > { %2507 = vmatpush.msrb.mxu3 %v5470_v0 }
0x1a0a   : > { %2508 = vmatpush.msrb.mxu3 %v5476_v2 }
0x1a0c   : > { %2509 = vmatpush.msrb.mxu3 %v5482_v3 }
0x1a0e   : > { %2510 = vmatpush.msrb.mxu3 %v5488_v4 }
0x1a8a   : > { %v1926_v14 = vpop.f32.mrf.mxu3 }
0x1a8b   : > { %v1930_v15 = vrot.slane %v1926_v14, 5 }
0x1a8d   : > { %v1932_v16 = vadd.f32 %v1930_v15, %v5353_v29 }
0x1a8f   : > { %4722 = vtanh.f32 %v1932_v16  ;;  %v4472_v17 = vmul.f32 -1.442695, %v1932_v16 }
0x1a91   : > { %4724 = vpow2.f32 %v4472_v17 }
0x1a95   : > { %v4723_v26 = vpop.eup %4722 }
0x1a96   : > { %1958 = vrot.lane.b32.xlu2 %v4723_v26, %s6153_s29 }
0x1a97   : > { %v4725_v18 = vpop.eup %4724 }
0x1a98   : > { %v1936_v19 = vadd.f32 1.0, %v4725_v18 }
0x1a9a   : > { %4726 = vrcp.f32 %v1936_v19  ;;  %v1948_v31 = vand.u32 2147483648, %v1936_v19  ;;  %vm1942_vm11 = vweird.f32 %v1936_v19  ;;  %v1946_v33 = vand.u32 2147483647, %v1936_v19 }
0x1a9c   : > { %v1949_v36 = vor.u32 1.1754944e-38, %v1948_v31  ;;  %vm1947_vm13 = vcmp.eq.f32.partialorder %v1946_v33, 8.507059e+37 }
0x1aa0   : > { %v4727_v20 = vpop.eup %4726 }
0x1aa1   : > { %v1938_v23 = vmul.f32 %v4727_v20, %v1936_v19  ;;  %vm1943_vm10 = vweird.f32 %v4727_v20 }
0x1aa2   : > { %vm1944_vm12 = vmor %vm1942_vm11, %vm1943_vm10 }
0x1aa3   : > { %v1939_v24 = vsub.f32 1.0, %v1938_v23 }
0x1aa5   : > { %v1940_v27 = vmul.f32 %v4727_v20, %v1939_v24 }
0x1aa7   : > { %v1941_v28 = vadd.f32 %v4727_v20, %v1940_v27 }
0x1aa9   : > { %v1945_v35 = vsel %vm1944_vm12, %v4727_v20, %v1941_v28 }
0x1aaa   : > { %v1950_v38 = vsel %vm1947_vm13, %v1949_v36, %v1945_v35 }
0x1aab   : > { %v1956_v42 = vmul.f32 %v1954_v41, %v1950_v38 }
0x1af0   : > { %v1959_v37 = vpop.permute.xlu2 %1958 }
0x1af1   : > { %v1961_v40 = vmul.f32 %v1959_v37, %v1950_v38 }
0x1af3   : > { %1963 = vrot.lane.b32.xlu0 %v1961_v40, %s6153_s29 }
0x1b65   : > { %v1964_v43 = vpop.permute.xlu0 %1963 }
0x1b66   : > { %v1966_v56 = vadd.f32 %v1964_v43, %v1956_v42 }
0x1b68   : > { %4728 = vtanh.f32 %v1966_v56  ;;  %v2028_v14 = vrot.slane %v1966_v56, 7 }
0x1b6e   : > { %v4729_v44 = vpop.eup %4728 }
0x1b6f   : > { %1969 = vrot.lane.b32.xlu1 %v4729_v44, %s6153_s29 }
0x1be1   : > { %v1970_v61 = vpop.permute.xlu1 %1969 }
0x1be2   : > { %v5521_v45 = vmul.f32 %v1970_v61, %v1950_v38 }
0x1be4   : > { %v1978_v1 = vrot.slane %v5521_v45, 3 }
0x1be6   : > { %1979 = vrot.lane.b32.xlu2 %v1978_v1, %s6155_s30 }
0x1c40   : > { %v1980_v9 = vpop.permute.xlu2 %1979 }
0x1c41   : > { %4473 = vmatmul.msk.f32.vlgmr.msrb.gmra.mxu0 %vm1097_vm8, %v1980_v9 }
0x1c42   : > { %2581 = vmatpush.msrb.mxu0 %v5470_v0 }
0x1c44   : > { %2582 = vmatpush.msrb.mxu0 %v5476_v2 }
0x1c46   : > { %2583 = vmatpush.msrb.mxu0 %v5482_v3 }
0x1c48   : > { %2584 = vmatpush.msrb.mxu0 %v5488_v4 }
0x1cbe   : > { %v2000_v46 = vpop.f32.mrf.mxu0 }
0x1cbf   : > { %v2004_v47 = vrot.slane %v2000_v46, 4 }
0x1cc1   : > { %v2006_v48 = vadd.f32 %v2004_v47, %v5353_v29 }
0x1cc3   : > { %4730 = vtanh.f32 %v2006_v48  ;;  %v4474_v50 = vmul.f32 -1.442695, %v2006_v48 }
0x1cc5   : > { %4732 = vpow2.f32 %v4474_v50 }
0x1cc9   : > { %v4731_v49 = vpop.eup %4730 }
0x1cca   : > { %2032 = vrot.lane.b32.xlu0 %v4731_v49, %s6153_s29 }
0x1ccb   : > { %v4733_v51 = vpop.eup %4732 }
0x1ccc   : > { %v2010_v53 = vadd.f32 1.0, %v4733_v51 }
0x1cce   : > { %4734 = vrcp.f32 %v2010_v53  ;;  %v2022_v63 = vand.u32 2147483648, %v2010_v53  ;;  %vm2016_vm15 = vweird.f32 %v2010_v53  ;;  %v2020_v5 = vand.u32 2147483647, %v2010_v53 }
0x1cd0   : > { %v2023_v7 = vor.u32 1.1754944e-38, %v2022_v63  ;;  %vm2021_vm1 = vcmp.eq.f32.partialorder %v2020_v5, 8.507059e+37 }
0x1cd4   : > { %v4735_v55 = vpop.eup %4734 }
0x1cd5   : > { %v2012_v57 = vmul.f32 %v4735_v55, %v2010_v53  ;;  %vm2017_vm14 = vweird.f32 %v4735_v55 }
0x1cd6   : > { %vm2018_vm0 = vmor %vm2016_vm15, %vm2017_vm14 }
0x1cd7   : > { %v2013_v58 = vsub.f32 1.0, %v2012_v57 }
0x1cd9   : > { %v2014_v59 = vmul.f32 %v4735_v55, %v2013_v58 }
0x1cdb   : > { %v2015_v62 = vadd.f32 %v4735_v55, %v2014_v59 }
0x1cdd   : > { %v2019_v6 = vsel %vm2018_vm0, %v4735_v55, %v2015_v62 }
0x1cde   : > { %v2024_v11 = vsel %vm2021_vm1, %v2023_v7, %v2019_v6 }
0x1cdf   : > { %v2030_v15 = vmul.f32 %v2028_v14, %v2024_v11 }
0x1d3c   : > { %v2033_v8 = vpop.permute.xlu0 %2032 }
0x1d3d   : > { %v2035_v13 = vmul.f32 %v2033_v8, %v2024_v11 }
0x1d3f   : > { %2037 = vrot.lane.b32.xlu1 %v2035_v13, %s6153_s29 }
0x1db1   : > { %v2038_v16 = vpop.permute.xlu1 %2037 }
0x1db2   : > { %v2040_v26 = vadd.f32 %v2038_v16, %v2030_v15 }
0x1db4   : > { %4736 = vtanh.f32 %v2040_v26  ;;  %v2102_v47 = vrot.slane %v2040_v26, 7 }
0x1dba   : > { %v4737_v17 = vpop.eup %4736 }
0x1dbb   : > { %2043 = vrot.lane.b32.xlu2 %v4737_v17, %s6153_s29 }
0x1e15   : > { %v2044_v18 = vpop.permute.xlu2 %2043 }
0x1e16   : > { %v5534_v19 = vmul.f32 %v2044_v18, %v2024_v11 }
0x1e18   : > { %v2052_v20 = vrot.slane %v5534_v19, 4 }
0x1e1a   : > { %2053 = vrot.lane.b32.xlu0 %v2052_v20, %s6155_s30 }
0x1e8c   : > { %v2054_v23 = vpop.permute.xlu0 %2053 }
0x1e8d   : > { %4475 = vmatmul.msk.f32.vlgmr.msrb.gmra.mxu1 %vm1097_vm8, %v2054_v23 }
0x1e8e   : > { %2655 = vmatpush.msrb.mxu1 %v5470_v0 }
0x1e90   : > { %2656 = vmatpush.msrb.mxu1 %v5476_v2 }
0x1e92   : > { %2657 = vmatpush.msrb.mxu1 %v5482_v3 }
0x1e94   : > { %2658 = vmatpush.msrb.mxu1 %v5488_v4 }
0x1f0a   : > { %v2074_v24 = vpop.f32.mrf.mxu1 }
0x1f0b   : > { %v2078_v27 = vrot.slane %v2074_v24, 3 }
0x1f0d   : > { %v2080_v28 = vadd.f32 %v2078_v27, %v5353_v29 }
0x1f0f   : > { %4738 = vtanh.f32 %v2080_v28  ;;  %v4476_v33 = vmul.f32 -1.442695, %v2080_v28 }
0x1f11   : > { %4740 = vpow2.f32 %v4476_v33 }
0x1f15   : > { %v4739_v31 = vpop.eup %4738 }
0x1f16   : > { %2106 = vrot.lane.b32.xlu1 %v4739_v31, %s6153_s29 }
0x1f17   : > { %v4741_v35 = vpop.eup %4740 }
0x1f18   : > { %v2084_v36 = vadd.f32 1.0, %v4741_v35 }
0x1f1a   : > { %4742 = vrcp.f32 %v2084_v36  ;;  %v2096_v43 = vand.u32 2147483648, %v2084_v36  ;;  %vm2090_vm4 = vweird.f32 %v2084_v36  ;;  %v2094_v56 = vand.u32 2147483647, %v2084_v36 }
0x1f1c   : > { %v2097_v61 = vor.u32 1.1754944e-38, %v2096_v43  ;;  %vm2095_vm6 = vcmp.eq.f32.partialorder %v2094_v56, 8.507059e+37 }
0x1f20   : > { %v4743_v37 = vpop.eup %4742 }
0x1f21   : > { %v2086_v38 = vmul.f32 %v4743_v37, %v2084_v36  ;;  %vm2091_vm3 = vweird.f32 %v4743_v37 }
0x1f22   : > { %vm2092_vm5 = vmor %vm2090_vm4, %vm2091_vm3 }
0x1f23   : > { %v2087_v40 = vsub.f32 1.0, %v2086_v38 }
0x1f25   : > { %v2088_v41 = vmul.f32 %v4743_v37, %v2087_v40 }
0x1f27   : > { %v2089_v42 = vadd.f32 %v4743_v37, %v2088_v41 }
0x1f29   : > { %v2093_v44 = vsel %vm2092_vm5, %v4743_v37, %v2089_v42 }
0x1f2a   : > { %v2098_v9 = vsel %vm2095_vm6, %v2097_v61, %v2093_v44 }
0x1f2b   : > { %v2104_v48 = vmul.f32 %v2102_v47, %v2098_v9 }
0x1f88   : > { %v2107_v1 = vpop.permute.xlu1 %2106 }
0x1f89   : > { %v2109_v46 = vmul.f32 %v2107_v1, %v2098_v9 }
0x1f8b   : > { %2111 = vrot.lane.b32.xlu2 %v2109_v46, %s6153_s29 }
0x1fe5   : > { %v2112_v49 = vpop.permute.xlu2 %2111 }
0x1fe6   : > { %v2114_v50 = vadd.f32 %v2112_v49, %v2104_v48 }
0x1fe8   : > { %4744 = vtanh.f32 %v2114_v50  ;;  %v2176_v28 = vrot.slane %v2114_v50, 7 }
0x1fee   : > { %v4745_v51 = vpop.eup %4744 }
0x1fef   : > { %2117 = vrot.lane.b32.xlu0 %v4745_v51, %s6153_s29 }
0x2061   : > { %v2118_v53 = vpop.permute.xlu0 %2117 }
0x2062   : > { %v5547_v55 = vmul.f32 %v2118_v53, %v2098_v9 }
0x2064   : > { %v2126_v57 = vrot.slane %v5547_v55, 5 }
0x2066   : > { %2127 = vrot.lane.b32.xlu1 %v2126_v57, %s6155_s30 }
0x20d8   : > { %v2128_v58 = vpop.permute.xlu1 %2127 }
0x20d9   : > { %4477 = vmatmul.msk.f32.vlgmr.msrb.gmra.mxu2 %vm1097_vm8, %v2128_v58 }
0x20da   : > { %2729 = vmatpush.msrb.mxu2 %v5470_v0 }
0x20dc   : > { %2730 = vmatpush.msrb.mxu2 %v5476_v2 }
0x20de   : > { %2731 = vmatpush.msrb.mxu2 %v5482_v3 }
0x20e0   : > { %2732 = vmatpush.msrb.mxu2 %v5488_v4 }
0x215c   : > { %v2148_v59 = vpop.f32.mrf.mxu2 }
0x215d   : > { %v2152_v62 = vrot.slane %v2148_v59, 2 }
0x215f   : > { %v2154_v63 = vadd.f32 %v2152_v62, %v5353_v29 }
0x2161   : > { %4746 = vtanh.f32 %v2154_v63  ;;  %v4478_v6 = vmul.f32 -1.442695, %v2154_v63 }
0x2163   : > { %4748 = vpow2.f32 %v4478_v6 }
0x2167   : > { %v4747_v5 = vpop.eup %4746 }
0x2168   : > { %2180 = vrot.lane.b32.xlu2 %v4747_v5, %s6153_s29 }
0x2169   : > { %v4749_v7 = vpop.eup %4748 }
0x216a   : > { %v2158_v8 = vadd.f32 1.0, %v4749_v7 }
0x216c   : > { %4750 = vrcp.f32 %v2158_v8  ;;  %v2170_v26 = vand.u32 2147483648, %v2158_v8  ;;  %vm2164_vm10 = vweird.f32 %v2158_v8  ;;  %v2168_v17 = vand.u32 2147483647, %v2158_v8 }
0x216e   : > { %v2171_v20 = vor.u32 1.1754944e-38, %v2170_v26  ;;  %vm2169_vm12 = vcmp.eq.f32.partialorder %v2168_v17, 8.507059e+37 }
0x2172   : > { %v4751_v11 = vpop.eup %4750 }
0x2173   : > { %v2160_v13 = vmul.f32 %v4751_v11, %v2158_v8  ;;  %vm2165_vm9 = vweird.f32 %v4751_v11 }
0x2174   : > { %vm2166_vm11 = vmor %vm2164_vm10, %vm2165_vm9 }
0x2175   : > { %v2161_v14 = vsub.f32 1.0, %v2160_v13 }
0x2177   : > { %v2162_v15 = vmul.f32 %v4751_v11, %v2161_v14 }
0x2179   : > { %v2163_v16 = vadd.f32 %v4751_v11, %v2162_v15 }
0x217b   : > { %v2167_v18 = vsel %vm2166_vm11, %v4751_v11, %v2163_v16 }
0x217c   : > { %v2172_v24 = vsel %vm2169_vm12, %v2171_v20, %v2167_v18 }
0x217d   : > { %v2178_v31 = vmul.f32 %v2176_v28, %v2172_v24 }
0x21c2   : > { %v2181_v23 = vpop.permute.xlu2 %2180 }
0x21c3   : > { %v2183_v27 = vmul.f32 %v2181_v23, %v2172_v24 }
0x21c5   : > { %2185 = vrot.lane.b32.xlu0 %v2183_v27, %s6153_s29 }
0x2237   : > { %v2186_v33 = vpop.permute.xlu0 %2185 }
0x2238   : > { %v2188_v35 = vadd.f32 %v2186_v33, %v2178_v31 }
0x223a   : > { %4752 = vtanh.f32 %v2188_v35  ;;  %v2250_v63 = vrot.slane %v2188_v35, 7 }
0x2240   : > { %v4753_v36 = vpop.eup %4752 }
0x2241   : > { %2191 = vrot.lane.b32.xlu1 %v4753_v36, %s6153_s29 }
0x22b3   : > { %v2192_v37 = vpop.permute.xlu1 %2191 }
0x22b4   : > { %v5560_v38 = vmul.f32 %v2192_v37, %v2172_v24 }
0x22b6   : > { %v2200_v40 = vrot.slane %v5560_v38, 6 }
0x22b8   : > { %2201 = vrot.lane.b32.xlu2 %v2200_v40, %s6155_s30 }
0x2312   : > { %v2202_v41 = vpop.permute.xlu2 %2201 }
0x2313   : > { %4479 = vmatmul.msk.f32.vlgmr.msra.gmra.mxu3 %vm1097_vm8, %v2202_v41 }
0x2314   : > { %2803 = vmatpush.msra.mxu3 %v5470_v0 }
0x2316   : > { %2804 = vmatpush.msra.mxu3 %v5476_v2 }
0x2318   : > { %2805 = vmatpush.msra.mxu3 %v5482_v3 }
0x231a   : > { %2806 = vmatpush.msra.mxu3 %v5488_v4 }
0x2396   : > { %v2222_v42 = vpop.f32.mrf.mxu3 }
0x2397   : > { %v2226_v43 = vrot.slane %v2222_v42, 1 }
0x2399   : > { %v2228_v56 = vadd.f32 %v2226_v43, %v5353_v29 }
0x239b   : > { %4754 = vtanh.f32 %v2228_v56  ;;  %v4480_v61 = vmul.f32 -1.442695, %v2228_v56 }
0x239d   : > { %4756 = vpow2.f32 %v4480_v61 }
0x23a1   : > { %v4755_v44 = vpop.eup %4754 }
0x23a2   : > { %2254 = vrot.lane.b32.xlu0 %v4755_v44, %s6153_s29 }
0x23a3   : > { %v4757_v1 = vpop.eup %4756 }
0x23a4   : > { %v2232_v9 = vadd.f32 1.0, %v4757_v1 }
0x23a6   : > { %4758 = vrcp.f32 %v2232_v9  ;;  %v2244_v51 = vand.u32 2147483648, %v2232_v9  ;;  %vm2238_vm14 = vweird.f32 %v2232_v9  ;;  %v2242_v53 = vand.u32 2147483647, %v2232_v9 }
0x23a8   : > { %v2245_v57 = vor.u32 1.1754944e-38, %v2244_v51  ;;  %vm2243_vm0 = vcmp.eq.f32.partialorder %v2242_v53, 8.507059e+37 }
0x23ac   : > { %v4759_v46 = vpop.eup %4758 }
0x23ad   : > { %v2234_v47 = vmul.f32 %v4759_v46, %v2232_v9  ;;  %vm2239_vm13 = vweird.f32 %v4759_v46 }
0x23ae   : > { %vm2240_vm15 = vmor %vm2238_vm14, %vm2239_vm13 }
0x23af   : > { %v2235_v48 = vsub.f32 1.0, %v2234_v47 }
0x23b1   : > { %v2236_v49 = vmul.f32 %v4759_v46, %v2235_v48 }
0x23b3   : > { %v2237_v50 = vadd.f32 %v4759_v46, %v2236_v49 }
0x23b5   : > { %v2241_v29 = vsel %vm2240_vm15, %v4759_v46, %v2237_v50 }
0x23b6   : > { %v2246_v59 = vsel %vm2243_vm0, %v2245_v57, %v2241_v29 }
0x23b7   : > { %v2252_v5 = vmul.f32 %v2250_v63, %v2246_v59 }
0x2414   : > { %v2255_v58 = vpop.permute.xlu0 %2254 }
0x2415   : > { %v2257_v62 = vmul.f32 %v2255_v58, %v2246_v59 }
0x2417   : > { %2259 = vrot.lane.b32.xlu1 %v2257_v62, %s6153_s29 }
0x2489   : > { %v2260_v6 = vpop.permute.xlu1 %2259 }
0x248a   : > { %v2262_v7 = vadd.f32 %v2260_v6, %v2252_v5 }
0x248c   : > { %4760 = vtanh.f32 %v2262_v7  ;;  %v2321_v56 = vrot.slane %v2262_v7, 7 }
0x2492   : > { %v4761_v8 = vpop.eup %4760 }
0x2493   : > { %2265 = vrot.lane.b32.xlu2 %v4761_v8, %s6153_s29 }
0x24ed   : > { %v2266_v11 = vpop.permute.xlu2 %2265 }
0x24ee   : > { %v5573_v13 = vmul.f32 %v2266_v11, %v2246_v59 }
0x24f0   : > { %v2274_v14 = vrot.slane %v5573_v13, 7 }
0x24f2   : > { %2275 = vrot.lane.b32.xlu0 %v2274_v14, %s6155_s30 }
0x2564   : > { %v2276_v15 = vpop.permute.xlu0 %2275 }
0x2565   : > { %4481 = vmatmul.msk.f32.vlgmr.msra.gmra.mxu0 %vm1097_vm8, %v2276_v15 }
0x2566   : > { %2877 = vmatpush.msra.mxu0 %v5470_v0 }
0x2568   : > { %2878 = vmatpush.msra.mxu0 %v5476_v2 }
0x256a   : > { %2879 = vmatpush.msra.mxu0 %v5482_v3 }
0x256c   : > { %2880 = vmatpush.msra.mxu0 %v5488_v4 }
0x25e2   : > { %v2296_v16 = vpop.f32.mrf.mxu0 }
0x25e3   : > { %v2299_v26 = vadd.f32 %v2296_v16, %v5356_v32 }
0x25e5   : > { %4762 = vtanh.f32 %v2299_v26  ;;  %v4482_v18 = vmul.f32 -1.442695, %v2299_v26 }
0x25e7   : > { %4764 = vpow2.f32 %v4482_v18 }
0x25eb   : > { %v4763_v17 = vpop.eup %4762 }
0x25ec   : > { %2325 = vrot.lane.b32.xlu1 %v4763_v17, %s6153_s29 }
0x25ed   : > { %v4765_v20 = vpop.eup %4764 }
0x25ee   : > { %v2303_v23 = vadd.f32 1.0, %v4765_v20 }
0x25f0   : > { %4766 = vrcp.f32 %v2303_v23  ;;  %v2315_v35 = vand.u32 2147483648, %v2303_v23  ;;  %vm2309_vm3 = vweird.f32 %v2303_v23  ;;  %v2313_v36 = vand.u32 2147483647, %v2303_v23 }
0x25f2   : > { %v2316_v40 = vor.u32 1.1754944e-38, %v2315_v35  ;;  %vm2314_vm5 = vcmp.eq.f32.partialorder %v2313_v36, 8.507059e+37 }
0x25f6   : > { %v4767_v24 = vpop.eup %4766 }
0x25f7   : > { %v2305_v27 = vmul.f32 %v4767_v24, %v2303_v23  ;;  %vm2310_vm1 = vweird.f32 %v4767_v24 }
0x25f8   : > { %vm2311_vm4 = vmor %vm2309_vm3, %vm2310_vm1 }
0x25f9   : > { %v2306_v28 = vsub.f32 1.0, %v2305_v27 }
0x25fb   : > { %v2307_v31 = vmul.f32 %v4767_v24, %v2306_v28 }
0x25fd   : > { %v2308_v33 = vadd.f32 %v4767_v24, %v2307_v31 }
0x25ff   : > { %v2312_v37 = vsel %vm2311_vm4, %v4767_v24, %v2308_v33 }
0x2600   : > { %v2317_v42 = vsel %vm2314_vm5, %v2316_v40, %v2312_v37 }
0x2601   : > { %v2323_v44 = vmul.f32 %v2321_v56, %v2317_v42 }
0x265e   : > { %v2326_v41 = vpop.permute.xlu1 %2325 }
0x265f   : > { %v2328_v43 = vmul.f32 %v2326_v41, %v2317_v42 }
0x2661   : > { %2330 = vrot.lane.b32.xlu2 %v2328_v43, %s6153_s29 }
0x26bb   : > { %v2331_v61 = vpop.permute.xlu2 %2330 }
0x26bc   : > { %v2333_v1 = vadd.f32 %v2331_v61, %v2323_v44 }
0x26be   : > { %4768 = vtanh.f32 %v2333_v1  ;;  %v2392_v17 = vrot.slane %v2333_v1, 7 }
0x26c4   : > { %v4769_v9 = vpop.eup %4768 }
0x26c5   : > { %2336 = vrot.lane.b32.xlu0 %v4769_v9, %s6153_s29 }
0x2737   : > { %v2337_v46 = vpop.permute.xlu0 %2336 }
0x2738   : > { %v2339_v47 = vmul.f32 %v2337_v46, %v2317_v42 }
0x273a   : > { %2341 = vrot.lane.b32.xlu1 %v2339_v47, %s6155_s30 }
0x27ac   : > { %v2342_v48 = vpop.permute.xlu1 %2341 }
0x27ad   : > { %2344 = vst.msk [vmem:[#allocation2 + $0x8] sm:$0x1] %vm1163_vm7, %v2342_v48  ;;  %4483 = vmatmul.msk.f32.vlgmr.msra.gmra.mxu1 %vm1097_vm8, %v2342_v48 }
0x27ae   : > { %2945 = vmatpush.msra.mxu1 %v5470_v0 }
0x27b0   : > { %2946 = vmatpush.msra.mxu1 %v5476_v2 }
0x27b2   : > { %2947 = vmatpush.msra.mxu1 %v5482_v3 }
0x27b4   : > { %2948 = vmatpush.msra.mxu1 %v5488_v4 }
0x282a   : > { %v2364_v49 = vpop.f32.mrf.mxu1 }
0x282b   : > { %v2368_v50 = vrot.slane %v2364_v49, 7 }
0x282d   : > { %v2370_v51 = vadd.f32 %v2368_v50, %v5356_v32 }
0x282f   : > { %4770 = vtanh.f32 %v2370_v51  ;;  %v4484_v29 = vmul.f32 -1.442695, %v2370_v51 }
0x2831   : > { %4772 = vpow2.f32 %v4484_v29 }
0x2835   : > { %v4771_v53 = vpop.eup %4770 }
0x2836   : > { %2396 = vrot.lane.b32.xlu2 %v4771_v53, %s6153_s29 }
0x2837   : > { %v4773_v57 = vpop.eup %4772 }
0x2838   : > { %v2374_v58 = vadd.f32 1.0, %v4773_v57 }
0x283a   : > { %4774 = vrcp.f32 %v2374_v58  ;;  %v2386_v7 = vand.u32 2147483648, %v2374_v58  ;;  %vm2380_vm9 = vweird.f32 %v2374_v58  ;;  %v2384_v8 = vand.u32 2147483647, %v2374_v58 }
0x283c   : > { %v2387_v14 = vor.u32 1.1754944e-38, %v2386_v7  ;;  %vm2385_vm11 = vcmp.eq.f32.partialorder %v2384_v8, 8.507059e+37 }
0x2840   : > { %v4775_v59 = vpop.eup %4774 }
0x2841   : > { %v2376_v62 = vmul.f32 %v4775_v59, %v2374_v58  ;;  %vm2381_vm6 = vweird.f32 %v4775_v59 }
0x2842   : > { %vm2382_vm10 = vmor %vm2380_vm9, %vm2381_vm6 }
0x2843   : > { %v2377_v63 = vsub.f32 1.0, %v2376_v62 }
0x2845   : > { %v2378_v5 = vmul.f32 %v4775_v59, %v2377_v63 }
0x2847   : > { %v2379_v6 = vadd.f32 %v4775_v59, %v2378_v5 }
0x2849   : > { %v2383_v11 = vsel %vm2382_vm10, %v4775_v59, %v2379_v6 }
0x284a   : > { %v2388_v16 = vsel %vm2385_vm11, %v2387_v14, %v2383_v11 }
0x284b   : > { %v2394_v18 = vmul.f32 %v2392_v17, %v2388_v16 }
0x2890   : > { %v2397_v15 = vpop.permute.xlu2 %2396 }
0x2891   : > { %v2399_v26 = vmul.f32 %v2397_v15, %v2388_v16 }
0x2893   : > { %2401 = vrot.lane.b32.xlu0 %v2399_v26, %s6153_s29 }
0x2905   : > { %v2402_v20 = vpop.permute.xlu0 %2401 }
0x2906   : > { %v2404_v23 = vadd.f32 %v2402_v20, %v2394_v18 }
0x2908   : > { %4776 = vtanh.f32 %v2404_v23  ;;  %v2466_v29 = vrot.slane %v2404_v23, 7 }
0x290e   : > { %v4777_v24 = vpop.eup %4776 }
0x290f   : > { %2407 = vrot.lane.b32.xlu1 %v4777_v24, %s6153_s29 }
0x2981   : > { %v2408_v27 = vpop.permute.xlu1 %2407 }
0x2982   : > { %v5597_v28 = vmul.f32 %v2408_v27, %v2388_v16 }
0x2984   : > { %v2416_v31 = vrot.slane %v5597_v28, 1 }
0x2986   : > { %2417 = vrot.lane.b32.xlu2 %v2416_v31, %s6155_s30 }
0x29e0   : > { %v2418_v33 = vpop.permute.xlu2 %2417 }
0x29e1   : > { %4485 = vmatmul.msk.f32.vlgmr.msra.gmra.mxu2 %vm1097_vm8, %v2418_v33 }
0x29e2   : > { %3019 = vmatpush.msra.mxu2 %v5470_v0 }
0x29e4   : > { %3020 = vmatpush.msra.mxu2 %v5476_v2 }
0x29e6   : > { %3021 = vmatpush.msra.mxu2 %v5482_v3 }
0x29e8   : > { %3022 = vmatpush.msra.mxu2 %v5488_v4 }
0x2a64   : > { %v2438_v35 = vpop.f32.mrf.mxu2 }
0x2a65   : > { %v2442_v36 = vrot.slane %v2438_v35, 6 }
0x2a67   : > { %v2444_v37 = vadd.f32 %v2442_v36, %v5356_v32 }
0x2a69   : > { %4778 = vtanh.f32 %v2444_v37  ;;  %v4486_v41 = vmul.f32 -1.442695, %v2444_v37 }
0x2a6b   : > { %4780 = vpow2.f32 %v4486_v41 }
0x2a6f   : > { %v4779_v40 = vpop.eup %4778 }
0x2a70   : > { %2470 = vrot.lane.b32.xlu0 %v4779_v40, %s6153_s29 }
0x2a71   : > { %v4781_v42 = vpop.eup %4780 }
0x2a72   : > { %v2448_v43 = vadd.f32 1.0, %v4781_v42 }
0x2a74   : > { %4782 = vrcp.f32 %v2448_v43  ;;  %v2460_v46 = vand.u32 2147483648, %v2448_v43  ;;  %vm2454_vm13 = vweird.f32 %v2448_v43  ;;  %v2458_v47 = vand.u32 2147483647, %v2448_v43 }
0x2a76   : > { %v2461_v49 = vor.u32 1.1754944e-38, %v2460_v46  ;;  %vm2459_vm15 = vcmp.eq.f32.partialorder %v2458_v47, 8.507059e+37 }
0x2a7a   : > { %v4783_v56 = vpop.eup %4782 }
0x2a7b   : > { %v2450_v44 = vmul.f32 %v4783_v56, %v2448_v43  ;;  %vm2455_vm12 = vweird.f32 %v4783_v56 }
0x2a7c   : > { %vm2456_vm14 = vmor %vm2454_vm13, %vm2455_vm12 }
0x2a7d   : > { %v2451_v61 = vsub.f32 1.0, %v2450_v44 }
0x2a7f   : > { %v2452_v1 = vmul.f32 %v4783_v56, %v2451_v61 }
0x2a81   : > { %v2453_v9 = vadd.f32 %v4783_v56, %v2452_v1 }
0x2a83   : > { %v2457_v48 = vsel %vm2456_vm14, %v4783_v56, %v2453_v9 }
0x2a84   : > { %v2462_v51 = vsel %vm2459_vm15, %v2461_v49, %v2457_v48 }
0x2a85   : > { %v2468_v57 = vmul.f32 %v2466_v29, %v2462_v51 }
0x2ae2   : > { %v2471_v50 = vpop.permute.xlu0 %2470 }
0x2ae3   : > { %v2473_v53 = vmul.f32 %v2471_v50, %v2462_v51 }
0x2ae5   : > { %2475 = vrot.lane.b32.xlu1 %v2473_v53, %s6153_s29 }
0x2b57   : > { %v2476_v58 = vpop.permute.xlu1 %2475 }
0x2b58   : > { %v2478_v59 = vadd.f32 %v2476_v58, %v2468_v57 }
0x2b5a   : > { %4784 = vtanh.f32 %v2478_v59  ;;  %v2540_v36 = vrot.slane %v2478_v59, 7 }
0x2b60   : > { %v4785_v62 = vpop.eup %4784 }
0x2b61   : > { %2481 = vrot.lane.b32.xlu2 %v4785_v62, %s6153_s29 }
0x2bbb   : > { %v2482_v63 = vpop.permute.xlu2 %2481 }
0x2bbc   : > { %v5610_v5 = vmul.f32 %v2482_v63, %v2462_v51 }
0x2bbe   : > { %v2490_v6 = vrot.slane %v5610_v5, 2 }
0x2bc0   : > { %2491 = vrot.lane.b32.xlu0 %v2490_v6, %s6155_s30 }
0x2c32   : > { %v2492_v7 = vpop.permute.xlu0 %2491 }
0x2c33   : > { %4487 = vmatmul.msk.f32.vlgmr.msrb.gmra.mxu3 %vm1097_vm8, %v2492_v7 }
0x2c34   : > { %3093 = vmatpush.msrb.mxu3 %v5470_v0 }
0x2c36   : > { %3094 = vmatpush.msrb.mxu3 %v5476_v2 }
0x2c38   : > { %3095 = vmatpush.msrb.mxu3 %v5482_v3 }
0x2c3a   : > { %3096 = vmatpush.msrb.mxu3 %v5488_v4 }
0x2cb6   : > { %v2512_v8 = vpop.f32.mrf.mxu3 }
0x2cb7   : > { %v2516_v11 = vrot.slane %v2512_v8, 5 }
0x2cb9   : > { %v2518_v14 = vadd.f32 %v2516_v11, %v5356_v32 }
0x2cbb   : > { %4786 = vtanh.f32 %v2518_v14  ;;  %v4488_v16 = vmul.f32 -1.442695, %v2518_v14 }
0x2cbd   : > { %4788 = vpow2.f32 %v4488_v16 }
0x2cc1   : > { %v4787_v15 = vpop.eup %4786 }
0x2cc2   : > { %2544 = vrot.lane.b32.xlu1 %v4787_v15, %s6153_s29 }
0x2cc3   : > { %v4789_v26 = vpop.eup %4788 }
0x2cc4   : > { %v2522_v17 = vadd.f32 1.0, %v4789_v26 }
0x2cc6   : > { %4790 = vrcp.f32 %v2522_v17  ;;  %v2534_v4 = vand.u32 2147483648, %v2522_v17  ;;  %vm2528_vm1 = vweird.f32 %v2522_v17  ;;  %v2532_v23 = vand.u32 2147483647, %v2522_v17 }
0x2cc8   : > { %v2535_v27 = vor.u32 1.1754944e-38, %v2534_v4  ;;  %vm2533_vm4 = vcmp.eq.f32.partialorder %v2532_v23, 8.507059e+37 }
0x2ccc   : > { %v4791_v0 = vpop.eup %4790 }
0x2ccd   : > { %v2524_v18 = vmul.f32 %v4791_v0, %v2522_v17  ;;  %vm2529_vm0 = vweird.f32 %v4791_v0 }
0x2cce   : > { %vm2530_vm3 = vmor %vm2528_vm1, %vm2529_vm0 }
0x2ccf   : > { %v2525_v2 = vsub.f32 1.0, %v2524_v18 }
0x2cd1   : > { %v2526_v20 = vmul.f32 %v4791_v0, %v2525_v2 }
0x2cd3   : > { %v2527_v3 = vadd.f32 %v4791_v0, %v2526_v20 }
0x2cd5   : > { %v2531_v24 = vsel %vm2530_vm3, %v4791_v0, %v2527_v3 }
0x2cd6   : > { %v2536_v33 = vsel %vm2533_vm4, %v2535_v27, %v2531_v24 }
0x2cd7   : > { %v2542_v37 = vmul.f32 %v2540_v36, %v2536_v33 }
0x2d34   : > { %v2545_v31 = vpop.permute.xlu1 %2544 }
0x2d35   : > { %v2547_v35 = vmul.f32 %v2545_v31, %v2536_v33 }
0x2d37   : > { %2549 = vrot.lane.b32.xlu2 %v2547_v35, %s6153_s29 }
0x2d91   : > { %v2550_v40 = vpop.permute.xlu2 %2549 }
0x2d92   : > { %v2552_v41 = vadd.f32 %v2550_v40, %v2542_v37 }
0x2d94   : > { %4792 = vtanh.f32 %v2552_v41  ;;  %v2614_v14 = vrot.slane %v2552_v41, 7 }
0x2d9a   : > { %v4793_v42 = vpop.eup %4792 }
0x2d9b   : > { %2555 = vrot.lane.b32.xlu0 %v4793_v42, %s6153_s29 }
0x2e0d   : > { %v2556_v43 = vpop.permute.xlu0 %2555 }
0x2e0e   : > { %v5623_v56 = vmul.f32 %v2556_v43, %v2536_v33 }
0x2e10   : > { %v2564_v44 = vrot.slane %v5623_v56, 3 }
0x2e12   : > { %2565 = vrot.lane.b32.xlu1 %v2564_v44, %s6155_s30 }
0x2e84   : > { %v2566_v61 = vpop.permute.xlu1 %2565 }
0x2e85   : > { %4489 = vmatmul.msk.f32.vlgmr.msrb.gmra.mxu0 %vm1097_vm8, %v2566_v61 }
0x2f02   : > { %v2586_v1 = vpop.f32.mrf.mxu0 }
0x2f03   : > { %v2590_v9 = vrot.slane %v2586_v1, 4 }
0x2f05   : > { %v2592_v46 = vadd.f32 %v2590_v9, %v5356_v32 }
0x2f07   : > { %4794 = vtanh.f32 %v2592_v46  ;;  %v4490_v48 = vmul.f32 -1.442695, %v2592_v46 }
0x2f09   : > { %4796 = vpow2.f32 %v4490_v48 }
0x2f0d   : > { %v4795_v47 = vpop.eup %4794 }
0x2f0e   : > { %2618 = vrot.lane.b32.xlu2 %v4795_v47, %s6153_s29 }
0x2f0f   : > { %v4797_v49 = vpop.eup %4796 }
0x2f10   : > { %v2596_v50 = vadd.f32 1.0, %v4797_v49 }
0x2f12   : > { %4798 = vrcp.f32 %v2596_v50  ;;  %v2608_v59 = vand.u32 2147483648, %v2596_v50  ;;  %vm2602_vm6 = vweird.f32 %v2596_v50  ;;  %v2606_v62 = vand.u32 2147483647, %v2596_v50 }
0x2f14   : > { %v2609_v6 = vor.u32 1.1754944e-38, %v2608_v59  ;;  %vm2607_vm10 = vcmp.eq.f32.partialorder %v2606_v62, 8.507059e+37 }
0x2f18   : > { %v4799_v51 = vpop.eup %4798 }
0x2f19   : > { %v2598_v53 = vmul.f32 %v4799_v51, %v2596_v50  ;;  %vm2603_vm5 = vweird.f32 %v4799_v51 }
0x2f1a   : > { %vm2604_vm9 = vmor %vm2602_vm6, %vm2603_vm5 }
0x2f1b   : > { %v2599_v29 = vsub.f32 1.0, %v2598_v53 }
0x2f1d   : > { %v2600_v57 = vmul.f32 %v4799_v51, %v2599_v29 }
0x2f1f   : > { %v2601_v58 = vadd.f32 %v4799_v51, %v2600_v57 }
0x2f21   : > { %v2605_v63 = vsel %vm2604_vm9, %v4799_v51, %v2601_v58 }
0x2f22   : > { %v2610_v8 = vsel %vm2607_vm10, %v2609_v6, %v2605_v63 }
0x2f23   : > { %v2616_v15 = vmul.f32 %v2614_v14, %v2610_v8 }
0x2f68   : > { %v2619_v7 = vpop.permute.xlu2 %2618 }
0x2f69   : > { %v2621_v11 = vmul.f32 %v2619_v7, %v2610_v8 }
0x2f6b   : > { %2623 = vrot.lane.b32.xlu0 %v2621_v11, %s6153_s29 }
0x2fdd   : > { %v2624_v16 = vpop.permute.xlu0 %2623 }
0x2fde   : > { %v2626_v26 = vadd.f32 %v2624_v16, %v2616_v15 }
0x2fe0   : > { %4800 = vtanh.f32 %v2626_v26  ;;  %v2688_v47 = vrot.slane %v2626_v26, 7 }
0x2fe6   : > { %v4801_v17 = vpop.eup %4800 }
0x2fe7   : > { %2629 = vrot.lane.b32.xlu1 %v4801_v17, %s6153_s29 }
0x3059   : > { %v2630_v0 = vpop.permute.xlu1 %2629 }
0x305a   : > { %v5632_v18 = vmul.f32 %v2630_v0, %v2610_v8 }
0x305c   : > { %v2638_v2 = vrot.slane %v5632_v18, 4 }
0x305e   : > { %2639 = vrot.lane.b32.xlu2 %v2638_v2, %s6155_s30 }
0x30b8   : > { %v2640_v20 = vpop.permute.xlu2 %2639 }
0x30b9   : > { %4491 = vmatmul.msk.f32.vlgmr.msrb.gmra.mxu1 %vm1097_vm8, %v2640_v20 }
0x3136   : > { %v2660_v3 = vpop.f32.mrf.mxu1 }
0x3137   : > { %v2664_v4 = vrot.slane %v2660_v3, 3 }
0x3139   : > { %v2666_v23 = vadd.f32 %v2664_v4, %v5356_v32 }
0x313b   : > { %4802 = vtanh.f32 %v2666_v23  ;;  %v4492_v27 = vmul.f32 -1.442695, %v2666_v23 }
0x313d   : > { %4804 = vpow2.f32 %v4492_v27 }
0x3141   : > { %v4803_v24 = vpop.eup %4802 }
0x3142   : > { %2692 = vrot.lane.b32.xlu0 %v4803_v24, %s6153_s29 }
0x3143   : > { %v4805_v31 = vpop.eup %4804 }
0x3144   : > { %v2670_v33 = vadd.f32 1.0, %v4805_v31 }
0x3146   : > { %4806 = vrcp.f32 %v2670_v33  ;;  %v2682_v42 = vand.u32 2147483648, %v2670_v33  ;;  %vm2676_vm12 = vweird.f32 %v2670_v33  ;;  %v2680_v43 = vand.u32 2147483647, %v2670_v33 }
0x3148   : > { %v2683_v61 = vor.u32 1.1754944e-38, %v2682_v42  ;;  %vm2681_vm14 = vcmp.eq.f32.partialorder %v2680_v43, 8.507059e+37 }
0x314c   : > { %v4807_v35 = vpop.eup %4806 }
0x314d   : > { %v2672_v36 = vmul.f32 %v4807_v35, %v2670_v33  ;;  %vm2677_vm11 = vweird.f32 %v4807_v35 }
0x314e   : > { %vm2678_vm13 = vmor %vm2676_vm12, %vm2677_vm11 }
0x314f   : > { %v2673_v37 = vsub.f32 1.0, %v2672_v36 }
0x3151   : > { %v2674_v40 = vmul.f32 %v4807_v35, %v2673_v37 }
0x3153   : > { %v2675_v41 = vadd.f32 %v4807_v35, %v2674_v40 }
0x3155   : > { %v2679_v44 = vsel %vm2678_vm13, %v4807_v35, %v2675_v41 }
0x3156   : > { %v2684_v9 = vsel %vm2681_vm14, %v2683_v61, %v2679_v44 }
0x3157   : > { %v2690_v48 = vmul.f32 %v2688_v47, %v2684_v9 }
0x31b4   : > { %v2693_v1 = vpop.permute.xlu0 %2692 }
0x31b5   : > { %v2695_v46 = vmul.f32 %v2693_v1, %v2684_v9 }
0x31b7   : > { %2697 = vrot.lane.b32.xlu1 %v2695_v46, %s6153_s29 }
0x3229   : > { %v2698_v49 = vpop.permute.xlu1 %2697 }
0x322a   : > { %v2700_v50 = vadd.f32 %v2698_v49, %v2690_v48 }
0x322c   : > { %4808 = vtanh.f32 %v2700_v50  ;;  %v2762_v27 = vrot.slane %v2700_v50, 7 }
0x3232   : > { %v4809_v51 = vpop.eup %4808 }
0x3233   : > { %2703 = vrot.lane.b32.xlu2 %v4809_v51, %s6153_s29 }
0x328d   : > { %v2704_v53 = vpop.permute.xlu2 %2703 }
0x328e   : > { %v5641_v29 = vmul.f32 %v2704_v53, %v2684_v9 }
0x3290   : > { %v2712_v57 = vrot.slane %v5641_v29, 5 }
0x3292   : > { %2713 = vrot.lane.b32.xlu0 %v2712_v57, %s6155_s30 }
0x3304   : > { %v2714_v58 = vpop.permute.xlu0 %2713 }
0x3305   : > { %4493 = vmatmul.msk.f32.vlgmr.msrb.gmra.mxu2 %vm1097_vm8, %v2714_v58 }
0x3388   : > { %v2734_v59 = vpop.f32.mrf.mxu2 }
0x3389   : > { %v2738_v62 = vrot.slane %v2734_v59, 2 }
0x338b   : > { %v2740_v63 = vadd.f32 %v2738_v62, %v5356_v32 }
0x338d   : > { %4810 = vtanh.f32 %v2740_v63  ;;  %v4494_v7 = vmul.f32 -1.442695, %v2740_v63 }
0x338f   : > { %4812 = vpow2.f32 %v4494_v7 }
0x3393   : > { %v4811_v6 = vpop.eup %4810 }
0x3394   : > { %2766 = vrot.lane.b32.xlu1 %v4811_v6, %s6153_s29 }
0x3395   : > { %v4813_v8 = vpop.eup %4812 }
0x3396   : > { %v2744_v11 = vadd.f32 1.0, %v4813_v8 }
0x3398   : > { %4814 = vrcp.f32 %v2744_v11  ;;  %v2756_v0 = vand.u32 2147483648, %v2744_v11  ;;  %vm2750_vm0 = vweird.f32 %v2744_v11  ;;  %v2754_v2 = vand.u32 2147483647, %v2744_v11 }
0x339a   : > { %v2757_v3 = vor.u32 1.1754944e-38, %v2756_v0  ;;  %vm2755_vm3 = vcmp.eq.f32.partialorder %v2754_v2, 8.507059e+37  ;;  %v4942_v2 = vld [vmem:[%s6139_s6] ss:$0 sm:$0xff] }
0x339e   : > { %v4815_v14 = vpop.eup %4814 }
0x339f   : > { %v2746_v15 = vmul.f32 %v4815_v14, %v2744_v11  ;;  %vm2751_vm15 = vweird.f32 %v4815_v14 }
0x33a0   : > { %vm2752_vm1 = vmor %vm2750_vm0, %vm2751_vm15 }
0x33a1   : > { %v2747_v16 = vsub.f32 1.0, %v2746_v15 }
0x33a3   : > { %v2748_v26 = vmul.f32 %v4815_v14, %v2747_v16 }
0x33a5   : > { %v2749_v17 = vadd.f32 %v4815_v14, %v2748_v26 }
0x33a7   : > { %v2753_v20 = vsel %vm2752_vm1, %v4815_v14, %v2749_v17 }
0x33a8   : > { %v2758_v23 = vsel %vm2755_vm3, %v2757_v3, %v2753_v20  ;;  %v5668_v20 = vadd.f32 %v4942_v2, %v5432_v30 }
0x33a9   : > { %v2764_v31 = vmul.f32 %v2762_v27, %v2758_v23 }
0x3406   : > { %v2767_v4 = vpop.permute.xlu1 %2766 }
0x3407   : > { %v2769_v24 = vmul.f32 %v2767_v4, %v2758_v23 }
0x3409   : > { %2771 = vrot.lane.b32.xlu2 %v2769_v24, %s6153_s29 }
0x3463   : > { %v2772_v33 = vpop.permute.xlu2 %2771 }
0x3464   : > { %v2774_v35 = vadd.f32 %v2772_v33, %v2764_v31 }
0x3466   : > { %4816 = vtanh.f32 %v2774_v35  ;;  %v2836_v7 = vrot.slane %v2774_v35, 7 }
0x346c   : > { %v4817_v36 = vpop.eup %4816 }
0x346d   : > { %2777 = vrot.lane.b32.xlu0 %v4817_v36, %s6153_s29 }
0x34df   : > { %v2778_v37 = vpop.permute.xlu0 %2777 }
0x34e0   : > { %v5650_v40 = vmul.f32 %v2778_v37, %v2758_v23 }
0x34e2   : > { %v2786_v41 = vrot.slane %v5650_v40, 6 }
0x34e4   : > { %2787 = vrot.lane.b32.xlu1 %v2786_v41, %s6155_s30 }
0x3556   : > { %v2788_v42 = vpop.permute.xlu1 %2787 }
0x3557   : > { %4495 = vmatmul.msk.f32.vlgmr.msra.gmra.mxu3 %vm1097_vm8, %v2788_v42 }
0x35da   : > { %v2808_v43 = vpop.f32.mrf.mxu3 }
0x35db   : > { %v2812_v44 = vrot.slane %v2808_v43, 1 }
0x35dd   : > { %v2814_v61 = vadd.f32 %v2812_v44, %v5356_v32 }
0x35df   : > { %4818 = vtanh.f32 %v2814_v61  ;;  %v4496_v9 = vmul.f32 -1.442695, %v2814_v61 }
0x35e1   : > { %4820 = vpow2.f32 %v4496_v9 }
0x35e5   : > { %v4819_v1 = vpop.eup %4818 }
0x35e6   : > { %2840 = vrot.lane.b32.xlu2 %v4819_v1, %s6153_s29 }
0x35e7   : > { %v4821_v46 = vpop.eup %4820 }
0x35e8   : > { %v2818_v47 = vadd.f32 1.0, %v4821_v46 }
0x35ea   : > { %4822 = vrcp.f32 %v2818_v47  ;;  %v2830_v57 = vand.u32 2147483648, %v2818_v47  ;;  %vm2824_vm5 = vweird.f32 %v2818_v47  ;;  %v2828_v58 = vand.u32 2147483647, %v2818_v47 }
0x35ec   : > { %v2831_v59 = vor.u32 1.1754944e-38, %v2830_v57  ;;  %vm2829_vm9 = vcmp.eq.f32.partialorder %v2828_v58, 8.507059e+37 }
0x35f0   : > { %v4823_v48 = vpop.eup %4822 }
0x35f1   : > { %v2820_v49 = vmul.f32 %v4823_v48, %v2818_v47  ;;  %vm2825_vm4 = vweird.f32 %v4823_v48 }
0x35f2   : > { %vm2826_vm6 = vmor %vm2824_vm5, %vm2825_vm4 }
0x35f3   : > { %v2821_v50 = vsub.f32 1.0, %v2820_v49 }
0x35f5   : > { %v2822_v51 = vmul.f32 %v4823_v48, %v2821_v50 }
0x35f7   : > { %v2823_v53 = vadd.f32 %v4823_v48, %v2822_v51 }
0x35f9   : > { %v2827_v32 = vsel %vm2826_vm6, %v4823_v48, %v2823_v53  ;;  %vm1236_vm6 = vcmask 254977  }
0x35fa   : > { %v2832_v63 = vsel %vm2829_vm9, %v2831_v59, %v2827_v32  ;;  %vm1686_vm9 = vcmask 261127  }
0x35fb   : > { %v2838_v8 = vmul.f32 %v2836_v7, %v2832_v63 }
0x3640   : > { %v2841_v62 = vpop.permute.xlu2 %2840 }
0x3641   : > { %v2843_v6 = vmul.f32 %v2841_v62, %v2832_v63 }
0x3643   : > { %2845 = vrot.lane.b32.xlu0 %v2843_v6, %s6153_s29 }
0x36b5   : > { %v2846_v11 = vpop.permute.xlu0 %2845 }
0x36b6   : > { %v2848_v14 = vadd.f32 %v2846_v11, %v2838_v8 }
0x36b8   : > { %4824 = vtanh.f32 %v2848_v14  ;;  %v2907_v46 = vrot.slane %v2848_v14, 7 }
0x36be   : > { %v4825_v15 = vpop.eup %4824 }
0x36bf   : > { %2851 = vrot.lane.b32.xlu1 %v4825_v15, %s6153_s29 }
0x3731   : > { %v2852_v16 = vpop.permute.xlu1 %2851 }
0x3732   : > { %v5659_v26 = vmul.f32 %v2852_v16, %v2832_v63 }
0x3734   : > { %v2860_v17 = vrot.slane %v5659_v26, 7 }
0x3736   : > { %2861 = vrot.lane.b32.xlu2 %v2860_v17, %s6155_s30 }
0x3790   : > { %v2862_v0 = vpop.permute.xlu2 %2861 }
0x3791   : > { %4497 = vmatmul.msk.f32.vlgmr.msra.gmra.mxu0 %vm1097_vm8, %v2862_v0 }
0x380e   : > { %v2882_v3 = vpop.f32.mrf.mxu0 }
0x380f   : > { %v2885_v4 = vadd.f32 %v2882_v3, %v5668_v20 }
0x3811   : > { %4826 = vtanh.f32 %v2885_v4  ;;  %v4498_v24 = vmul.f32 -1.442695, %v2885_v4 }
0x3813   : > { %4828 = vpow2.f32 %v4498_v24 }
0x3817   : > { %v4827_v23 = vpop.eup %4826 }
0x3818   : > { %2911 = vrot.lane.b32.xlu0 %v4827_v23, %s6153_s29 }
0x3819   : > { %v4829_v27 = vpop.eup %4828 }
0x381a   : > { %v2889_v31 = vadd.f32 1.0, %v4829_v27 }
0x381c   : > { %4830 = vrcp.f32 %v2889_v31  ;;  %v2901_v30 = vand.u32 2147483648, %v2889_v31  ;;  %vm2895_vm11 = vweird.f32 %v2889_v31  ;;  %v2899_v42 = vand.u32 2147483647, %v2889_v31 }
0x381e   : > { %v2902_v44 = vor.u32 1.1754944e-38, %v2901_v30  ;;  %vm2900_vm13 = vcmp.eq.f32.partialorder %v2899_v42, 8.507059e+37 }
0x3822   : > { %v4831_v33 = vpop.eup %4830 }
0x3823   : > { %v2891_v35 = vmul.f32 %v4831_v33, %v2889_v31  ;;  %vm2896_vm10 = vweird.f32 %v4831_v33 }
0x3824   : > { %vm2897_vm12 = vmor %vm2895_vm11, %vm2896_vm10  ;;  %vm1536_vm10 = vcmask 259077   ;;  %vm1461_vm11 = vcmask 258052  }
0x3825   : > { %v2892_v36 = vsub.f32 1.0, %v2891_v35 }
0x3827   : > { %v2893_v37 = vmul.f32 %v4831_v33, %v2892_v36 }
0x3829   : > { %v2894_v41 = vadd.f32 %v4831_v33, %v2893_v37 }
0x382b   : > { %v2898_v43 = vsel %vm2897_vm12, %v4831_v33, %v2894_v41  ;;  %vm1386_vm12 = vcmask 257027  }
0x382c   : > { %v2903_v1 = vsel %vm2900_vm13, %v2902_v44, %v2898_v43  ;;  %vm1611_vm13 = vcmask 260102  }
0x382d   : > { %v2909_v47 = vmul.f32 %v2907_v46, %v2903_v1 }
0x388a   : > { %v2912_v61 = vpop.permute.xlu0 %2911 }
0x388b   : > { %v2914_v9 = vmul.f32 %v2912_v61, %v2903_v1 }
0x388d   : > { %2916 = vrot.lane.b32.xlu1 %v2914_v9, %s6153_s29 }
0x38ff   : > { %v2917_v48 = vpop.permute.xlu1 %2916 }
0x3900   : > { %v2919_v49 = vadd.f32 %v2917_v48, %v2909_v47 }
0x3902   : > { %4832 = vtanh.f32 %v2919_v49  ;;  %v2978_v27 = vrot.slane %v2919_v49, 7 }
0x3908   : > { %v4833_v50 = vpop.eup %4832 }
0x3909   : > { %2922 = vrot.lane.b32.xlu2 %v4833_v50, %s6153_s29 }
0x3963   : > { %v2923_v51 = vpop.permute.xlu2 %2922 }
0x3964   : > { %v2925_v53 = vmul.f32 %v2923_v51, %v2903_v1 }
0x3966   : > { %2927 = vrot.lane.b32.xlu0 %v2925_v53, %s6155_s30 }
0x39d8   : > { %v2928_v57 = vpop.permute.xlu0 %2927 }
0x39d9   : > { %2930 = vst.msk [vmem:[#allocation2 + $0xc] sm:$0x1] %vm1163_vm7, %v2928_v57  ;;  %4499 = vmatmul.msk.f32.vlgmr.msra.gmra.mxu1 %vm1097_vm8, %v2928_v57 }
0x3a56   : > { %v2950_v58 = vpop.f32.mrf.mxu1 }
0x3a57   : > { %v2954_v32 = vrot.slane %v2950_v58, 7 }
0x3a59   : > { %v2956_v59 = vadd.f32 %v2954_v32, %v5668_v20 }
0x3a5b   : > { %4834 = vtanh.f32 %v2956_v59  ;;  %v4500_v63 = vmul.f32 -1.442695, %v2956_v59 }
0x3a5d   : > { %4836 = vpow2.f32 %v4500_v63 }
0x3a61   : > { %v4835_v62 = vpop.eup %4834 }
0x3a62   : > { %2982 = vrot.lane.b32.xlu1 %v4835_v62, %s6153_s29 }
0x3a63   : > { %v4837_v6 = vpop.eup %4836 }
0x3a64   : > { %v2960_v7 = vadd.f32 1.0, %v4837_v6 }
0x3a66   : > { %4838 = vrcp.f32 %v2960_v7  ;;  %v2972_v17 = vand.u32 2147483648, %v2960_v7  ;;  %vm2966_vm14 = vweird.f32 %v2960_v7  ;;  %v2970_v0 = vand.u32 2147483647, %v2960_v7 }
0x3a68   : > { %v2973_v3 = vor.u32 1.1754944e-38, %v2972_v17  ;;  %vm2971_vm0 = vcmp.eq.f32.partialorder %v2970_v0, 8.507059e+37  ;;  %v3154_v17 = vld [vmem:[%s6140_s7 + $0x10] sm:$0xff] }
0x3a69   : > { %v4515_v0 = vld [vmem:[%s6140_s7 + $0x50] sm:$0xff] }
0x3a6c   : > { %v4839_v8 = vpop.eup %4838 }
0x3a6d   : > { %v2962_v11 = vmul.f32 %v4839_v8, %v2960_v7  ;;  %vm2967_vm7 = vweird.f32 %v4839_v8 }
0x3a6e   : > { %vm2968_vm15 = vmor %vm2966_vm14, %vm2967_vm7  ;;  %vm1311_vm7 = vcmask 256002  }
0x3a6f   : > { %v2963_v14 = vsub.f32 1.0, %v2962_v11 }
0x3a71   : > { %v2964_v15 = vmul.f32 %v4839_v8, %v2963_v14 }
0x3a73   : > { %v2965_v16 = vadd.f32 %v4839_v8, %v2964_v15 }
0x3a75   : > { %v2969_v2 = vsel %vm2968_vm15, %v4839_v8, %v2965_v16  ;;  %v4516_v16 = vld [vmem:[%s6140_s7 + $0x58] sm:$0xff] }
0x3a76   : > { %v2974_v23 = vsel %vm2971_vm0, %v2973_v3, %v2969_v2  ;;  %3246 = vmatpush.msrb.mxu2 %v4516_v16  ;;  %v3153_v3 = vld [vmem:[%s6140_s7 + $0x8] sm:$0xff] }
0x3a77   : > { %v2980_v31 = vmul.f32 %v2978_v27, %v2974_v23 }
0x3a78   : > { %3247 = vmatpush.msrb.mxu2 %v4515_v0 }
0x3ad4   : > { %v2983_v4 = vpop.permute.xlu1 %2982 }
0x3ad5   : > { %v2985_v24 = vmul.f32 %v2983_v4, %v2974_v23  ;;  %v4514_v4 = vld [vmem:[%s6140_s7 + $0x48] sm:$0xff] }
0x3ad6   : > { %3248 = vmatpush.msrb.mxu2 %v4514_v4 }
0x3ad7   : > { %2987 = vrot.lane.b32.xlu2 %v2985_v24, %s6153_s29  ;;  %v4513_v24 = vld [vmem:[%s6140_s7 + $0x40] sm:$0xff] }
0x3ad8   : > { %3249 = vmatpush.msrb.mxu2 %v4513_v24 }
0x3b31   : > { %v2988_v33 = vpop.permute.xlu2 %2987 }
0x3b32   : > { %v5680_v35 = vadd.f32 %v2988_v33, %v2980_v31  ;;  %v4528_v33 = vld [vmem:[%s6140_s7 + $0x98] sm:$0xff] }
0x3b34   : > { %4840 = vtanh.f32 %v5680_v35 }
0x3b3a   : > { %v4841_v36 = vpop.eup %4840 }
0x3b3b   : > { %2993 = vrot.lane.b32.xlu0 %v4841_v36, %s6153_s29  ;;  %v4526_v36 = vld [vmem:[%s6140_s7 + $0x88] sm:$0xff] }
0x3bad   : > { %v2994_v37 = vpop.permute.xlu0 %2993 }
0x3bae   : > { %v5684_v41 = vmul.f32 %v2994_v37, %v2974_v23  ;;  %v3152_v23 = vld [vmem:[%s6140_s7] sm:$0xff] }
0x3bb0   : > { %v3002_v30 = vrot.slane %v5684_v41, 1 }
0x3bb2   : > { %3003 = vrot.lane.b32.xlu1 %v3002_v30, %s6155_s30 }
0x3c24   : > { %v3004_v42 = vpop.permute.xlu1 %3003 }
0x3c25   : > { %4501 = vmatmul.msk.f32.vlgmr.msra.gmra.mxu2 %vm1097_vm8, %v3004_v42  ;;  %v4534_v42 = vld [vmem:[%s6140_s7 + $0xb8] sm:$0xff] }
0x3ca8   : > { %v3024_v43 = vpop.f32.mrf.mxu2 }
0x3ca9   : > { %v3028_v44 = vrot.slane %v3024_v43, 6  ;;  %v4533_v43 = vld [vmem:[%s6140_s7 + $0xb0] sm:$0xff] }
0x3cab   : > { %v3030_v61 = vadd.f32 %v3028_v44, %v5668_v20  ;;  %v4539_v44 = vld [vmem:[%s6140_s7 + $0xd0] sm:$0xff] }
0x3cad   : > { %4842 = vtanh.f32 %v3030_v61  ;;  %v4502_v9 = vmul.f32 -1.442695, %v3030_v61  ;;  %v4532_v61 = vld [vmem:[%s6140_s7 + $0xa8] sm:$0xff] }
0x3caf   : > { %4844 = vpow2.f32 %v4502_v9  ;;  %v4531_v9 = vld [vmem:[%s6140_s7 + $0xa0] sm:$0xff] }
0x3cb3   : > { %v4843_v1 = vpop.eup %4842 }
0x3cb4   : > { %3056 = vrot.lane.b32.xlu2 %v4843_v1, %s6153_s29  ;;  %v4538_v1 = vld [vmem:[%s6140_s7 + $0xc8] sm:$0xff] }
0x3cb5   : > { %v4845_v46 = vpop.eup %4844 }
0x3cbc   : > { %1232 = vrot.lane.b32.xlu2 %v5371_v21, %s6155_s30  ;;  %v3034_v21 = vadd.f32 1.0, %v4845_v46  ;;  %v4537_v46 = vld [vmem:[%s6140_s7 + $0xc0] sm:$0xff] }
0x3cbe   : > { %4846 = vrcp.f32 %v3034_v21  ;;  %vm3040_vm3 = vweird.f32 %v3034_v21  ;;  %v3044_v49 = vand.u32 2147483647, %v3034_v21 }
0x3cc0   : > { %vm3045_vm5 = vcmp.eq.f32.partialorder %v3044_v49, 8.507059e+37 }
0x3cc4   : > { %1683 = vrot.lane.b32.xlu2 %v5451_v34, %s6155_s30  ;;  %v4847_v34 = vpop.eup %4846 }
0x3cc5   : > { %vm3041_vm1 = vweird.f32 %v4847_v34 }
0x3cc6   : > { %vm3042_vm4 = vmor %vm3040_vm3, %vm3041_vm1 }
0x3ccc   : > { %2122 = vrot.lane.b32.xlu2 %v5547_v55, %s6155_s30  ;;  %v3036_v55 = vmul.f32 %v4847_v34, %v3034_v21 }
0x3cd4   : > { %1458 = vrot.lane.b32.xlu2 %v5410_v54, %s6155_s30  ;;  %v3037_v54 = vsub.f32 1.0, %v3036_v55  ;;  %v4551_v55 = vld [vmem:[%s6140_s7 + $0x110] sm:$0xff] }
0x3cd6   : > { %v3038_v47 = vmul.f32 %v4847_v34, %v3037_v54  ;;  %v4550_v54 = vld [vmem:[%s6140_s7 + $0x108] sm:$0xff] }
0x3cd8   : > { %v3039_v48 = vadd.f32 %v4847_v34, %v3038_v47  ;;  %v4549_v47 = vld [vmem:[%s6140_s7 + $0x100] sm:$0xff] }
0x3cdc   : > { %2048 = vrot.lane.b32.xlu2 %v5534_v19, %s6155_s30  ;;  %v3046_v19 = vand.u32 2147483648, %v3034_v21 }
0x3cde   : > { %v3047_v50 = vor.u32 1.1754944e-38, %v3046_v19 }
0x3ce4   : > { %2560 = vrot.lane.b32.xlu2 %v5623_v56, %s6155_s30  ;;  %v3043_v56 = vsel %vm3042_vm4, %v4847_v34, %v3039_v48  ;;  %v4552_v34 = vld [vmem:[%s6140_s7 + $0x118] sm:$0xff] }
0x3cec   : > { %2634 = vrot.lane.b32.xlu2 %v5632_v18, %s6155_s30  ;;  %v5707_v18 = vsel %vm3045_vm5, %v3047_v50, %v3043_v56 }
0x3cf4   : > { %2856 = vrot.lane.b32.xlu2 %v5659_v26, %s6155_s30 }
0x3d0e   : > { %v3057_v51 = vpop.permute.xlu2 %3056 }
0x3d0f   : > { %v3059_v53 = vmul.f32 %v3057_v51, %v5707_v18 }
0x3d11   : > { %3061 = vrot.lane.b32.xlu0 %v3059_v53, %s6153_s29 }
0x3d16   : > { %v1233_v26 = vpop.permute.xlu2 %1232 }
0x3d17   : > { %1237 = vst.msk [vmem:[#allocation2 + $0xf] sm:$0x2] %vm1236_vm6, %v1233_v26 }
0x3d19   : > { %1383 = vrot.lane.b32.xlu0 %v5397_v22, %s6155_s30 }
0x3d1e   : > { %v1684_v57 = vpop.permute.xlu2 %1683 }
0x3d1f   : > { %1687 = vst.msk [vmem:[#allocation2 + $0xc] sm:$0x80] %vm1686_vm9, %v1684_v57 }
0x3d21   : > { %1826 = vrot.lane.b32.xlu0 %v5495_v39, %s6155_s30 }
0x3d26   : > { %v2123_v58 = vpop.permute.xlu2 %2122 }
0x3d27   : > { %2125 = vst.msk [vmem:[#allocation2 + $0x11] sm:$0x20] %vm1536_vm10, %v2123_v58 }
0x3d29   : > { %2270 = vrot.lane.b32.xlu0 %v5573_v13, %s6155_s30  ;;  %v3052_v13 = vrot.slane %v5680_v35, 7  ;;  %v4527_v35 = vld [vmem:[%s6140_s7 + $0x90] sm:$0xff] }
0x3d2b   : > { %v3054_v63 = vmul.f32 %v3052_v13, %v5707_v18  ;;  %v4520_v13 = vld [vmem:[%s6140_s7 + $0x68] sm:$0xff] }
0x3d2e   : > { %v1459_v32 = vpop.permute.xlu2 %1458 }
0x3d2f   : > { %1462 = vst.msk [vmem:[#allocation2 - $0x2] sm:$0x10] %vm1461_vm11, %v1459_v32 }
0x3d31   : > { %1608 = vrot.lane.b32.xlu0 %v5438_v60, %s6155_s30 }
0x3d36   : > { %v2049_v22 = vpop.permute.xlu2 %2048 }
0x3d37   : > { %2051 = vst.msk [vmem:[#allocation2 + $0x2] sm:$0x10] %vm1461_vm11, %v2049_v22 }
0x3d39   : > { %2196 = vrot.lane.b32.xlu0 %v5560_v38, %s6155_s30 }
0x3d3e   : > { %v2561_v39 = vpop.permute.xlu2 %2560 }
0x3d3f   : > { %2563 = vst.msk [vmem:[#allocation2 + $0x16] sm:$0x8] %vm1386_vm12, %v2561_v39 }
0x3d46   : > { %v2635_v59 = vpop.permute.xlu2 %2634 }
0x3d47   : > { %2637 = vst.msk [vmem:[#allocation2 + $0x6] sm:$0x10] %vm1461_vm11, %v2635_v59  ;;  %v4522_v59 = vld [vmem:[%s6140_s7 + $0x78] sm:$0xff] }
0x3d48   : > { %3284 = vmatpush.msra.mxu3 %v4522_v59 }
0x3d4e   : > { %v2857_v62 = vpop.permute.xlu2 %2856 }
0x3d4f   : > { %2859 = vst.msk [vmem:[#allocation2 + $0x14] sm:$0x80] %vm1686_vm9, %v2857_v62  ;;  %v4521_v62 = vld [vmem:[%s6140_s7 + $0x70] sm:$0xff] }
0x3d50   : > { %3285 = vmatpush.msra.mxu3 %v4521_v62 }
0x3d52   : > { %3286 = vmatpush.msra.mxu3 %v4520_v13 }
0x3d83   : > { %v3062_v6 = vpop.permute.xlu0 %3061 }
0x3d84   : > { %v5728_v60 = vadd.f32 %v3062_v6, %v3054_v63  ;;  %v4519_v63 = vld [vmem:[%s6140_s7 + $0x60] sm:$0xff]  ;;  %v4558_v6 = vld [vmem:[%s6140_s7 + $0x138] sm:$0xff] }
0x3d85   : > { %3287 = vmatpush.msra.mxu3 %v4519_v63  ;;  %v5992_v63 = vld [vmem:[%s6145_s12] ss:$0 sm:$0xff] }
0x3d86   : > { %4848 = vtanh.f32 %v5728_v60 }
0x3d8b   : > { %v1384_v7 = vpop.permute.xlu0 %1383 }
0x3d8c   : > { %v4849_v38 = vpop.eup %4848  ;;  %1387 = vst.msk [vmem:[#allocation2 + $0xe] sm:$0x8] %vm1386_vm12, %v1384_v7  ;;  %v4557_v7 = vld [vmem:[%s6140_s7 + $0x130] sm:$0xff] }
0x3d8d   : > { %3067 = vrot.lane.b32.xlu1 %v4849_v38, %s6153_s29  ;;  %v4556_v38 = vld [vmem:[%s6140_s7 + $0x128] sm:$0xff]  ;;  %s4306_s29 = sshll.u32 %s4302_s0, 4  ;;  %s4307_s29 = int_to_ptr.hbm [resolvable:$true] %s4306_s29 }
0x3d93   : > { %v1827_v8 = vpop.permute.xlu0 %1826 }
0x3d94   : > { %1829 = vst.msk [vmem:[#allocation2 + $0x13] sm:$0x2] %vm1236_vm6, %v1827_v8  ;;  %v4555_v8 = vld [vmem:[%s6140_s7 + $0x120] sm:$0xff] }
0x3d95   : > { %1533 = vrot.lane.b32.xlu1 %v5423_v25, %s6155_s30  ;;  %v4508_v25 = vld [vmem:[%s6140_s7 + $0x38] sm:$0xff] }
0x3d96   : > { %3181 = vmatpush.msrb.mxu0 %v4508_v25  ;;  %v4544_v25 = vld [vmem:[%s6140_s7 + $0xe8] sm:$0xff] }
0x3d9b   : > { %v2271_v11 = vpop.permute.xlu0 %2270 }
0x3d9c   : > { %2273 = vst.msk [vmem:[#allocation2 + $0x10] sm:$0x80] %vm1686_vm9, %v2271_v11  ;;  %v4546_v11 = vld [vmem:[%s6140_s7 + $0xf8] sm:$0xff] }
0x3d9d   : > { %1974 = vrot.lane.b32.xlu1 %v5521_v45, %s6155_s30  ;;  %v4505_v45 = vld [vmem:[%s6140_s7 + $0x20] sm:$0xff] }
0x3da3   : > { %v1609_v14 = vpop.permute.xlu0 %1608 }
0x3da4   : > { %1612 = vst.msk [vmem:[#allocation2 - $0x3] sm:$0x40] %vm1611_vm13, %v1609_v14 }
0x3da5   : > { %1308 = vrot.lane.b32.xlu1 %v5384_v52, %s6155_s30  ;;  %v4507_v52 = vld [vmem:[%s6140_s7 + $0x30] sm:$0xff] }
0x3da6   : > { %3182 = vmatpush.msrb.mxu0 %v4507_v52  ;;  %v4543_v52 = vld [vmem:[%s6140_s7 + $0xe0] sm:$0xff] }
0x3dab   : > { %v2197_v15 = vpop.permute.xlu0 %2196 }
0x3dac   : > { %2199 = vst.msk [vmem:[#allocation2 + $0x1] sm:$0x40] %vm1611_vm13, %v2197_v15  ;;  %v4545_v15 = vld [vmem:[%s6140_s7 + $0xf0] sm:$0xff] }
0x3dad   : > { %1900 = vrot.lane.b32.xlu1 %v5508_v10, %s6155_s30  ;;  %v4506_v10 = vld [vmem:[%s6140_s7 + $0x28] sm:$0xff] }
0x3dae   : > { %3183 = vmatpush.msrb.mxu0 %v4506_v10 }
0x3db0   : > { %3184 = vmatpush.msrb.mxu0 %v4505_v45 }
0x3db2   : > { %3322 = vmatpush.msra.mxu0 %v4528_v33 }
0x3db4   : > { %3323 = vmatpush.msra.mxu0 %v4527_v35 }
0x3db5   : > { %2412 = vrot.lane.b32.xlu1 %v5597_v28, %s6155_s30 }
0x3db6   : > { %3324 = vmatpush.msra.mxu0 %v4526_v36  ;;  %v3539_v36 = vld [vmem:[%s6143_s10] sm:$0xff] }
0x3dbd   : > { %2486 = vrot.lane.b32.xlu1 %v5610_v5, %s6155_s30 }
0x3dc5   : > { %2782 = vrot.lane.b32.xlu1 %v5650_v40, %s6155_s30  ;;  %v3155_v40 = vld [vmem:[%s6140_s7 + $0x18] sm:$0xff]  ;;  %s4957_s30 = sshra.s32 %s4307_s29, 4  ;;  %s4958_s30 = int_to_ptr.hbm [resolvable:$true] %s4957_s30 }
0x3dc6   : > { %3210 = vmatpush.msrb.mxu1 %v3155_v40  ;;  %s4959_s1 = scalar_lea.hbm %s4958_s30, 1  ;;  %p4964_p0 = scmp.lt.s32.totalorder %s4958_s30, %s6148_s15 }
0x3dc7   : > { %p4960_p11 = scmp.ne.s32.totalorder %s4958_s30, %s4959_s1  ;;  %p4965_p1 = scmp.lt.s32.totalorder %s4963_s27, %s4959_s1 }
0x3dc8   : > { %3211 = vmatpush.msrb.mxu1 %v3154_v17 }
0x3dc9   : > { %p4961_p12 = pnand %p4960_p11, %p5128_p5  ;;  %p4966_p2 = por %p4965_p1, %p4964_p0 }
0x3dca   : > { %3212 = vmatpush.msrb.mxu1 %v3153_v3 }
0x3dcb   : > { %p4962_p13 = pneg %p4961_p12 }
0x3dcc   : > { %3213 = vmatpush.msrb.mxu1 %v3152_v23 }
0x3dcd   : > { %p4967_p3 = pnand %p4966_p2, %p4962_p13 }
0x3dce   : > { %3360 = vmatpush.msra.mxu1 %v4534_v42  ;;  %v5931_v42 = vld [vmem:[%s6144_s11 + $0x8] sm:$0xff] }
0x3dd0   : > { %3361 = vmatpush.msra.mxu1 %v4533_v43 }
0x3dd2   : > { %3362 = vmatpush.msra.mxu1 %v4532_v61 }
0x3dd4   : > { %3363 = vmatpush.msra.mxu1 %v4531_v9 }
0x3dff   : > { %v3068_v28 = vpop.permute.xlu1 %3067 }
0x3e00   : > { %v5764_v5 = vmul.f32 %v3068_v28, %v5707_v18 }
0x3e02   : > { %v3076_v2 = vrot.slane %v5764_v5, 2 }
0x3e04   : > { %3077 = vrot.lane.b32.xlu0 %v3076_v2, %s6167_s26 }
0x3e07   : > { %v1534_v27 = vpop.permute.xlu1 %1533 }
0x3e08   : > { %1537 = vst.msk [vmem:[#allocation2 + $0xd] sm:$0x20] %vm1536_vm10, %v1534_v27 }
0x3e0c   : > { %2708 = vrot.lane.b32.xlu0 %v5641_v29, %s6167_s26  ;;  %v4525_v29 = vld [vmem:[%s6140_s7 + $0x80] sm:$0xff] }
0x3e0d   : > { %3325 = vmatpush.msra.mxu0 %v4525_v29  ;;  %v5914_v29 = vld [vmem:[%s6144_s11 + $0x18] sm:$0xff] }
0x3e0f   : > { %v1975_v31 = vpop.permute.xlu1 %1974 }
0x3e10   : > { %1977 = vst.msk [vmem:[#allocation2 + $0x12] sm:$0x8] %vm1386_vm12, %v1975_v31 }
0x3e14   : > { %2998 = vrot.lane.b32.xlu0 %v5684_v41, %s6167_s26  ;;  %v4540_v41 = vld [vmem:[%s6140_s7 + $0xd8] sm:$0xff] }
0x3e15   : > { %3398 = vmatpush.msra.mxu2 %v4540_v41  ;;  %v5937_v41 = vld [vmem:[%s6144_s11] sm:$0xff] }
0x3e17   : > { %v1309_v37 = vpop.permute.xlu1 %1308  ;;  %v3156_v30 = vld [vmem:[#allocation2 + $0x10] sm:$0xff]  ;;  %3399 = vmatpush.msra.mxu2 %v4539_v44 }
0x3e18   : > { %1312 = vst.msk [vmem:[#allocation2 - $0x1] sm:$0x4] %vm1311_vm7, %v1309_v37  ;;  %4509 = vmatmul.msk.f32.vlgmr.msrb.gmra.mxu0 %vm1097_vm8, %v3156_v30  ;;  %v5925_v30 = vld [vmem:[%s6144_s11 + $0x10] sm:$0xff] }
0x3e19   : > { %3400 = vmatpush.msra.mxu2 %v4538_v1  ;;  %3474 = vmatpush.msrb.mxu0 %v4552_v34 }
0x3e1b   : > { %3401 = vmatpush.msra.mxu2 %v4537_v46  ;;  %3475 = vmatpush.msrb.mxu0 %v4551_v55 }
0x3e1d   : > { %3476 = vmatpush.msrb.mxu0 %v4550_v54 }
0x3e1f   : > { %v1901_v21 = vpop.permute.xlu1 %1900  ;;  %3477 = vmatpush.msrb.mxu0 %v4549_v47 }
0x3e20   : > { %1903 = vst.msk [vmem:[#allocation2 + $0x3] sm:$0x4] %vm1311_vm7, %v1901_v21 }
0x3e27   : > { %v2413_v48 = vpop.permute.xlu1 %2412  ;;  %v3150_v19 = vld [vmem:[#allocation2] sm:$0xff] }
0x3e28   : > { %v3221_v49 = vld [vmem:[#allocation2 + $0x1] sm:$0xff]  ;;  %2415 = vst.msk [vmem:[#allocation2 + $0x17] sm:$0x2] %vm1236_vm6, %v2413_v48  ;;  %4511 = vmatmul.msk.f32.vlgmr.msrb.gmra.mxu1 %vm1097_vm8, %v3150_v19 }
0x3e29   : > { %4517 = vmatmul.msk.f32.vlgmr.msrb.gmra.mxu2 %vm1097_vm8, %v3221_v49  ;;  %3512 = vmatpush.msrb.mxu1 %v4558_v6 }
0x3e2a   : > { %3565 = vmatpush.msrb.mxu2 %v3539_v36 }
0x3e2b   : > { %3513 = vmatpush.msrb.mxu1 %v4557_v7 }
0x3e2d   : > { %3514 = vmatpush.msrb.mxu1 %v4556_v38 }
0x3e2f   : > { %v2487_v56 = vpop.permute.xlu1 %2486  ;;  %v3157_v50 = vld [vmem:[#allocation2 + $0x18] sm:$0x3]  ;;  %3515 = vmatpush.msrb.mxu1 %v4555_v8 }
0x3e30   : > { %2489 = vst.msk [vmem:[#allocation2 + $0x7] sm:$0x4] %vm1311_vm7, %v2487_v56  ;;  %4510 = vmatmul.msk.f32.gmra.mxu0 %vm1097_vm8, %v3157_v50  ;;  %v3335_v58 = vld [vmem:[#allocation2 + $0x12] sm:$0xff] }
0x3e31   : > { %v3259_v45 = vld [vmem:[#allocation2 + $0x11] sm:$0xff] }
0x3e37   : > { %v2783_v51 = vpop.permute.xlu1 %2782  ;;  %v3151_v18 = vld [vmem:[#allocation2 + $0x8] sm:$0x3] }
0x3e38   : > { %v3222_v53 = vld [vmem:[#allocation2 + $0x9] sm:$0x3]  ;;  %2785 = vst.msk [vmem:[#allocation2 + $0x5] sm:$0x40] %vm1611_vm13, %v2783_v51  ;;  %4512 = vmatmul.msk.f32.gmra.mxu1 %vm1097_vm8, %v3151_v18 }
0x3e39   : > { %v3297_v26 = vld [vmem:[#allocation2 + $0x2] sm:$0xff]  ;;  %4518 = vmatmul.msk.f32.gmra.mxu2 %vm1097_vm8, %v3222_v53 }
0x3e3a   : > { %4529 = vmatmul.msk.f32.vlgmr.msra.gmra.mxu0 %vm1097_vm8, %v3297_v26  ;;  %v3373_v32 = vld [vmem:[#allocation2 + $0x3] sm:$0xff]  ;;  %v5971_v26 = vld [vmem:[%s6141_s8] ss:$0 sm:$0xff] }
0x3e3b   : > { %3722 = vmatpush.msra.mxu0 %v5914_v29 }
0x3e3d   : > { %3723 = vmatpush.msra.mxu0 %v5925_v30 }
0x3e3f   : > { %v3298_v57 = vld [vmem:[#allocation2 + $0xa] sm:$0x3]  ;;  %3724 = vmatpush.msra.mxu0 %v5931_v42 }
0x3e40   : > { %4535 = vmatmul.msk.f32.vlgmr.msra.gmra.mxu1 %vm1097_vm8, %v3335_v58  ;;  %v3374_v22 = vld [vmem:[#allocation2 + $0xb] sm:$0x3] }
0x3e41   : > { %4541 = vmatmul.msk.f32.vlgmr.msra.gmra.mxu2 %vm1097_vm8, %v3373_v32  ;;  %v3449_v39 = vld [vmem:[#allocation2 + $0x4] sm:$0xff]  ;;  %3792 = vmatpush.msra.mxu1 %v5914_v29  ;;  %v5976_v32 = vld [vmem:[%s6142_s9] ss:$0 sm:$0xff] }
0x3e42   : > { %4530 = vmatmul.msk.f32.gmra.mxu0 %vm1097_vm8, %v3298_v57  ;;  %3862 = vmatpush.msra.mxu2 %v5914_v29 }
0x3e43   : > { %3793 = vmatpush.msra.mxu1 %v5925_v30  ;;  %3725 = vmatpush.msra.mxu0 %v5937_v41 }
0x3e44   : > { %3863 = vmatpush.msra.mxu2 %v5925_v30 }
0x3e45   : > { %3794 = vmatpush.msra.mxu1 %v5931_v42 }
0x3e46   : > { %3864 = vmatpush.msra.mxu2 %v5931_v42 }
0x3e47   : > { %3795 = vmatpush.msra.mxu1 %v5937_v41 }
0x3e48   : > { %3865 = vmatpush.msra.mxu2 %v5937_v41 }
0x3e49   : > { %4542 = vmatmul.msk.f32.gmra.mxu2 %vm1097_vm8, %v3374_v22 }
0x3e4a   : > { %4553 = vmatmul.msk.f32.vlgmr.msrb.gmra.mxu0 %vm1097_vm8, %v3449_v39 }
0x3e4b   : > { %4002 = vmatpush.msrb.mxu0 %v5914_v29 }
0x3e4d   : > { %4003 = vmatpush.msrb.mxu0 %v5925_v30 }
0x3e4f   : > { %4004 = vmatpush.msrb.mxu0 %v5931_v42 }
0x3e51   : > { %4005 = vmatpush.msrb.mxu0 %v5937_v41 }
0x3e76   : > { %v3078_v14 = vpop.permute.xlu0 %3077 }
0x3e77   : > { %4503 = vmatmul.msk.f32.vlgmr.msrb.gmra.mxu3 %vm1097_vm8, %v3078_v14 }
0x3e78   : > { %3436 = vmatpush.msrb.mxu3 %v4546_v11 }
0x3e7a   : > { %3437 = vmatpush.msrb.mxu3 %v4545_v15 }
0x3e7c   : > { %3438 = vmatpush.msrb.mxu3 %v4544_v25 }
0x3e7e   : > { %v2709_v10 = vpop.permute.xlu0 %2708  ;;  %3439 = vmatpush.msrb.mxu3 %v4543_v52 }
0x3e7f   : > { %2711 = vst.msk [vmem:[#allocation2 + $0x15] sm:$0x20] %vm1536_vm10, %v2709_v10  ;;  %4523 = vmatmul.msk.f32.vlgmr.msra.gmra.mxu3 %vm1097_vm8, %v3259_v45 }
0x3e80   : > { %3589 = vmatpush.msra.mxu3 %v5914_v29 }
0x3e82   : > { %3590 = vmatpush.msra.mxu3 %v5925_v30 }
0x3e84   : > { %3591 = vmatpush.msra.mxu3 %v5931_v42 }
0x3e86   : > { %v2999_v28 = vpop.permute.xlu0 %2998  ;;  %v3260_v40 = vld [vmem:[#allocation2 + $0x19] sm:$0x3]  ;;  %3592 = vmatpush.msra.mxu3 %v5937_v41 }
0x3e87   : > { %v3336_v16 = vld [vmem:[#allocation2 + $0x1a] sm:$0x3]  ;;  %3001 = vst.msk [vmem:[#allocation2 + $0x1b] sm:$0x2] %vm1236_vm6, %v2999_v28  ;;  %4524 = vmatmul.msk.f32.gmra.mxu3 %vm1097_vm8, %v3260_v40 }
0x3e88   : > { %4536 = vmatmul.msk.f32.gmra.mxu1 %vm1097_vm8, %v3336_v16  ;;  %v3411_v17 = vld [vmem:[#allocation2 + $0x13] sm:$0xff] }
0x3e89   : > { %v3487_v0 = vld [vmem:[#allocation2 + $0x14] sm:$0xff] }
0x3e8e   : > { %v3412_v2 = vld [vmem:[#allocation2 + $0x1b] sm:$0x3] }
0x3e8f   : > { %4547 = vmatmul.msk.f32.vlgmr.msrb.gmra.mxu3 %vm1097_vm8, %v3411_v17 }
0x3e90   : > { %4559 = vmatmul.msk.f32.vlgmr.msrb.gmra.mxu1 %vm1097_vm8, %v3487_v0  ;;  %3652 = vmatpush.msrb.mxu3 %v5914_v29 }
0x3e91   : > { %4072 = vmatpush.msrb.mxu1 %v5914_v29 }
0x3e92   : > { %3653 = vmatpush.msrb.mxu3 %v5925_v30 }
0x3e93   : > { %4073 = vmatpush.msrb.mxu1 %v5925_v30 }
0x3e94   : > { %3654 = vmatpush.msrb.mxu3 %v5931_v42 }
0x3e95   : > { %v3186_v3 = vpop.f32.mrf.mxu0  ;;  %4074 = vmatpush.msrb.mxu1 %v5931_v42 }
0x3e96   : > { %3655 = vmatpush.msrb.mxu3 %v5937_v41 }
0x3e97   : > { %4548 = vmatmul.msk.f32.gmra.mxu3 %vm1097_vm8, %v3412_v2  ;;  %4075 = vmatpush.msrb.mxu1 %v5937_v41 }
0x3e9f   : > { %3593 = vmatmul.f32.vlgmr.msra.gmra.mxu3 %v5007_v12 }
0x3ea0   : > { %3932 = vmatpush.msra.mxu3 %v5914_v29 }
0x3ea2   : > { %3933 = vmatpush.msra.mxu3 %v5925_v30 }
0x3ea4   : > { %3934 = vmatpush.msra.mxu3 %v5931_v42 }
0x3ea5   : > { %v3215_v4 = vpop.f32.mrf.mxu1 }
0x3ea6   : > { %v3216_v44 = vadd.f32 %v3215_v4, %v3186_v3  ;;  %3935 = vmatpush.msra.mxu3 %v5937_v41 }
0x3eac   : > { %v3251_v23 = vpop.f32.mrf.mxu2 }
0x3ead   : > { %v3189_v24 = vpop.f32.mrf.mxu0  ;;  %v3257_v1 = vadd.f32 %v3251_v23, %v3216_v44 }
0x3eb5   : > { %v3218_v27 = vpop.f32.mrf.mxu1 }
0x3eb6   : > { %v3219_v31 = vadd.f32 %v3218_v27, %v3189_v24 }
0x3eb7   : > { %v3327_v43 = vpop.f32.mrf.mxu0 }
0x3ebc   : > { %v3254_v33 = vpop.f32.mrf.mxu2 }
0x3ebd   : > { %v3258_v35 = vadd.f32 %v3254_v33, %v3219_v31  ;;  %v3365_v9 = vpop.f32.mrf.mxu1 }
0x3ebf   : > { %v3330_v21 = vpop.f32.mrf.mxu0 }
0x3ec4   : > { %v3403_v49 = vpop.f32.mrf.mxu2 }
0x3ec7   : > { %v3479_v18 = vpop.f32.mrf.mxu0 }
0x3ecc   : > { %v5985_v62 = vpop.f32.mrf.mxu2 }
0x3efa   : > { %v5920_v37 = vpop.f32.mrf.mxu3 }
0x3f02   : > { %v3289_v61 = vpop.f32.mrf.mxu3 }
0x3f03   : > { %v3295_v46 = vadd.f32 %v3289_v61, %v3257_v1 }
0x3f05   : > { %v3333_v12 = vadd.f32 %v3327_v43, %v3295_v46  ;;  %v3368_v54 = vpop.f32.mrf.mxu1 }
0x3f07   : > { %v3371_v48 = vadd.f32 %v3365_v9, %v3333_v12 }
0x3f09   : > { %v3409_v56 = vadd.f32 %v3403_v49, %v3371_v48 }
0x3f0a   : > { %v3292_v34 = vpop.f32.mrf.mxu3 }
0x3f0b   : > { %v3296_v55 = vadd.f32 %v3292_v34, %v3258_v35 }
0x3f0d   : > { %v3334_v47 = vadd.f32 %v3330_v21, %v3296_v55  ;;  %v3517_v57 = vpop.f32.mrf.mxu1 }
0x3f0f   : > { %v5965_v19 = vadd.f32 %v3368_v54, %v3334_v47 }
0x3f12   : > { %v3441_v50 = vpop.f32.mrf.mxu3 }
0x3f13   : > { %v3447_v51 = vadd.f32 %v3441_v50, %v3409_v56 }
0x3f15   : > { %v3485_v53 = vadd.f32 %v3479_v18, %v3447_v51 }
0x3f17   : > { %v3523_v58 = vadd.f32 %v3517_v57, %v3485_v53 }
0x3f19   : > { %v3529_v22 = vmul.f32 %v5971_v26, %v3523_v58 }
0x3f1a   : > { %v5987_v13 = vpop.f32.mrf.mxu3 }
0x3f1b   : > { %v3535_v39 = vadd.f32 %v5976_v32, %v3529_v22  ;;  %v3102_v22 = vrot.slane %v5920_v37, 5 }
0x3f1d   : > { %v3537_v59 = vmax.f32 %v3535_v39, 0.0  ;;  %v3104_v39 = vadd.f32 %v3102_v22, %v5668_v20 }
0x3f1f   : > { %4561 = vmatmul.msk.f32.vlgmr.msrb.gmra.mxu2 %vm1051_vm2, %v3537_v59 }
0x3f20   : > { %4142 = vmatpush.msrb.mxu2 %v5914_v29 }
0x3f22   : > { %4143 = vmatpush.msrb.mxu2 %v5925_v30  ;;  %v3594_v7 = vpop.f32.mrf.mxu3 }
0x3f24   : > { %4144 = vmatpush.msrb.mxu2 %v5931_v42 }
0x3f26   : > { %4145 = vmatpush.msrb.mxu2 %v5937_v41 }
0x3fa2   : > { %v3567_v6 = vpop.f32.mrf.mxu2 }
0x3fa3   : > { %v5995_v38 = vadd.f32 %v5992_v63, %v3567_v6 }
0x3fa5   : > { %v3597_v8 = vadd.f32 %v3594_v7, %v5995_v38  ;;  %v4504_v7 = vmul.f32 -1.442695, %v3104_v39 }
0x3fa7   : > { %4850 = vtanh.f32 %v3597_v8  ;;  %v4563_v14 = vmul.f32 -1.442695, %v3597_v8 }
0x3fa9   : > { %4852 = vpow2.f32 %v4563_v14 }
0x3fad   : > { %v4851_v11 = vpop.eup %4850 }
0x3fae   : > { %3620 = vrot.lane.b32.xlu1 %v4851_v11, %s6168_s20 }
0x3faf   : > { %v4853_v15 = vpop.eup %4852 }
0x3fb0   : > { %v3601_v25 = vadd.f32 1.0, %v4853_v15 }
0x3fb2   : > { %4854 = vrcp.f32 %v3601_v25  ;;  %v3613_v16 = vand.u32 2147483648, %v3601_v25  ;;  %vm3607_vm15 = vweird.f32 %v3601_v25  ;;  %v3611_v17 = vand.u32 2147483647, %v3601_v25 }
0x3fb4   : > { %v3614_v2 = vor.u32 1.1754944e-38, %v3613_v16  ;;  %vm3612_vm1 = vcmp.eq.f32.partialorder %v3611_v17, 8.507059e+37 }
0x3fb8   : > { %v4855_v52 = vpop.eup %4854 }
0x3fb9   : > { %v3603_v10 = vmul.f32 %v4855_v52, %v3601_v25  ;;  %vm3608_vm14 = vweird.f32 %v4855_v52 }
0x3fba   : > { %vm3609_vm0 = vmor %vm3607_vm15, %vm3608_vm14 }
0x3fbb   : > { %v3604_v45 = vsub.f32 1.0, %v3603_v10 }
0x3fbd   : > { %v3605_v28 = vmul.f32 %v4855_v52, %v3604_v45 }
0x3fbf   : > { %v3606_v40 = vadd.f32 %v4855_v52, %v3605_v28 }
0x3fc1   : > { %v3610_v0 = vsel %vm3609_vm0, %v4855_v52, %v3606_v40 }
0x3fc2   : > { %v3615_v4 = vsel %vm3612_vm1, %v3614_v2, %v3610_v0 }
0x3fc3   : > { %v3618_v24 = vmul.f32 0.0, %v3615_v4 }
0x4020   : > { %v3621_v3 = vpop.permute.xlu1 %3620 }
0x4021   : > { %v3623_v23 = vmul.f32 %v3621_v3, %v3615_v4 }
0x4023   : > { %3625 = vrot.lane.b32.xlu2 %v3623_v23, %s6168_s20 }
0x407d   : > { %v3626_v27 = vpop.permute.xlu2 %3625 }
0x407e   : > { %v3628_v31 = vadd.f32 %v3626_v27, %v3618_v24 }
0x4080   : > { %4856 = vtanh.f32 %v3628_v31  ;;  %v3685_v18 = vrot.slane %v3628_v31, 7 }
0x4086   : > { %v4857_v33 = vpop.eup %4856 }
0x4087   : > { %3631 = vrot.lane.b32.xlu0 %v4857_v33, %s6168_s20  ;;  %v3126_v33 = vrot.slane %v5728_v60, 7 }
0x40f9   : > { %v3632_v35 = vpop.permute.xlu0 %3631 }
0x40fa   : > { %v3634_v36 = vmul.f32 %v3632_v35, %v3615_v4 }
0x40fc   : > { %3636 = vrot.lane.b32.xlu1 %v3634_v36, %s6167_s26 }
0x416e   : > { %v3637_v43 = vpop.permute.xlu1 %3636 }
0x416f   : > { %4564 = vmatmul.msk.f32.vlgmr.msrb.gmra.mxu3 %vm1097_vm8, %v3637_v43 }
0x4170   : > { %4208 = vmatpush.msrb.mxu3 %v5914_v29 }
0x4172   : > { %4209 = vmatpush.msrb.mxu3 %v5925_v30 }
0x4174   : > { %4210 = vmatpush.msrb.mxu3 %v5931_v42 }
0x4176   : > { %4211 = vmatpush.msrb.mxu3 %v5937_v41 }
0x41f2   : > { %v3657_v44 = vpop.f32.mrf.mxu3 }
0x41f3   : > { %v3661_v61 = vrot.slane %v3657_v44, 7 }
0x41f5   : > { %v3663_v1 = vadd.f32 %v3661_v61, %v5995_v38 }
0x41f7   : > { %4858 = vtanh.f32 %v3663_v1  ;;  %v4565_v46 = vmul.f32 -1.442695, %v3663_v1 }
0x41f9   : > { %4860 = vpow2.f32 %v4565_v46 }
0x41fd   : > { %v4859_v9 = vpop.eup %4858 }
0x41fe   : > { %3689 = vrot.lane.b32.xlu2 %v4859_v9, %s6168_s20 }
0x41ff   : > { %v4861_v29 = vpop.eup %4860 }
0x4200   : > { %v3667_v12 = vadd.f32 1.0, %v4861_v29 }
0x4202   : > { %4862 = vrcp.f32 %v3667_v12  ;;  %v3679_v55 = vand.u32 2147483648, %v3667_v12  ;;  %vm3673_vm4 = vweird.f32 %v3667_v12  ;;  %v3677_v54 = vand.u32 2147483647, %v3667_v12 }
0x4204   : > { %v3680_v48 = vor.u32 1.1754944e-38, %v3679_v55  ;;  %vm3678_vm6 = vcmp.eq.f32.partialorder %v3677_v54, 8.507059e+37 }
0x4206   : > { %3072 = vrot.lane.b32.xlu2 %v5764_v5, %s6167_s26 }
0x4208   : > { %v4863_v30 = vpop.eup %4862 }
0x4209   : > { %v3669_v42 = vmul.f32 %v4863_v30, %v3667_v12  ;;  %vm3674_vm3 = vweird.f32 %v4863_v30 }
0x420a   : > { %vm3675_vm5 = vmor %vm3673_vm4, %vm3674_vm3 }
0x420b   : > { %v3670_v21 = vsub.f32 1.0, %v3669_v42 }
0x420d   : > { %v3671_v41 = vmul.f32 %v4863_v30, %v3670_v21 }
0x420f   : > { %v3672_v34 = vadd.f32 %v4863_v30, %v3671_v41 }
0x4211   : > { %v3676_v47 = vsel %vm3675_vm5, %v4863_v30, %v3672_v34 }
0x4212   : > { %v3681_v5 = vsel %vm3678_vm6, %v3680_v48, %v3676_v47 }
0x4213   : > { %v3687_v53 = vmul.f32 %v3685_v18, %v3681_v5 }
0x4258   : > { %v3690_v49 = vpop.permute.xlu2 %3689 }
0x4259   : > { %v3692_v56 = vmul.f32 %v3690_v49, %v3681_v5 }
0x425b   : > { %3694 = vrot.lane.b32.xlu0 %v3692_v56, %s6168_s20 }
0x4260   : > { %v3073_v50 = vpop.permute.xlu2 %3072 }
0x4261   : > { %3075 = vst.msk [vmem:[#allocation2 + $0xb] sm:$0x4] %vm1311_vm7, %v3073_v50 }
0x4268   : > { %v3450_v51 = vld [vmem:[#allocation2 + $0xc] sm:$0x3] }
0x4269   : > { %4554 = vmatmul.msk.f32.gmra.mxu0 %vm1097_vm8, %v3450_v51 }
0x42cd   : > { %v3695_v57 = vpop.permute.xlu0 %3694 }
0x42ce   : > { %v6014_v58 = vadd.f32 %v3695_v57, %v3687_v53 }
0x42d0   : > { %4864 = vtanh.f32 %v6014_v58  ;;  %v3755_v56 = vrot.slane %v6014_v58, 7  ;;  %v3410_v58 = vadd.f32 %v5985_v62, %v5965_v19 }
0x42d1   : > { %4866 = vtanh.f32 %v3104_v39 }
0x42d2   : > { %4868 = vpow2.f32 %v4504_v7  ;;  %v3448_v7 = vadd.f32 %v5987_v13, %v3410_v58 }
0x42d6   : > { %v4865_v59 = vpop.eup %4864 }
0x42d7   : > { %3700 = vrot.lane.b32.xlu1 %v4865_v59, %s6168_s20  ;;  %v4867_v6 = vpop.eup %4866 }
0x42d8   : > { %v4869_v8 = vpop.eup %4868 }
0x42d9   : > { %v3108_v11 = vadd.f32 1.0, %v4869_v8 }
0x42db   : > { %4870 = vrcp.f32 %v3108_v11  ;;  %v3120_v28 = vand.u32 2147483648, %v3108_v11  ;;  %vm3114_vm10 = vweird.f32 %v3108_v11  ;;  %v3118_v40 = vand.u32 2147483647, %v3108_v11 }
0x42dd   : > { %v3121_v17 = vor.u32 1.1754944e-38, %v3120_v28  ;;  %vm3119_vm13 = vcmp.eq.f32.partialorder %v3118_v40, 8.507059e+37 }
0x42df   : > { %3130 = vrot.lane.b32.xlu1 %v4867_v6, %s6168_s20 }
0x42e1   : > { %v4871_v14 = vpop.eup %4870 }
0x42e2   : > { %v3110_v15 = vmul.f32 %v4871_v14, %v3108_v11  ;;  %vm3115_vm9 = vweird.f32 %v4871_v14 }
0x42e3   : > { %vm3116_vm11 = vmor %vm3114_vm10, %vm3115_vm9 }
0x42e4   : > { %v3111_v25 = vsub.f32 1.0, %v3110_v15 }
0x42e6   : > { %v3112_v37 = vmul.f32 %v4871_v14, %v3111_v25  ;;  %v3482_v23 = vpop.f32.mrf.mxu0 }
0x42e7   : > { %v3486_v8 = vadd.f32 %v3482_v23, %v3448_v7 }
0x42e8   : > { %v3113_v20 = vadd.f32 %v4871_v14, %v3112_v37 }
0x42ea   : > { %v3117_v16 = vsel %vm3116_vm11, %v4871_v14, %v3113_v20 }
0x42eb   : > { %v3122_v2 = vsel %vm3119_vm13, %v3121_v17, %v3117_v16 }
0x42ec   : > { %v3128_v36 = vmul.f32 %v3126_v33, %v3122_v2 }
0x4349   : > { %v3701_v52 = vpop.permute.xlu1 %3700 }
0x434a   : > { %v3703_v10 = vmul.f32 %v3701_v52, %v3681_v5 }
0x434c   : > { %v3705_v45 = vrot.slane %v3703_v10, 1 }
0x434e   : > { %3706 = vrot.lane.b32.xlu0 %v3705_v45, %s6167_s26 }
0x4351   : > { %v3131_v0 = vpop.permute.xlu1 %3130 }
0x4352   : > { %v3133_v3 = vmul.f32 %v3131_v0, %v3122_v2 }
0x4356   : > { %3135 = vrot.lane.b32.xlu0 %v3133_v3, %s6168_s20 }
0x43c0   : > { %v3707_v4 = vpop.permute.xlu0 %3706 }
0x43c1   : > { %4566 = vmatmul.msk.f32.vlgmr.msra.gmra.mxu0 %vm1097_vm8, %v3707_v4 }
0x43c8   : > { %v3136_v35 = vpop.permute.xlu0 %3135 }
0x43c9   : > { %v3138_v43 = vadd.f32 %v3136_v35, %v3128_v36 }
0x443e   : > { %v3727_v24 = vpop.f32.mrf.mxu0 }
0x443f   : > { %v3731_v27 = vrot.slane %v3727_v24, 6 }
0x4441   : > { %v3733_v31 = vadd.f32 %v3731_v27, %v5995_v38 }
0x4443   : > { %4872 = vtanh.f32 %v3733_v31  ;;  %v4567_v1 = vmul.f32 -1.442695, %v3733_v31 }
0x4444   : > { %4874 = vtanh.f32 %v3138_v43 }
0x4445   : > { %4876 = vpow2.f32 %v4567_v1 }
0x4449   : > { %v4873_v44 = vpop.eup %4872 }
0x444a   : > { %3759 = vrot.lane.b32.xlu2 %v4873_v44, %s6168_s20  ;;  %v4875_v61 = vpop.eup %4874 }
0x444b   : > { %v4877_v9 = vpop.eup %4876 }
0x444c   : > { %v3737_v46 = vadd.f32 1.0, %v4877_v9 }
0x444e   : > { %4878 = vrcp.f32 %v3737_v46  ;;  %v3749_v21 = vand.u32 2147483648, %v3737_v46  ;;  %vm3743_vm14 = vweird.f32 %v3737_v46  ;;  %v3747_v41 = vand.u32 2147483647, %v3737_v46 }
0x4450   : > { %v3750_v55 = vor.u32 1.1754944e-38, %v3749_v21  ;;  %vm3748_vm0 = vcmp.eq.f32.partialorder %v3747_v41, 8.507059e+37 }
0x4452   : > { %3141 = vrot.lane.b32.xlu2 %v4875_v61, %s6168_s20 }
0x4454   : > { %v4879_v29 = vpop.eup %4878 }
0x4455   : > { %v3739_v12 = vmul.f32 %v4879_v29, %v3737_v46  ;;  %vm3744_vm7 = vweird.f32 %v4879_v29 }
0x4456   : > { %vm3745_vm15 = vmor %vm3743_vm14, %vm3744_vm7 }
0x4457   : > { %v3740_v30 = vsub.f32 1.0, %v3739_v12 }
0x4459   : > { %v3741_v60 = vmul.f32 %v4879_v29, %v3740_v30 }
0x445b   : > { %v3742_v42 = vadd.f32 %v4879_v29, %v3741_v60 }
0x445d   : > { %v3746_v34 = vsel %vm3745_vm15, %v4879_v29, %v3742_v42 }
0x445e   : > { %v3751_v47 = vsel %vm3748_vm0, %v3750_v55, %v3746_v34 }
0x445f   : > { %v3757_v50 = vmul.f32 %v3755_v56, %v3751_v47 }
0x44a4   : > { %v3760_v54 = vpop.permute.xlu2 %3759 }
0x44a5   : > { %v3762_v48 = vmul.f32 %v3760_v54, %v3751_v47 }
0x44a7   : > { %3764 = vrot.lane.b32.xlu1 %v3762_v48, %s6168_s20 }
0x44ac   : > { %v3142_v49 = vpop.permute.xlu2 %3141 }
0x44ad   : > { %v3144_v5 = vmul.f32 %v3142_v49, %v3122_v2 }
0x44af   : > { %3146 = vrot.lane.b32.xlu1 %v3144_v5, %s6167_s26 }
0x4519   : > { %v3765_v51 = vpop.permute.xlu1 %3764 }
0x451a   : > { %v3767_v18 = vadd.f32 %v3765_v51, %v3757_v50 }
0x451c   : > { %4880 = vtanh.f32 %v3767_v18  ;;  %v3825_v31 = vrot.slane %v3767_v18, 7 }
0x4521   : > { %v3147_v53 = vpop.permute.xlu1 %3146 }
0x4522   : > { %v4881_v57 = vpop.eup %4880  ;;  %3149 = vst.msk [vmem:[#allocation2 + $0x1a] sm:$0x8] %vm1386_vm12, %v3147_v53 }
0x4523   : > { %3770 = vrot.lane.b32.xlu0 %v4881_v57, %s6168_s20 }
0x4529   : > { %v3488_v22 = vld [vmem:[#allocation2 + $0x1c] sm:$0x3] }
0x452a   : > { %4560 = vmatmul.msk.f32.gmra.mxu1 %vm1097_vm8, %v3488_v22 }
0x4595   : > { %v3771_v39 = vpop.permute.xlu0 %3770 }
0x4596   : > { %v3773_v59 = vmul.f32 %v3771_v39, %v3751_v47 }
0x4598   : > { %v3775_v6 = vrot.slane %v3773_v59, 2 }
0x459a   : > { %3776 = vrot.lane.b32.xlu2 %v3775_v6, %s6167_s26 }
0x45a7   : > { %v3520_v11 = vpop.f32.mrf.mxu1 }
0x45a8   : > { %v3524_v14 = vadd.f32 %v3520_v11, %v3486_v8 }
0x45aa   : > { %v3530_v15 = vmul.f32 %v5971_v26, %v3524_v14 }
0x45ac   : > { %v3536_v25 = vadd.f32 %v5976_v32, %v3530_v15 }
0x45ae   : > { %v3538_v37 = vmax.f32 %v3536_v25, 0.0 }
0x45b0   : > { %4562 = vmatmul.msk.f32.gmra.mxu2 %vm1051_vm2, %v3538_v37 }
0x45f4   : > { %v3777_v52 = vpop.permute.xlu2 %3776 }
0x45f5   : > { %4568 = vmatmul.msk.f32.vlgmr.msra.gmra.mxu1 %vm1097_vm8, %v3777_v52 }
0x4633   : > { %v6048_v46 = vpop.f32.mrf.mxu2 }
0x4672   : > { %v3797_v10 = vpop.f32.mrf.mxu1 }
0x4673   : > { %v3801_v45 = vrot.slane %v3797_v10, 5 }
0x4675   : > { %v3803_v20 = vadd.f32 %v3801_v45, %v5995_v38 }
0x4677   : > { %4882 = vtanh.f32 %v3803_v20  ;;  %v4569_v62 = vmul.f32 -1.442695, %v3803_v20 }
0x4679   : > { %4884 = vpow2.f32 %v4569_v62 }
0x467d   : > { %v4883_v19 = vpop.eup %4882 }
0x467e   : > { %3829 = vrot.lane.b32.xlu0 %v4883_v19, %s6168_s20 }
0x467f   : > { %v4885_v13 = vpop.eup %4884 }
0x4680   : > { %v3807_v26 = vadd.f32 1.0, %v4885_v13 }
0x4682   : > { %4886 = vrcp.f32 %v3807_v26  ;;  %v3819_v0 = vand.u32 2147483648, %v3807_v26  ;;  %vm3813_vm12 = vweird.f32 %v3807_v26  ;;  %v3817_v2 = vand.u32 2147483647, %v3807_v26 }
0x4684   : > { %v3820_v4 = vor.u32 1.1754944e-38, %v3819_v0  ;;  %vm3818_vm3 = vcmp.eq.f32.partialorder %v3817_v2, 8.507059e+37 }
0x4688   : > { %v4887_v32 = vpop.eup %4886 }
0x4689   : > { %v3809_v28 = vmul.f32 %v4887_v32, %v3807_v26  ;;  %vm3814_vm2 = vweird.f32 %v4887_v32 }
0x468a   : > { %vm3815_vm1 = vmor %vm3813_vm12, %vm3814_vm2 }
0x468b   : > { %v3810_v40 = vsub.f32 1.0, %v3809_v28 }
0x468d   : > { %v3811_v16 = vmul.f32 %v4887_v32, %v3810_v40 }
0x468f   : > { %v3812_v17 = vadd.f32 %v4887_v32, %v3811_v16 }
0x4691   : > { %v3816_v3 = vsel %vm3815_vm1, %v4887_v32, %v3812_v17 }
0x4692   : > { %v3821_v24 = vsel %vm3818_vm3, %v3820_v4, %v3816_v3 }
0x4693   : > { %v3827_v33 = vmul.f32 %v3825_v31, %v3821_v24 }
0x46f0   : > { %v3830_v23 = vpop.permute.xlu0 %3829 }
0x46f1   : > { %v3832_v27 = vmul.f32 %v3830_v23, %v3821_v24 }
0x46f3   : > { %3834 = vrot.lane.b32.xlu1 %v3832_v27, %s6168_s20 }
0x4765   : > { %v3835_v35 = vpop.permute.xlu1 %3834 }
0x4766   : > { %v3837_v36 = vadd.f32 %v3835_v35, %v3827_v33 }
0x4768   : > { %4888 = vtanh.f32 %v3837_v36  ;;  %v3895_v57 = vrot.slane %v3837_v36, 7 }
0x476e   : > { %v4889_v43 = vpop.eup %4888 }
0x476f   : > { %3840 = vrot.lane.b32.xlu2 %v4889_v43, %s6168_s20 }
0x47c9   : > { %v3841_v44 = vpop.permute.xlu2 %3840 }
0x47ca   : > { %v3843_v61 = vmul.f32 %v3841_v44, %v3821_v24 }
0x47cc   : > { %v3845_v1 = vrot.slane %v3843_v61, 3 }
0x47ce   : > { %3846 = vrot.lane.b32.xlu0 %v3845_v1, %s6167_s26 }
0x4840   : > { %v3847_v9 = vpop.permute.xlu0 %3846 }
0x4841   : > { %4570 = vmatmul.msk.f32.vlgmr.msra.gmra.mxu2 %vm1097_vm8, %v3847_v9 }
0x48c4   : > { %v3867_v29 = vpop.f32.mrf.mxu2 }
0x48c5   : > { %v3871_v12 = vrot.slane %v3867_v29, 4 }
0x48c7   : > { %v3873_v30 = vadd.f32 %v3871_v12, %v5995_v38 }
0x48c9   : > { %4890 = vtanh.f32 %v3873_v30  ;;  %v4571_v42 = vmul.f32 -1.442695, %v3873_v30 }
0x48cb   : > { %4892 = vpow2.f32 %v4571_v42 }
0x48cf   : > { %v4891_v60 = vpop.eup %4890 }
0x48d0   : > { %3899 = vrot.lane.b32.xlu1 %v4891_v60, %s6168_s20 }
0x48d1   : > { %v4893_v21 = vpop.eup %4892 }
0x48d2   : > { %v3877_v41 = vadd.f32 1.0, %v4893_v21 }
0x48d4   : > { %4894 = vrcp.f32 %v3877_v41  ;;  %v3889_v49 = vand.u32 2147483648, %v3877_v41  ;;  %vm3883_vm5 = vweird.f32 %v3877_v41  ;;  %v3887_v5 = vand.u32 2147483647, %v3877_v41 }
0x48d6   : > { %v3890_v50 = vor.u32 1.1754944e-38, %v3889_v49  ;;  %vm3888_vm9 = vcmp.eq.f32.partialorder %v3887_v5, 8.507059e+37 }
0x48da   : > { %v4895_v34 = vpop.eup %4894 }
0x48db   : > { %v3879_v55 = vmul.f32 %v4895_v34, %v3877_v41  ;;  %vm3884_vm4 = vweird.f32 %v4895_v34 }
0x48dc   : > { %vm3885_vm6 = vmor %vm3883_vm5, %vm3884_vm4 }
0x48dd   : > { %v3880_v54 = vsub.f32 1.0, %v3879_v55 }
0x48df   : > { %v3881_v47 = vmul.f32 %v4895_v34, %v3880_v54 }
0x48e1   : > { %v3882_v48 = vadd.f32 %v4895_v34, %v3881_v47 }
0x48e3   : > { %v3886_v56 = vsel %vm3885_vm6, %v4895_v34, %v3882_v48 }
0x48e4   : > { %v3891_v18 = vsel %vm3888_vm9, %v3890_v50, %v3886_v56 }
0x48e5   : > { %v3897_v22 = vmul.f32 %v3895_v57, %v3891_v18 }
0x4942   : > { %v3900_v51 = vpop.permute.xlu1 %3899 }
0x4943   : > { %v3902_v53 = vmul.f32 %v3900_v51, %v3891_v18 }
0x4945   : > { %3904 = vrot.lane.b32.xlu2 %v3902_v53, %s6168_s20 }
0x499f   : > { %v3905_v39 = vpop.permute.xlu2 %3904 }
0x49a0   : > { %v3907_v59 = vadd.f32 %v3905_v39, %v3897_v22 }
0x49a2   : > { %4896 = vtanh.f32 %v3907_v59  ;;  %v3965_v3 = vrot.slane %v3907_v59, 7 }
0x49a8   : > { %v4897_v6 = vpop.eup %4896 }
0x49a9   : > { %3910 = vrot.lane.b32.xlu0 %v4897_v6, %s6168_s20 }
0x4a1b   : > { %v3911_v58 = vpop.permute.xlu0 %3910 }
0x4a1c   : > { %v3913_v7 = vmul.f32 %v3911_v58, %v3891_v18 }
0x4a1e   : > { %v3915_v8 = vrot.slane %v3913_v7, 4 }
0x4a20   : > { %3916 = vrot.lane.b32.xlu1 %v3915_v8, %s6167_s26 }
0x4a92   : > { %v3917_v11 = vpop.permute.xlu1 %3916 }
0x4a93   : > { %4572 = vmatmul.msk.f32.vlgmr.msra.gmra.mxu3 %vm1097_vm8, %v3917_v11 }
0x4b16   : > { %v3937_v14 = vpop.f32.mrf.mxu3 }
0x4b17   : > { %v3941_v15 = vrot.slane %v3937_v14, 3 }
0x4b19   : > { %v3943_v25 = vadd.f32 %v3941_v15, %v5995_v38 }
0x4b1b   : > { %4898 = vtanh.f32 %v3943_v25  ;;  %v4573_v52 = vmul.f32 -1.442695, %v3943_v25 }
0x4b1d   : > { %4900 = vpow2.f32 %v4573_v52 }
0x4b21   : > { %v4899_v37 = vpop.eup %4898 }
0x4b22   : > { %3969 = vrot.lane.b32.xlu2 %v4899_v37, %s6168_s20 }
0x4b23   : > { %v4901_v10 = vpop.eup %4900 }
0x4b24   : > { %v3947_v45 = vadd.f32 1.0, %v4901_v10 }
0x4b26   : > { %4902 = vrcp.f32 %v3947_v45  ;;  %v3959_v32 = vand.u32 2147483648, %v3947_v45  ;;  %vm3953_vm11 = vweird.f32 %v3947_v45  ;;  %v3957_v28 = vand.u32 2147483647, %v3947_v45 }
0x4b28   : > { %v3960_v16 = vor.u32 1.1754944e-38, %v3959_v32  ;;  %vm3958_vm7 = vcmp.eq.f32.partialorder %v3957_v28, 8.507059e+37 }
0x4b2c   : > { %v4903_v20 = vpop.eup %4902 }
0x4b2d   : > { %v3949_v19 = vmul.f32 %v4903_v20, %v3947_v45  ;;  %vm3954_vm10 = vweird.f32 %v4903_v20 }
0x4b2e   : > { %vm3955_vm13 = vmor %vm3953_vm11, %vm3954_vm10 }
0x4b2f   : > { %v3950_v62 = vsub.f32 1.0, %v3949_v19 }
0x4b31   : > { %v3951_v13 = vmul.f32 %v4903_v20, %v3950_v62 }
0x4b33   : > { %v3952_v26 = vadd.f32 %v4903_v20, %v3951_v13 }
0x4b35   : > { %v3956_v40 = vsel %vm3955_vm13, %v4903_v20, %v3952_v26 }
0x4b36   : > { %v3961_v0 = vsel %vm3958_vm7, %v3960_v16, %v3956_v40 }
0x4b37   : > { %v3967_v4 = vmul.f32 %v3965_v3, %v3961_v0 }
0x4b7c   : > { %v3970_v17 = vpop.permute.xlu2 %3969 }
0x4b7d   : > { %v3972_v2 = vmul.f32 %v3970_v17, %v3961_v0 }
0x4b7f   : > { %3974 = vrot.lane.b32.xlu0 %v3972_v2, %s6168_s20 }
0x4bf1   : > { %v3975_v23 = vpop.permute.xlu0 %3974 }
0x4bf2   : > { %v3977_v24 = vadd.f32 %v3975_v23, %v3967_v4 }
0x4bf4   : > { %4904 = vtanh.f32 %v3977_v24  ;;  %v4035_v56 = vrot.slane %v3977_v24, 7  ;;  %v3571_v24 = vadd.f32 %v5992_v63, %v6048_v46 }
0x4bfa   : > { %v4905_v27 = vpop.eup %4904 }
0x4bfb   : > { %3980 = vrot.lane.b32.xlu1 %v4905_v27, %s6168_s20 }
0x4c6d   : > { %v3981_v31 = vpop.permute.xlu1 %3980 }
0x4c6e   : > { %v3983_v33 = vmul.f32 %v3981_v31, %v3961_v0 }
0x4c70   : > { %v3985_v35 = vrot.slane %v3983_v33, 5 }
0x4c72   : > { %3986 = vrot.lane.b32.xlu2 %v3985_v35, %s6167_s26 }
0x4ccc   : > { %v3987_v36 = vpop.permute.xlu2 %3986 }
0x4ccd   : > { %4574 = vmatmul.msk.f32.vlgmr.msrb.gmra.mxu0 %vm1097_vm8, %v3987_v36 }
0x4d4a   : > { %v4007_v43 = vpop.f32.mrf.mxu0 }
0x4d4b   : > { %v4011_v44 = vrot.slane %v4007_v43, 2 }
0x4d4d   : > { %v4013_v61 = vadd.f32 %v4011_v44, %v5995_v38 }
0x4d4f   : > { %4906 = vtanh.f32 %v4013_v61  ;;  %v4575_v9 = vmul.f32 -1.442695, %v4013_v61 }
0x4d51   : > { %4908 = vpow2.f32 %v4575_v9 }
0x4d55   : > { %v4907_v1 = vpop.eup %4906 }
0x4d56   : > { %4039 = vrot.lane.b32.xlu0 %v4907_v1, %s6168_s20 }
0x4d57   : > { %v4909_v29 = vpop.eup %4908 }
0x4d58   : > { %v4017_v12 = vadd.f32 1.0, %v4909_v29 }
0x4d5a   : > { %4910 = vrcp.f32 %v4017_v12  ;;  %v4029_v34 = vand.u32 2147483648, %v4017_v12  ;;  %vm4023_vm15 = vweird.f32 %v4017_v12  ;;  %v4027_v55 = vand.u32 2147483647, %v4017_v12 }
0x4d5c   : > { %v4030_v47 = vor.u32 1.1754944e-38, %v4029_v34  ;;  %vm4028_vm2 = vcmp.eq.f32.partialorder %v4027_v55, 8.507059e+37 }
0x4d60   : > { %v4911_v30 = vpop.eup %4910 }
0x4d61   : > { %v4019_v60 = vmul.f32 %v4911_v30, %v4017_v12  ;;  %vm4024_vm14 = vweird.f32 %v4911_v30 }
0x4d62   : > { %vm4025_vm0 = vmor %vm4023_vm15, %vm4024_vm14  ;;  %vm4291_vm15 = vcmask 57344  }
0x4d63   : > { %v4020_v42 = vsub.f32 1.0, %v4019_v60 }
0x4d65   : > { %v4021_v21 = vmul.f32 %v4911_v30, %v4020_v42 }
0x4d67   : > { %v4022_v41 = vadd.f32 %v4911_v30, %v4021_v21 }
0x4d69   : > { %v4026_v54 = vsel %vm4025_vm0, %v4911_v30, %v4022_v41 }
0x4d6a   : > { %v4031_v49 = vsel %vm4028_vm2, %v4030_v47, %v4026_v54 }
0x4d6b   : > { %v4037_v50 = vmul.f32 %v4035_v56, %v4031_v49 }
0x4dc8   : > { %v4040_v48 = vpop.permute.xlu0 %4039 }
0x4dc9   : > { %v4042_v5 = vmul.f32 %v4040_v48, %v4031_v49 }
0x4dcb   : > { %4044 = vrot.lane.b32.xlu1 %v4042_v5, %s6168_s20 }
0x4e3d   : > { %v4045_v51 = vpop.permute.xlu1 %4044 }
0x4e3e   : > { %v4047_v18 = vadd.f32 %v4045_v51, %v4037_v50 }
0x4e40   : > { %4912 = vtanh.f32 %v4047_v18  ;;  %v4105_v28 = vrot.slane %v4047_v18, 7 }
0x4e46   : > { %v4913_v53 = vpop.eup %4912 }
0x4e47   : > { %4050 = vrot.lane.b32.xlu2 %v4913_v53, %s6168_s20 }
0x4ea1   : > { %v4051_v57 = vpop.permute.xlu2 %4050 }
0x4ea2   : > { %v4053_v22 = vmul.f32 %v4051_v57, %v4031_v49 }
0x4ea4   : > { %v4055_v39 = vrot.slane %v4053_v22, 6 }
0x4ea6   : > { %4056 = vrot.lane.b32.xlu0 %v4055_v39, %s6167_s26 }
0x4f18   : > { %v4057_v59 = vpop.permute.xlu0 %4056 }
0x4f19   : > { %4576 = vmatmul.msk.f32.vlgmr.msrb.gmra.mxu1 %vm1097_vm8, %v4057_v59 }
0x4f96   : > { %v4077_v6 = vpop.f32.mrf.mxu1 }
0x4f97   : > { %v4081_v58 = vrot.slane %v4077_v6, 1 }
0x4f99   : > { %v4083_v7 = vadd.f32 %v4081_v58, %v5995_v38 }
0x4f9b   : > { %4914 = vtanh.f32 %v4083_v7  ;;  %v4577_v11 = vmul.f32 -1.442695, %v4083_v7 }
0x4f9d   : > { %4916 = vpow2.f32 %v4577_v11 }
0x4fa1   : > { %v4915_v8 = vpop.eup %4914 }
0x4fa2   : > { %4109 = vrot.lane.b32.xlu1 %v4915_v8, %s6168_s20 }
0x4fa3   : > { %v4917_v14 = vpop.eup %4916 }
0x4fa4   : > { %v4087_v15 = vadd.f32 1.0, %v4917_v14 }
0x4fa6   : > { %4918 = vrcp.f32 %v4087_v15  ;;  %v4099_v20 = vand.u32 2147483648, %v4087_v15  ;;  %vm4093_vm1 = vweird.f32 %v4087_v15  ;;  %v4097_v19 = vand.u32 2147483647, %v4087_v15 }
0x4fa8   : > { %v4100_v62 = vor.u32 1.1754944e-38, %v4099_v20  ;;  %vm4098_vm4 = vcmp.eq.f32.partialorder %v4097_v19, 8.507059e+37 }
0x4fac   : > { %v4919_v25 = vpop.eup %4918 }
0x4fad   : > { %v4089_v37 = vmul.f32 %v4919_v25, %v4087_v15  ;;  %vm4094_vm12 = vweird.f32 %v4919_v25 }
0x4fae   : > { %vm4095_vm3 = vmor %vm4093_vm1, %vm4094_vm12 }
0x4faf   : > { %v4090_v52 = vsub.f32 1.0, %v4089_v37 }
0x4fb1   : > { %v4091_v10 = vmul.f32 %v4919_v25, %v4090_v52 }
0x4fb3   : > { %v4092_v45 = vadd.f32 %v4919_v25, %v4091_v10 }
0x4fb5   : > { %v4096_v38 = vsel %vm4095_vm3, %v4919_v25, %v4092_v45 }
0x4fb6   : > { %v4101_v26 = vsel %vm4098_vm4, %v4100_v62, %v4096_v38  ;;  %v4263_v62 = vld [vmem:[%s6146_s13 + $0x18] sm:$0xff] }
0x4fb7   : > { %v4107_v40 = vmul.f32 %v4105_v28, %v4101_v26  ;;  %4283 = vmatpush.msra.mxu0 %v4263_v62 }
0x5014   : > { %v4110_v13 = vpop.permute.xlu1 %4109 }
0x5015   : > { %v4112_v32 = vmul.f32 %v4110_v13, %v4101_v26  ;;  %v4262_v13 = vld [vmem:[%s6146_s13 + $0x10] sm:$0xff] }
0x5016   : > { %4284 = vmatpush.msra.mxu0 %v4262_v13 }
0x5017   : > { %4114 = vrot.lane.b32.xlu2 %v4112_v32, %s6168_s20  ;;  %v4260_v32 = vld [vmem:[%s6146_s13] sm:$0xff] }
0x5071   : > { %v4115_v16 = vpop.permute.xlu2 %4114 }
0x5072   : > { %v4117_v17 = vadd.f32 %v4115_v16, %v4107_v40 }
0x5074   : > { %4920 = vtanh.f32 %v4117_v17  ;;  %v4172_v41 = vrot.slane %v4117_v17, 7 }
0x507a   : > { %v4921_v0 = vpop.eup %4920 }
0x507b   : > { %4120 = vrot.lane.b32.xlu0 %v4921_v0, %s6168_s20  ;;  %v4264_v0 = vld [vmem:[%s6147_s14] sm:$0x1] }
0x50ed   : > { %v4121_v2 = vpop.permute.xlu0 %4120 }
0x50ee   : > { %v4123_v3 = vmul.f32 %v4121_v2, %v4101_v26  ;;  %v4261_v26 = vld [vmem:[%s6146_s13 + $0x8] sm:$0xff] }
0x50ef   : > { %4285 = vmatpush.msra.mxu0 %v4261_v26 }
0x50f0   : > { %v4125_v4 = vrot.slane %v4123_v3, 7 }
0x50f1   : > { %4286 = vmatpush.msra.mxu0 %v4260_v32 }
0x50f2   : > { %4126 = vrot.lane.b32.xlu1 %v4125_v4, %s6167_s26 }
0x5164   : > { %v4127_v23 = vpop.permute.xlu1 %4126 }
0x5165   : > { %4578 = vmatmul.msk.f32.vlgmr.msrb.gmra.mxu2 %vm1097_vm8, %v4127_v23 }
0x51e8   : > { %v4147_v27 = vpop.f32.mrf.mxu2 }
0x51e9   : > { %v4150_v31 = vadd.f32 %v4147_v27, %v3571_v24 }
0x51eb   : > { %4922 = vtanh.f32 %v4150_v31  ;;  %v4579_v35 = vmul.f32 -1.442695, %v4150_v31 }
0x51ed   : > { %4924 = vpow2.f32 %v4579_v35 }
0x51f1   : > { %v4923_v33 = vpop.eup %4922 }
0x51f2   : > { %4176 = vrot.lane.b32.xlu2 %v4923_v33, %s6168_s20 }
0x51f3   : > { %v4925_v36 = vpop.eup %4924 }
0x51f4   : > { %v4154_v43 = vadd.f32 1.0, %v4925_v36 }
0x51f6   : > { %4926 = vrcp.f32 %v4154_v43  ;;  %v4166_v12 = vand.u32 2147483648, %v4154_v43  ;;  %vm4160_vm6 = vweird.f32 %v4154_v43  ;;  %v4164_v63 = vand.u32 2147483647, %v4154_v43 }
0x51f8   : > { %v4167_v30 = vor.u32 1.1754944e-38, %v4166_v12  ;;  %vm4165_vm10 = vcmp.eq.f32.partialorder %v4164_v63, 8.507059e+37 }
0x51fc   : > { %v4927_v44 = vpop.eup %4926 }
0x51fd   : > { %v4156_v61 = vmul.f32 %v4927_v44, %v4154_v43  ;;  %vm4161_vm5 = vweird.f32 %v4927_v44 }
0x51fe   : > { %vm4162_vm9 = vmor %vm4160_vm6, %vm4161_vm5 }
0x51ff   : > { %v4157_v1 = vsub.f32 1.0, %v4156_v61 }
0x5201   : > { %v4158_v9 = vmul.f32 %v4927_v44, %v4157_v1 }
0x5203   : > { %v4159_v29 = vadd.f32 %v4927_v44, %v4158_v9 }
0x5205   : > { %v4163_v46 = vsel %vm4162_vm9, %v4927_v44, %v4159_v29 }
0x5206   : > { %v4168_v42 = vsel %vm4165_vm10, %v4167_v30, %v4163_v46 }
0x5207   : > { %v4174_v34 = vmul.f32 %v4172_v41, %v4168_v42 }
0x524c   : > { %v4177_v60 = vpop.permute.xlu2 %4176 }
0x524d   : > { %v4179_v21 = vmul.f32 %v4177_v60, %v4168_v42 }
0x524f   : > { %4181 = vrot.lane.b32.xlu0 %v4179_v21, %s6168_s20 }
0x52c1   : > { %v4182_v55 = vpop.permute.xlu0 %4181 }
0x52c2   : > { %v4184_v54 = vadd.f32 %v4182_v55, %v4174_v34 }
0x52c4   : > { %4928 = vtanh.f32 %v4184_v54  ;;  %v4241_v10 = vrot.slane %v4184_v54, 7 }
0x52ca   : > { %v4929_v47 = vpop.eup %4928 }
0x52cb   : > { %4187 = vrot.lane.b32.xlu1 %v4929_v47, %s6168_s20 }
0x533d   : > { %v4188_v48 = vpop.permute.xlu1 %4187 }
0x533e   : > { %v4190_v49 = vmul.f32 %v4188_v48, %v4168_v42 }
0x5340   : > { %4192 = vrot.lane.b32.xlu2 %v4190_v49, %s6167_s26 }
0x539a   : > { %v4193_v5 = vpop.permute.xlu2 %4192 }
0x539b   : > { %4580 = vmatmul.msk.f32.vlgmr.msrb.gmra.mxu3 %vm1097_vm8, %v4193_v5 }
0x541e   : > { %v4213_v56 = vpop.f32.mrf.mxu3 }
0x541f   : > { %v4217_v50 = vrot.slane %v4213_v56, 7 }
0x5421   : > { %v4219_v51 = vadd.f32 %v4217_v50, %v3571_v24 }
0x5423   : > { %4930 = vtanh.f32 %v4219_v51  ;;  %v4581_v53 = vmul.f32 -1.442695, %v4219_v51 }
0x5425   : > { %4932 = vpow2.f32 %v4581_v53 }
0x5429   : > { %v4931_v18 = vpop.eup %4930 }
0x542a   : > { %4245 = vrot.lane.b32.xlu0 %v4931_v18, %s6168_s20 }
0x542b   : > { %v4933_v57 = vpop.eup %4932 }
0x542c   : > { %v4223_v22 = vadd.f32 1.0, %v4933_v57 }
0x542e   : > { %4934 = vrcp.f32 %v4223_v22  ;;  %v4235_v8 = vand.u32 2147483648, %v4223_v22  ;;  %vm4229_vm13 = vweird.f32 %v4223_v22  ;;  %v4233_v11 = vand.u32 2147483647, %v4223_v22 }
0x5430   : > { %v4236_v15 = vor.u32 1.1754944e-38, %v4235_v8  ;;  %vm4234_vm14 = vcmp.eq.f32.partialorder %v4233_v11, 8.507059e+37 }
0x5434   : > { %v4935_v39 = vpop.eup %4934 }
0x5435   : > { %v4225_v59 = vmul.f32 %v4935_v39, %v4223_v22  ;;  %vm4230_vm11 = vweird.f32 %v4935_v39 }
0x5436   : > { %vm4231_vm7 = vmor %vm4229_vm13, %vm4230_vm11 }
0x5437   : > { %v4226_v6 = vsub.f32 1.0, %v4225_v59 }
0x5439   : > { %v4227_v58 = vmul.f32 %v4935_v39, %v4226_v6 }
0x543b   : > { %v4228_v7 = vadd.f32 %v4935_v39, %v4227_v58 }
0x543d   : > { %v4232_v14 = vsel %vm4231_vm7, %v4935_v39, %v4228_v7 }
0x543e   : > { %v4237_v37 = vsel %vm4234_vm14, %v4236_v15, %v4232_v14 }
0x543f   : > { %v4243_v45 = vmul.f32 %v4241_v10, %v4237_v37 }
0x549c   : > { %v4246_v25 = vpop.permute.xlu0 %4245 }
0x549d   : > { %v4248_v52 = vmul.f32 %v4246_v25, %v4237_v37 }
0x549f   : > { %4250 = vrot.lane.b32.xlu1 %v4248_v52, %s6168_s20 }
0x5511   : > { %v4251_v20 = vpop.permute.xlu1 %4250 }
0x5512   : > { %v4253_v19 = vadd.f32 %v4251_v20, %v4243_v45 }
0x5514   : > { %4936 = vtanh.f32 %v4253_v19 }
0x551a   : > { %v4937_v38 = vpop.eup %4936 }
0x551b   : > { %4256 = vrot.lane.b32.xlu2 %v4937_v38, %s6168_s20 }
0x5575   : > { %v4257_v28 = vpop.permute.xlu2 %4256 }
0x5576   : > { %v4259_v40 = vmul.f32 %v4257_v28, %v4237_v37 }
0x5578   : > { %v4266_v16 = vrot.slane %v4259_v40, 1 }
0x557a   : > { %4267 = vrot.lane.b32.xlu0 %v4266_v16, %s6167_s26  ;;  %s4294_s26 = scalar_lea.sflag [#allocation4], %s485_s25 }
0x55ec   : > { %v4268_v17 = vpop.permute.xlu0 %4267 }
0x55ed   : > { %4582 = vmatmul.msk.f32.vlgmr.msra.gmra.mxu0 %vm1097_vm8, %v4268_v17 }
0x566a   : > { %v4288_v2 = vpop.f32.mrf.mxu0 }
0x566b   : > { %v4289_v3 = vadd.f32 %v4288_v2, %v4264_v0 }
0x566d   : > { %4292 = vst.msk [vmem:[%s486_s17] sm:$0x1] %vm4291_vm15, %v4289_v3 }
0x566e   : > { %4970 = shalt.err (!%p4967_p3)
}
0x566f   : > { %4586 = dma.vmem_to_hbm [thread:$0]  (%p5128_p5), %s4305_s23, 16, %s4307_s29, %s4294_s26  }
0x5670 PF: > { %p4592_p4 = scmp.ge.s32.totalorder %s5005_s21, 2  ;;  %s4318_s16 = sand.u32 1, %s4993_s18  }
0x5671   : > { %s4319_s17 = scalar_lea.sflag [#allocation4], %s4318_s16 }
0x5672   : > { %p4589_p7 = pnand %p4592_p4, %p5132_p6 }
0x5674   : > { %p4590_p8 = pneg %p4589_p7 }
0x5676   : > { %4988 = dma.done.wait (%p4590_p8), %s4319_s17, 16  }
0x5677   : > { %4990 = vsyncadd (%p4590_p8), %s4319_s17, 4294967280  ;;  %s6170_s21 = sld [smem:[#allocation7_spill]]  ;;  %s6173_s18 = smov %s4997_s19 }
0x5678   : > { %s6171_s1 = sld [smem:[#allocation6_spill]] }
0x5679   : > { %s6172_s20 = sld [smem:[#allocation8_spill]] }
0x567d   : > { %p25_p9 = scmp.ge.s32.totalorder %s6170_s21, 4  }
0x567e   : > { %s6174_s19 = smov %s6171_s1 }
0x567f   :  { %27 = sbr.rel (!%p25_p9) target bundleno = 6 (0x6), region = 135 }
0x5684   :  { %4324 = vsyncpa [#allocation4], 1 }
0x5685   :  { %4326 = vsyncpa [#allocation4 + $0x1], 1 }

</bundles_post_ra>
